<compile_context>
chip_gen: v5e
topology: v5e:2x2
jax: 0.10.0
libtpu: 0.0.40
codegen_flags: <defaults>
</compile_context>

<pallas_src>
import math
import functools

import jax
import jax.numpy as jnp
from jax.experimental import pallas as pl
from jax.experimental.pallas import tpu as pltpu


# ---------------------------------------------------------------------------
# Kernel
# ---------------------------------------------------------------------------
def _transformer_layer_kernel(
    xq_ref, xkv_ref,                       # activations: query tile / full seq
    ln1g_ref, ln1b_ref,
    wq_ref, bq_ref, wk_ref, bk_ref, wv_ref, bv_ref,   # attention in-proj (pre-T)
    wo_ref, bo_ref,                        # attention out-proj (pre-T)
    ln2g_ref, ln2b_ref,
    w1_ref, b1_ref, w2_ref, b2_ref,        # FFN (pre-T)
    o_ref,
    *, heads, mxu_dtype,
):
    """One transformer block for one (batch, query-tile) grid cell."""
    eps = 1e-5                       # torch.nn.LayerNorm default
    dim = xq_ref.shape[-1]
    head_dim = dim // heads

    def layer_norm(x, g_ref, b_ref):
        mu = jnp.mean(x, axis=-1, keepdims=True)
        var = jnp.mean(jnp.square(x - mu), axis=-1, keepdims=True)
        return (x - mu) * jax.lax.rsqrt(var + eps) * g_ref[...] + b_ref[...]

    def linear(a, w_ref, b_ref):
        # bf16 (or f32) MXU operands, f32 accumulation; weights already transposed.
        return jnp.dot(a.astype(mxu_dtype), w_ref[...],
                       preferred_element_type=jnp.float32) + b_ref[...]

    x_q = xq_ref[0].astype(jnp.float32)    # (TQ, D) residual stream (query rows)
    x_kv = xkv_ref[0].astype(jnp.float32)  # (S,  D) full sequence (keys/values)

    # ---- PreNorm -> self-attention -> residual -------------------------------
    xn_q = layer_norm(x_q, ln1g_ref, ln1b_ref)
    xn_kv = layer_norm(x_kv, ln1g_ref, ln1b_ref)

    q = linear(xn_q, wq_ref, bq_ref)       # (TQ, D); 1/sqrt(head_dim) folded in
    k = linear(xn_kv, wk_ref, bk_ref)      # (S,  D)
    v = linear(xn_kv, wv_ref, bv_ref)      # (S,  D)

    tq = q.shape[0]
    s = k.shape[0]
    # Batched (head-major) attention instead of a per-head loop + concatenate.
    qh = jnp.transpose(q.reshape(tq, heads, head_dim), (1, 0, 2)).astype(mxu_dtype)
    kh = jnp.transpose(k.reshape(s, heads, head_dim), (1, 0, 2)).astype(mxu_dtype)
    vh = jnp.transpose(v.reshape(s, heads, head_dim), (1, 0, 2)).astype(mxu_dtype)

    scores = jnp.einsum("hqd,hkd->hqk", qh, kh,
                        preferred_element_type=jnp.float32)        # (H, TQ, S)
    m = jnp.max(scores, axis=-1, keepdims=True)
    p = jnp.exp(scores - m)
    denom = jnp.sum(p, axis=-1, keepdims=True)
    p = p * pl.reciprocal(denom, approx=True)                      # softmax (EUP recip)
    ctx = jnp.einsum("hqk,hkd->hqd", p.astype(mxu_dtype), vh,
                     preferred_element_type=jnp.float32)           # (H, TQ, hd)
    attn = jnp.transpose(ctx, (1, 0, 2)).reshape(tq, dim)          # (TQ, D)

    x_res = x_q + linear(attn, wo_ref, bo_ref)                     # residual 1

    # ---- PreNorm -> FeedForward (Linear - GELU - Linear) -> residual ----------
    xn2 = layer_norm(x_res, ln2g_ref, ln2b_ref)
    h = linear(xn2, w1_ref, b1_ref)
    h = 0.5 * h * (1.0 + jax.lax.erf(h * (1.0 / math.sqrt(2.0))))  # exact GELU
    y = linear(h, w2_ref, b2_ref)

    o_ref[0] = (x_res + y).astype(o_ref.dtype)                     # residual 2


# ---------------------------------------------------------------------------
# Wrapper / pallas_call plumbing
# ---------------------------------------------------------------------------
_VMEM_LIMIT = None


def _vmem_limit_bytes():
    """Raise the scoped VMEM limit above the small default, with headroom."""
    global _VMEM_LIMIT
    if _VMEM_LIMIT is None:
        try:
            cap = int(pltpu.get_tpu_info().vmem_capacity_bytes)
        except Exception:
            cap = 64 * 1024 * 1024
        _VMEM_LIMIT = max(32 * 1024 * 1024, cap - 16 * 1024 * 1024)
    return _VMEM_LIMIT


def _choose_query_tile(seq_len):
    for t in (512, 256, 128):
        if seq_len % t == 0:
            return t
    return seq_len  # small / odd sequences: one tile == full sequence


def _build_layer_call(B, S, D, TQ, mlp_dim, out_dtype, heads, mxu_dtype,
                      single_buffer_weights):
    num_q = S // TQ

    def const_spec(shape):
        idx = lambda b, q: (0,) * len(shape)
        if single_buffer_weights:
            # Constant-index parameter blocks do not need double-buffering.
            return pl.BlockSpec(shape, idx, pipeline_mode=pl.Buffered(1))
        return pl.BlockSpec(shape, idx)

    in_specs = [
        pl.BlockSpec((1, TQ, D), lambda b, q: (b, q, 0)),   # x (query rows)
        pl.BlockSpec((1, S, D), lambda b, q: (b, 0, 0)),    # x (full seq, K/V)
        const_spec((1, D)), const_spec((1, D)),             # ln1 gamma / beta
        const_spec((D, D)), const_spec((1, D)),             # Wq^T (scaled), bq (scaled)
        const_spec((D, D)), const_spec((1, D)),             # Wk^T, bk
        const_spec((D, D)), const_spec((1, D)),             # Wv^T, bv
        const_spec((D, D)), const_spec((1, D)),             # Wo^T, bo
        const_spec((1, D)), const_spec((1, D)),             # ln2 gamma / beta
        const_spec((D, mlp_dim)), const_spec((1, mlp_dim)),  # W1^T, b1
        const_spec((mlp_dim, D)), const_spec((1, D)),        # W2^T, b2
    ]

    kernel = functools.partial(_transformer_layer_kernel,
                               heads=heads, mxu_dtype=mxu_dtype)

    return pl.pallas_call(
        kernel,
        out_shape=jax.ShapeDtypeStruct((B, S, D), out_dtype),
        grid=(B, num_q),
        in_specs=in_specs,
        out_specs=pl.BlockSpec((1, TQ, D), lambda b, q: (b, q, 0)),
        compiler_params=pltpu.CompilerParams(
            dimension_semantics=("parallel", "parallel"),
            vmem_limit_bytes=_vmem_limit_bytes(),
        ),
    )


# Whether pipeline_mode=pl.Buffered(1) is supported on this JAX build/device;
# resolved on the first layer call, then reused.
_SINGLE_BUFFER_WEIGHTS_OK = None


def transformer_layer(x, p, *, heads):
    """Apply one transformer block with a Pallas kernel (grid over (B, S//TQ))."""
    global _SINGLE_BUFFER_WEIGHTS_OK
    B, S, D = x.shape
    mlp_dim = p["w1_t"].shape[1]
    TQ = _choose_query_tile(S)
    mxu_dtype = p["wq_t"].dtype

    # NOTE: x is intentionally passed twice (query-tile view + full-sequence
    # view for K/V); do NOT alias the output onto it (in-place would let later
    # query tiles read already-overwritten K/V rows).
    args = (x, x,
            p["ln1_g"], p["ln1_b"],
            p["wq_t"], p["bq"], p["wk_t"], p["bk"], p["wv_t"], p["bv"],
            p["wo_t"], p["bo"],
            p["ln2_g"], p["ln2_b"],
            p["w1_t"], p["b1"], p["w2_t"], p["b2"])

    modes = ([True, False] if _SINGLE_BUFFER_WEIGHTS_OK is None
             else [_SINGLE_BUFFER_WEIGHTS_OK])
    err = None
    for single_buffer in modes:
        try:
            call = _build_layer_call(B, S, D, TQ, mlp_dim, x.dtype, heads,
                                     mxu_dtype, single_buffer)
            out = call(*args)
            _SINGLE_BUFFER_WEIGHTS_OK = single_buffer
            return out
        except Exception as e:  # fall back to default double-buffered weights
            err = e
    raise err


# ---------------------------------------------------------------------------
# Parameters (torch-layout init -> TPU-friendly layout)
# ---------------------------------------------------------------------------
def prepare_layer_params(raw, *, heads, weight_dtype=jnp.bfloat16):
    """Convert torch-layout weights into pre-transposed, MXU-ready tensors.

    - splits in_proj into Wq/Wk/Wv and folds 1/sqrt(head_dim) into Wq, bq
    - transposes every weight so the kernel never does `.T`
    - casts the big matrices to `weight_dtype` (bf16 by default); biases and
      LayerNorm params stay in f32 (element-wise math stays in f32).
    """
    dim = raw["ln1_g"].shape[0]
    head_dim = dim // heads
    scale = 1.0 / math.sqrt(head_dim)

    wq, wk, wv = jnp.split(raw["in_proj_w"], 3, axis=0)   # each (D, D), torch layout
    bq, bk, bv = jnp.split(raw["in_proj_b"], 3, axis=0)

    def t(w):  # pre-transpose + cast for MXU
        return jnp.asarray(w.T, dtype=weight_dtype)

    def row(b):  # 2-D (1, N) f32 row vector (broadcasts cleanly in-kernel)
        return jnp.asarray(b, jnp.float32).reshape(1, -1)

    return {
        "ln1_g": row(raw["ln1_g"]), "ln1_b": row(raw["ln1_b"]),
        "wq_t": t(wq * scale), "bq": row(bq * scale),     # scale folded into Q proj
        "wk_t": t(wk), "bk": row(bk),
        "wv_t": t(wv), "bv": row(bv),
        "wo_t": t(raw["out_proj_w"]), "bo": row(raw["out_proj_b"]),
        "ln2_g": row(raw["ln2_g"]), "ln2_b": row(raw["ln2_b"]),
        "w1_t": t(raw["lin1_w"]), "b1": row(raw["lin1_b"]),
        "w2_t": t(raw["lin2_w"]), "b2": row(raw["lin2_b"]),
    }


def init_transformer_params(key, dim, depth, heads, mlp_dim,
                            weight_dtype=jnp.bfloat16):
    """Deterministic synthetic parameters matching the torch module's shapes."""
    params = []
    for _ in range(depth):
        key, *ks = jax.random.split(key, 10)
        raw = {
            "ln1_g": jnp.ones((dim,), jnp.float32),
            "ln1_b": jnp.zeros((dim,), jnp.float32),
            "in_proj_w": 0.02 * jax.random.normal(ks[0], (3 * dim, dim), jnp.float32),
            "in_proj_b": 0.02 * jax.random.normal(ks[1], (3 * dim,), jnp.float32),
            "out_proj_w": 0.02 * jax.random.normal(ks[2], (dim, dim), jnp.float32),
            "out_proj_b": 0.02 * jax.random.normal(ks[3], (dim,), jnp.float32),
            "ln2_g": jnp.ones((dim,), jnp.float32),
            "ln2_b": jnp.zeros((dim,), jnp.float32),
            "lin1_w": 0.02 * jax.random.normal(ks[4], (mlp_dim, dim), jnp.float32),
            "lin1_b": 0.02 * jax.random.normal(ks[5], (mlp_dim,), jnp.float32),
            "lin2_w": 0.02 * jax.random.normal(ks[6], (dim, mlp_dim), jnp.float32),
            "lin2_b": 0.02 * jax.random.normal(ks[7], (dim,), jnp.float32),
        }
        params.append(prepare_layer_params(raw, heads=heads,
                                           weight_dtype=weight_dtype))
    return params


def transformer_forward(x, params, *, heads, use_pool=False):
    for layer_params in params:
        x = transformer_layer(x, layer_params, heads=heads)
    # TODO(synk): use_pool=True path (nn.AdaptiveAvgPool2d((2, mlp_dim // 2)))
    # is not implemented; the reference default forward uses use_pool=False.
    # Dropout is omitted (reference config uses dropout=0.0 / eval semantics).
    return x


# ---------------------------------------------------------------------------
# Self-test
# ---------------------------------------------------------------------------
if __name__ == "__main__":
    B, S, D = 2, 8, 32
    depth, heads, mlp_dim = 2, 4, 64

    key = jax.random.PRNGKey(0)
    kx, kp = jax.random.split(key)
    x = jax.random.normal(kx, (B, S, D), jnp.float32)
    params = init_transformer_params(kp, D, depth, heads, mlp_dim,
                                     weight_dtype=jnp.bfloat16)

    out = transformer_forward(x, params, heads=heads, use_pool=False)
    out = jax.block_until_ready(out)
    assert out.shape == (B, S, D)
    assert bool(jnp.all(jnp.isfinite(out)))
    print("KERNEL_OK")
</pallas_src>

<mosaic_0001>
module attributes {stable_mosaic.version = 11 : i64} {
  func.func @_transformer_layer_kernel(%arg0: i32, %arg1: i32, %arg2: memref<1x8x32xf32, #tpu.memory_space<vmem>>, %arg3: memref<1x8x32xf32, #tpu.memory_space<vmem>>, %arg4: memref<1x32xf32, #tpu.memory_space<vmem>>, %arg5: memref<1x32xf32, #tpu.memory_space<vmem>>, %arg6: memref<32x32xbf16, #tpu.memory_space<vmem>>, %arg7: memref<1x32xf32, #tpu.memory_space<vmem>>, %arg8: memref<32x32xbf16, #tpu.memory_space<vmem>>, %arg9: memref<1x32xf32, #tpu.memory_space<vmem>>, %arg10: memref<32x32xbf16, #tpu.memory_space<vmem>>, %arg11: memref<1x32xf32, #tpu.memory_space<vmem>>, %arg12: memref<32x32xbf16, #tpu.memory_space<vmem>>, %arg13: memref<1x32xf32, #tpu.memory_space<vmem>>, %arg14: memref<1x32xf32, #tpu.memory_space<vmem>>, %arg15: memref<1x32xf32, #tpu.memory_space<vmem>>, %arg16: memref<32x64xbf16, #tpu.memory_space<vmem>>, %arg17: memref<1x64xf32, #tpu.memory_space<vmem>>, %arg18: memref<64x32xbf16, #tpu.memory_space<vmem>>, %arg19: memref<1x32xf32, #tpu.memory_space<vmem>>, %arg20: memref<1x8x32xf32, #tpu.memory_space<vmem>>) attributes {dimension_semantics = [#tpu.dimension_semantics<parallel>, #tpu.dimension_semantics<parallel>], iteration_bounds = array<i64: 2, 1>, scalar_prefetch = 0 : i64, scratch_operands = 0 : i64, tpu.core_type = #tpu.core_type<tc>, window_params = [{transform_indices = @transform_0, window_bounds = array<i64: 1, 8, 32>}, {transform_indices = @transform_1, window_bounds = array<i64: 1, 8, 32>}, {pipeline_mode = #tpu.pipeline_mode<synchronous>, transform_indices = @transform_2, window_bounds = array<i64: 1, 32>}, {pipeline_mode = #tpu.pipeline_mode<synchronous>, transform_indices = @transform_3, window_bounds = array<i64: 1, 32>}, {pipeline_mode = #tpu.pipeline_mode<synchronous>, transform_indices = @transform_4, window_bounds = array<i64: 32, 32>}, {pipeline_mode = #tpu.pipeline_mode<synchronous>, transform_indices = @transform_5, window_bounds = array<i64: 1, 32>}, {pipeline_mode = #tpu.pipeline_mode<synchronous>, transform_indices = @transform_6, window_bounds = array<i64: 32, 32>}, {pipeline_mode = #tpu.pipeline_mode<synchronous>, transform_indices = @transform_7, window_bounds = array<i64: 1, 32>}, {pipeline_mode = #tpu.pipeline_mode<synchronous>, transform_indices = @transform_8, window_bounds = array<i64: 32, 32>}, {pipeline_mode = #tpu.pipeline_mode<synchronous>, transform_indices = @transform_9, window_bounds = array<i64: 1, 32>}, {pipeline_mode = #tpu.pipeline_mode<synchronous>, transform_indices = @transform_10, window_bounds = array<i64: 32, 32>}, {pipeline_mode = #tpu.pipeline_mode<synchronous>, transform_indices = @transform_11, window_bounds = array<i64: 1, 32>}, {pipeline_mode = #tpu.pipeline_mode<synchronous>, transform_indices = @transform_12, window_bounds = array<i64: 1, 32>}, {pipeline_mode = #tpu.pipeline_mode<synchronous>, transform_indices = @transform_13, window_bounds = array<i64: 1, 32>}, {pipeline_mode = #tpu.pipeline_mode<synchronous>, transform_indices = @transform_14, window_bounds = array<i64: 32, 64>}, {pipeline_mode = #tpu.pipeline_mode<synchronous>, transform_indices = @transform_15, window_bounds = array<i64: 1, 64>}, {pipeline_mode = #tpu.pipeline_mode<synchronous>, transform_indices = @transform_16, window_bounds = array<i64: 64, 32>}, {pipeline_mode = #tpu.pipeline_mode<synchronous>, transform_indices = @transform_17, window_bounds = array<i64: 1, 32>}, {transform_indices = @transform_18, window_bounds = array<i64: 1, 8, 32>}]} {
    %c0 = arith.constant 0 : index
    %c0_0 = arith.constant 0 : index
    %c0_1 = arith.constant 0 : index
    %0 = vector.load %arg2[%c0, %c0_0, %c0_1] : memref<1x8x32xf32, #tpu.memory_space<vmem>>, vector<1x8x32xf32>
    %1 = vector.shape_cast %0 : vector<1x8x32xf32> to vector<8x32xf32>
    %c0_2 = arith.constant 0 : index
    %c0_3 = arith.constant 0 : index
    %c0_4 = arith.constant 0 : index
    %2 = vector.load %arg3[%c0_2, %c0_3, %c0_4] : memref<1x8x32xf32, #tpu.memory_space<vmem>>, vector<1x8x32xf32>
    %3 = vector.shape_cast %2 : vector<1x8x32xf32> to vector<8x32xf32>
    %cst = arith.constant dense<0.000000e+00> : vector<8xf32>
    %4 = vector.multi_reduction <add>, %1, %cst [1] : vector<8x32xf32> to vector<8xf32>
    %5 = vector.shape_cast %4 : vector<8xf32> to vector<8x1xf32>
    %cst_5 = arith.constant 3.200000e+01 : f32
    %6 = vector.broadcast %cst_5 : f32 to vector<8x1xf32>
    %7 = arith.divf %5, %6 : vector<8x1xf32>
    %8 = vector.broadcast %7 : vector<8x1xf32> to vector<8x32xf32>
    %9 = arith.subf %1, %8 : vector<8x32xf32>
    %10 = arith.mulf %9, %9 : vector<8x32xf32>
    %cst_6 = arith.constant dense<0.000000e+00> : vector<8xf32>
    %11 = vector.multi_reduction <add>, %10, %cst_6 [1] : vector<8x32xf32> to vector<8xf32>
    %12 = vector.shape_cast %11 : vector<8xf32> to vector<8x1xf32>
    %cst_7 = arith.constant 3.200000e+01 : f32
    %13 = vector.broadcast %cst_7 : f32 to vector<8x1xf32>
    %14 = arith.divf %12, %13 : vector<8x1xf32>
    %15 = vector.broadcast %7 : vector<8x1xf32> to vector<8x32xf32>
    %16 = arith.subf %1, %15 : vector<8x32xf32>
    %cst_8 = arith.constant 9.99999974E-6 : f32
    %17 = vector.broadcast %cst_8 : f32 to vector<8x1xf32>
    %18 = arith.addf %14, %17 : vector<8x1xf32>
    %19 = math.rsqrt %18 : vector<8x1xf32>
    %20 = vector.broadcast %19 : vector<8x1xf32> to vector<8x32xf32>
    %21 = arith.mulf %16, %20 : vector<8x32xf32>
    %c0_9 = arith.constant 0 : index
    %c0_10 = arith.constant 0 : index
    %22 = vector.load %arg4[%c0_9, %c0_10] : memref<1x32xf32, #tpu.memory_space<vmem>>, vector<1x32xf32>
    %23 = vector.broadcast %22 : vector<1x32xf32> to vector<8x32xf32>
    %24 = arith.mulf %21, %23 : vector<8x32xf32>
    %c0_11 = arith.constant 0 : index
    %c0_12 = arith.constant 0 : index
    %25 = vector.load %arg5[%c0_11, %c0_12] : memref<1x32xf32, #tpu.memory_space<vmem>>, vector<1x32xf32>
    %26 = vector.broadcast %25 : vector<1x32xf32> to vector<8x32xf32>
    %27 = arith.addf %24, %26 : vector<8x32xf32>
    %cst_13 = arith.constant dense<0.000000e+00> : vector<8xf32>
    %28 = vector.multi_reduction <add>, %3, %cst_13 [1] : vector<8x32xf32> to vector<8xf32>
    %29 = vector.shape_cast %28 : vector<8xf32> to vector<8x1xf32>
    %cst_14 = arith.constant 3.200000e+01 : f32
    %30 = vector.broadcast %cst_14 : f32 to vector<8x1xf32>
    %31 = arith.divf %29, %30 : vector<8x1xf32>
    %32 = vector.broadcast %31 : vector<8x1xf32> to vector<8x32xf32>
    %33 = arith.subf %3, %32 : vector<8x32xf32>
    %34 = arith.mulf %33, %33 : vector<8x32xf32>
    %cst_15 = arith.constant dense<0.000000e+00> : vector<8xf32>
    %35 = vector.multi_reduction <add>, %34, %cst_15 [1] : vector<8x32xf32> to vector<8xf32>
    %36 = vector.shape_cast %35 : vector<8xf32> to vector<8x1xf32>
    %cst_16 = arith.constant 3.200000e+01 : f32
    %37 = vector.broadcast %cst_16 : f32 to vector<8x1xf32>
    %38 = arith.divf %36, %37 : vector<8x1xf32>
    %39 = vector.broadcast %31 : vector<8x1xf32> to vector<8x32xf32>
    %40 = arith.subf %3, %39 : vector<8x32xf32>
    %cst_17 = arith.constant 9.99999974E-6 : f32
    %41 = vector.broadcast %cst_17 : f32 to vector<8x1xf32>
    %42 = arith.addf %38, %41 : vector<8x1xf32>
    %43 = math.rsqrt %42 : vector<8x1xf32>
    %44 = vector.broadcast %43 : vector<8x1xf32> to vector<8x32xf32>
    %45 = arith.mulf %40, %44 : vector<8x32xf32>
    %c0_18 = arith.constant 0 : index
    %c0_19 = arith.constant 0 : index
    %46 = vector.load %arg4[%c0_18, %c0_19] : memref<1x32xf32, #tpu.memory_space<vmem>>, vector<1x32xf32>
    %47 = vector.broadcast %46 : vector<1x32xf32> to vector<8x32xf32>
    %48 = arith.mulf %45, %47 : vector<8x32xf32>
    %c0_20 = arith.constant 0 : index
    %c0_21 = arith.constant 0 : index
    %49 = vector.load %arg5[%c0_20, %c0_21] : memref<1x32xf32, #tpu.memory_space<vmem>>, vector<1x32xf32>
    %50 = vector.broadcast %49 : vector<1x32xf32> to vector<8x32xf32>
    %51 = arith.addf %48, %50 : vector<8x32xf32>
    %52 = arith.truncf %27 : vector<8x32xf32> to vector<8x32xbf16>
    %c0_22 = arith.constant 0 : index
    %c0_23 = arith.constant 0 : index
    %53 = vector.load %arg6[%c0_22, %c0_23] : memref<32x32xbf16, #tpu.memory_space<vmem>>, vector<32x32xbf16>
    %cst_24 = arith.constant dense<0.000000e+00> : vector<8x32xf32>
    %54 = tpu.matmul %52, %53, %cst_24 {dimension_numbers = #tpu.dot_dimension_numbers<[1], [0], [0], [1], [0, 0, 1, 1], [], []>} : vector<8x32xbf16>, vector<32x32xbf16>, vector<8x32xf32> -> vector<8x32xf32>
    %c0_25 = arith.constant 0 : index
    %c0_26 = arith.constant 0 : index
    %55 = vector.load %arg7[%c0_25, %c0_26] : memref<1x32xf32, #tpu.memory_space<vmem>>, vector<1x32xf32>
    %56 = vector.broadcast %55 : vector<1x32xf32> to vector<8x32xf32>
    %57 = arith.addf %54, %56 : vector<8x32xf32>
    %58 = arith.truncf %51 : vector<8x32xf32> to vector<8x32xbf16>
    %c0_27 = arith.constant 0 : index
    %c0_28 = arith.constant 0 : index
    %59 = vector.load %arg8[%c0_27, %c0_28] : memref<32x32xbf16, #tpu.memory_space<vmem>>, vector<32x32xbf16>
    %cst_29 = arith.constant dense<0.000000e+00> : vector<8x32xf32>
    %60 = tpu.matmul %58, %59, %cst_29 {dimension_numbers = #tpu.dot_dimension_numbers<[1], [0], [0], [1], [0, 0, 1, 1], [], []>} : vector<8x32xbf16>, vector<32x32xbf16>, vector<8x32xf32> -> vector<8x32xf32>
    %c0_30 = arith.constant 0 : index
    %c0_31 = arith.constant 0 : index
    %61 = vector.load %arg9[%c0_30, %c0_31] : memref<1x32xf32, #tpu.memory_space<vmem>>, vector<1x32xf32>
    %62 = vector.broadcast %61 : vector<1x32xf32> to vector<8x32xf32>
    %63 = arith.addf %60, %62 : vector<8x32xf32>
    %64 = arith.truncf %51 : vector<8x32xf32> to vector<8x32xbf16>
    %c0_32 = arith.constant 0 : index
    %c0_33 = arith.constant 0 : index
    %65 = vector.load %arg10[%c0_32, %c0_33] : memref<32x32xbf16, #tpu.memory_space<vmem>>, vector<32x32xbf16>
    %cst_34 = arith.constant dense<0.000000e+00> : vector<8x32xf32>
    %66 = tpu.matmul %64, %65, %cst_34 {dimension_numbers = #tpu.dot_dimension_numbers<[1], [0], [0], [1], [0, 0, 1, 1], [], []>} : vector<8x32xbf16>, vector<32x32xbf16>, vector<8x32xf32> -> vector<8x32xf32>
    %c0_35 = arith.constant 0 : index
    %c0_36 = arith.constant 0 : index
    %67 = vector.load %arg11[%c0_35, %c0_36] : memref<1x32xf32, #tpu.memory_space<vmem>>, vector<1x32xf32>
    %68 = vector.broadcast %67 : vector<1x32xf32> to vector<8x32xf32>
    %69 = arith.addf %66, %68 : vector<8x32xf32>
    %70 = vector.shape_cast %57 : vector<8x32xf32> to vector<8x4x8xf32>
    %71 = tpu.transpose %70, [1, 0, 2] : vector<8x4x8xf32> -> vector<4x8x8xf32>
    %72 = arith.truncf %71 : vector<4x8x8xf32> to vector<4x8x8xbf16>
    %73 = vector.shape_cast %63 : vector<8x32xf32> to vector<8x4x8xf32>
    %74 = tpu.transpose %73, [1, 0, 2] : vector<8x4x8xf32> -> vector<4x8x8xf32>
    %75 = arith.truncf %74 : vector<4x8x8xf32> to vector<4x8x8xbf16>
    %76 = vector.shape_cast %69 : vector<8x32xf32> to vector<8x4x8xf32>
    %77 = tpu.transpose %76, [1, 0, 2] : vector<8x4x8xf32> -> vector<4x8x8xf32>
    %78 = arith.truncf %77 : vector<4x8x8xf32> to vector<4x8x8xbf16>
    "tpu.trace_start"() <{level = 10 : i32, message = "hqd,hkd->hqk"}> : () -> ()
    %cst_37 = arith.constant dense<0.000000e+00> : vector<4x8x8xf32>
    %79 = tpu.matmul %72, %75, %cst_37 {dimension_numbers = #tpu.dot_dimension_numbers<[2], [2], [1], [1], [0, 0, 0, 1, 1, 1], [0], [0]>} : vector<4x8x8xbf16>, vector<4x8x8xbf16>, vector<4x8x8xf32> -> vector<4x8x8xf32>
    "tpu.trace_stop"() : () -> ()
    %cst_38 = arith.constant dense<0xFF800000> : vector<4x8xf32>
    %80 = vector.multi_reduction <maximumf>, %79, %cst_38 [2] : vector<4x8x8xf32> to vector<4x8xf32>
    %81 = vector.shape_cast %80 : vector<4x8xf32> to vector<4x8x1xf32>
    %82 = vector.broadcast %81 : vector<4x8x1xf32> to vector<4x8x8xf32>
    %83 = arith.subf %79, %82 : vector<4x8x8xf32>
    %84 = math.exp %83 : vector<4x8x8xf32>
    %cst_39 = arith.constant dense<0.000000e+00> : vector<4x8xf32>
    %85 = vector.multi_reduction <add>, %84, %cst_39 [2] : vector<4x8x8xf32> to vector<4x8xf32>
    %86 = vector.shape_cast %85 : vector<4x8xf32> to vector<4x8x1xf32>
    %87 = tpu.reciprocal %86 {approx = true} : vector<4x8x1xf32> -> vector<4x8x1xf32>
    %88 = vector.broadcast %87 : vector<4x8x1xf32> to vector<4x8x8xf32>
    %89 = arith.mulf %84, %88 : vector<4x8x8xf32>
    %90 = arith.truncf %89 : vector<4x8x8xf32> to vector<4x8x8xbf16>
    "tpu.trace_start"() <{level = 10 : i32, message = "hqk,hkd->hqd"}> : () -> ()
    %cst_40 = arith.constant dense<0.000000e+00> : vector<4x8x8xf32>
    %91 = tpu.matmul %90, %78, %cst_40 {dimension_numbers = #tpu.dot_dimension_numbers<[2], [1], [1], [2], [0, 0, 0, 1, 1, 2], [0], [0]>} : vector<4x8x8xbf16>, vector<4x8x8xbf16>, vector<4x8x8xf32> -> vector<4x8x8xf32>
    "tpu.trace_stop"() : () -> ()
    %92 = tpu.transpose %91, [1, 0, 2] : vector<4x8x8xf32> -> vector<8x4x8xf32>
    %93 = vector.shape_cast %92 : vector<8x4x8xf32> to vector<8x32xf32>
    %94 = arith.truncf %93 : vector<8x32xf32> to vector<8x32xbf16>
    %c0_41 = arith.constant 0 : index
    %c0_42 = arith.constant 0 : index
    %95 = vector.load %arg12[%c0_41, %c0_42] : memref<32x32xbf16, #tpu.memory_space<vmem>>, vector<32x32xbf16>
    %cst_43 = arith.constant dense<0.000000e+00> : vector<8x32xf32>
    %96 = tpu.matmul %94, %95, %cst_43 {dimension_numbers = #tpu.dot_dimension_numbers<[1], [0], [0], [1], [0, 0, 1, 1], [], []>} : vector<8x32xbf16>, vector<32x32xbf16>, vector<8x32xf32> -> vector<8x32xf32>
    %c0_44 = arith.constant 0 : index
    %c0_45 = arith.constant 0 : index
    %97 = vector.load %arg13[%c0_44, %c0_45] : memref<1x32xf32, #tpu.memory_space<vmem>>, vector<1x32xf32>
    %98 = vector.broadcast %97 : vector<1x32xf32> to vector<8x32xf32>
    %99 = arith.addf %96, %98 : vector<8x32xf32>
    %100 = arith.addf %1, %99 : vector<8x32xf32>
    %cst_46 = arith.constant dense<0.000000e+00> : vector<8xf32>
    %101 = vector.multi_reduction <add>, %100, %cst_46 [1] : vector<8x32xf32> to vector<8xf32>
    %102 = vector.shape_cast %101 : vector<8xf32> to vector<8x1xf32>
    %cst_47 = arith.constant 3.200000e+01 : f32
    %103 = vector.broadcast %cst_47 : f32 to vector<8x1xf32>
    %104 = arith.divf %102, %103 : vector<8x1xf32>
    %105 = vector.broadcast %104 : vector<8x1xf32> to vector<8x32xf32>
    %106 = arith.subf %100, %105 : vector<8x32xf32>
    %107 = arith.mulf %106, %106 : vector<8x32xf32>
    %cst_48 = arith.constant dense<0.000000e+00> : vector<8xf32>
    %108 = vector.multi_reduction <add>, %107, %cst_48 [1] : vector<8x32xf32> to vector<8xf32>
    %109 = vector.shape_cast %108 : vector<8xf32> to vector<8x1xf32>
    %cst_49 = arith.constant 3.200000e+01 : f32
    %110 = vector.broadcast %cst_49 : f32 to vector<8x1xf32>
    %111 = arith.divf %109, %110 : vector<8x1xf32>
    %112 = vector.broadcast %104 : vector<8x1xf32> to vector<8x32xf32>
    %113 = arith.subf %100, %112 : vector<8x32xf32>
    %cst_50 = arith.constant 9.99999974E-6 : f32
    %114 = vector.broadcast %cst_50 : f32 to vector<8x1xf32>
    %115 = arith.addf %111, %114 : vector<8x1xf32>
    %116 = math.rsqrt %115 : vector<8x1xf32>
    %117 = vector.broadcast %116 : vector<8x1xf32> to vector<8x32xf32>
    %118 = arith.mulf %113, %117 : vector<8x32xf32>
    %c0_51 = arith.constant 0 : index
    %c0_52 = arith.constant 0 : index
    %119 = vector.load %arg14[%c0_51, %c0_52] : memref<1x32xf32, #tpu.memory_space<vmem>>, vector<1x32xf32>
    %120 = vector.broadcast %119 : vector<1x32xf32> to vector<8x32xf32>
    %121 = arith.mulf %118, %120 : vector<8x32xf32>
    %c0_53 = arith.constant 0 : index
    %c0_54 = arith.constant 0 : index
    %122 = vector.load %arg15[%c0_53, %c0_54] : memref<1x32xf32, #tpu.memory_space<vmem>>, vector<1x32xf32>
    %123 = vector.broadcast %122 : vector<1x32xf32> to vector<8x32xf32>
    %124 = arith.addf %121, %123 : vector<8x32xf32>
    %125 = arith.truncf %124 : vector<8x32xf32> to vector<8x32xbf16>
    %c0_55 = arith.constant 0 : index
    %c0_56 = arith.constant 0 : index
    %126 = vector.load %arg16[%c0_55, %c0_56] : memref<32x64xbf16, #tpu.memory_space<vmem>>, vector<32x64xbf16>
    %cst_57 = arith.constant dense<0.000000e+00> : vector<8x64xf32>
    %127 = tpu.matmul %125, %126, %cst_57 {dimension_numbers = #tpu.dot_dimension_numbers<[1], [0], [0], [1], [0, 0, 1, 1], [], []>} : vector<8x32xbf16>, vector<32x64xbf16>, vector<8x64xf32> -> vector<8x64xf32>
    %c0_58 = arith.constant 0 : index
    %c0_59 = arith.constant 0 : index
    %128 = vector.load %arg17[%c0_58, %c0_59] : memref<1x64xf32, #tpu.memory_space<vmem>>, vector<1x64xf32>
    %129 = vector.broadcast %128 : vector<1x64xf32> to vector<8x64xf32>
    %130 = arith.addf %127, %129 : vector<8x64xf32>
    %cst_60 = arith.constant 5.000000e-01 : f32
    %131 = vector.broadcast %cst_60 : f32 to vector<8x64xf32>
    %132 = arith.mulf %131, %130 : vector<8x64xf32>
    %cst_61 = arith.constant 0.707106769 : f32
    %133 = vector.broadcast %cst_61 : f32 to vector<8x64xf32>
    %134 = arith.mulf %130, %133 : vector<8x64xf32>
    %135 = math.erf %134 : vector<8x64xf32>
    %cst_62 = arith.constant 1.000000e+00 : f32
    %136 = vector.broadcast %cst_62 : f32 to vector<8x64xf32>
    %137 = arith.addf %136, %135 : vector<8x64xf32>
    %138 = arith.mulf %132, %137 : vector<8x64xf32>
    %139 = arith.truncf %138 : vector<8x64xf32> to vector<8x64xbf16>
    %c0_63 = arith.constant 0 : index
    %c0_64 = arith.constant 0 : index
    %140 = vector.load %arg18[%c0_63, %c0_64] : memref<64x32xbf16, #tpu.memory_space<vmem>>, vector<64x32xbf16>
    %cst_65 = arith.constant dense<0.000000e+00> : vector<8x32xf32>
    %141 = tpu.matmul %139, %140, %cst_65 {dimension_numbers = #tpu.dot_dimension_numbers<[1], [0], [0], [1], [0, 0, 1, 1], [], []>} : vector<8x64xbf16>, vector<64x32xbf16>, vector<8x32xf32> -> vector<8x32xf32>
    %c0_66 = arith.constant 0 : index
    %c0_67 = arith.constant 0 : index
    %142 = vector.load %arg19[%c0_66, %c0_67] : memref<1x32xf32, #tpu.memory_space<vmem>>, vector<1x32xf32>
    %143 = vector.broadcast %142 : vector<1x32xf32> to vector<8x32xf32>
    %144 = arith.addf %141, %143 : vector<8x32xf32>
    %145 = arith.addf %100, %144 : vector<8x32xf32>
    %c0_68 = arith.constant 0 : index
    %c0_69 = arith.constant 0 : index
    %c0_70 = arith.constant 0 : index
    %146 = vector.load %arg20[%c0_68, %c0_69, %c0_70] : memref<1x8x32xf32, #tpu.memory_space<vmem>>, vector<1x8x32xf32>
    %147 = vector.shape_cast %146 : vector<1x8x32xf32> to vector<8x32xf32>
    %148 = vector.shape_cast %145 : vector<8x32xf32> to vector<1x8x32xf32>
    tpu.vector_store %arg20[%c0_68, %c0_69, %c0_70], %148 {strides = array<i32>} : memref<1x8x32xf32, #tpu.memory_space<vmem>>, vector<1x8x32xf32>,
    return
  }
  func.func @transform_0(%arg0: i32, %arg1: i32) -> (i32, i32, i32) {
    %c0_i32 = arith.constant 0 : i32
    %c0_i32_0 = arith.constant 0 : i32
    return %arg0, %arg1, %c0_i32 : i32, i32, i32
  }
  func.func @transform_1(%arg0: i32, %arg1: i32) -> (i32, i32, i32) {
    %c0_i32 = arith.constant 0 : i32
    %c0_i32_0 = arith.constant 0 : i32
    %c0_i32_1 = arith.constant 0 : i32
    return %arg0, %c0_i32, %c0_i32_0 : i32, i32, i32
  }
  func.func @transform_2(%arg0: i32, %arg1: i32) -> (i32, i32) {
    %c0_i32 = arith.constant 0 : i32
    %c0_i32_0 = arith.constant 0 : i32
    %c0_i32_1 = arith.constant 0 : i32
    return %c0_i32, %c0_i32_0 : i32, i32
  }
  func.func @transform_3(%arg0: i32, %arg1: i32) -> (i32, i32) {
    %c0_i32 = arith.constant 0 : i32
    %c0_i32_0 = arith.constant 0 : i32
    %c0_i32_1 = arith.constant 0 : i32
    return %c0_i32, %c0_i32_0 : i32, i32
  }
  func.func @transform_4(%arg0: i32, %arg1: i32) -> (i32, i32) {
    %c0_i32 = arith.constant 0 : i32
    %c0_i32_0 = arith.constant 0 : i32
    %c0_i32_1 = arith.constant 0 : i32
    return %c0_i32, %c0_i32_0 : i32, i32
  }
  func.func @transform_5(%arg0: i32, %arg1: i32) -> (i32, i32) {
    %c0_i32 = arith.constant 0 : i32
    %c0_i32_0 = arith.constant 0 : i32
    %c0_i32_1 = arith.constant 0 : i32
    return %c0_i32, %c0_i32_0 : i32, i32
  }
  func.func @transform_6(%arg0: i32, %arg1: i32) -> (i32, i32) {
    %c0_i32 = arith.constant 0 : i32
    %c0_i32_0 = arith.constant 0 : i32
    %c0_i32_1 = arith.constant 0 : i32
    return %c0_i32, %c0_i32_0 : i32, i32
  }
  func.func @transform_7(%arg0: i32, %arg1: i32) -> (i32, i32) {
    %c0_i32 = arith.constant 0 : i32
    %c0_i32_0 = arith.constant 0 : i32
    %c0_i32_1 = arith.constant 0 : i32
    return %c0_i32, %c0_i32_0 : i32, i32
  }
  func.func @transform_8(%arg0: i32, %arg1: i32) -> (i32, i32) {
    %c0_i32 = arith.constant 0 : i32
    %c0_i32_0 = arith.constant 0 : i32
    %c0_i32_1 = arith.constant 0 : i32
    return %c0_i32, %c0_i32_0 : i32, i32
  }
  func.func @transform_9(%arg0: i32, %arg1: i32) -> (i32, i32) {
    %c0_i32 = arith.constant 0 : i32
    %c0_i32_0 = arith.constant 0 : i32
    %c0_i32_1 = arith.constant 0 : i32
    return %c0_i32, %c0_i32_0 : i32, i32
  }
  func.func @transform_10(%arg0: i32, %arg1: i32) -> (i32, i32) {
    %c0_i32 = arith.constant 0 : i32
    %c0_i32_0 = arith.constant 0 : i32
    %c0_i32_1 = arith.constant 0 : i32
    return %c0_i32, %c0_i32_0 : i32, i32
  }
  func.func @transform_11(%arg0: i32, %arg1: i32) -> (i32, i32) {
    %c0_i32 = arith.constant 0 : i32
    %c0_i32_0 = arith.constant 0 : i32
    %c0_i32_1 = arith.constant 0 : i32
    return %c0_i32, %c0_i32_0 : i32, i32
  }
  func.func @transform_12(%arg0: i32, %arg1: i32) -> (i32, i32) {
    %c0_i32 = arith.constant 0 : i32
    %c0_i32_0 = arith.constant 0 : i32
    %c0_i32_1 = arith.constant 0 : i32
    return %c0_i32, %c0_i32_0 : i32, i32
  }
  func.func @transform_13(%arg0: i32, %arg1: i32) -> (i32, i32) {
    %c0_i32 = arith.constant 0 : i32
    %c0_i32_0 = arith.constant 0 : i32
    %c0_i32_1 = arith.constant 0 : i32
    return %c0_i32, %c0_i32_0 : i32, i32
  }
  func.func @transform_14(%arg0: i32, %arg1: i32) -> (i32, i32) {
    %c0_i32 = arith.constant 0 : i32
    %c0_i32_0 = arith.constant 0 : i32
    %c0_i32_1 = arith.constant 0 : i32
    return %c0_i32, %c0_i32_0 : i32, i32
  }
  func.func @transform_15(%arg0: i32, %arg1: i32) -> (i32, i32) {
    %c0_i32 = arith.constant 0 : i32
    %c0_i32_0 = arith.constant 0 : i32
    %c0_i32_1 = arith.constant 0 : i32
    return %c0_i32, %c0_i32_0 : i32, i32
  }
  func.func @transform_16(%arg0: i32, %arg1: i32) -> (i32, i32) {
    %c0_i32 = arith.constant 0 : i32
    %c0_i32_0 = arith.constant 0 : i32
    %c0_i32_1 = arith.constant 0 : i32
    return %c0_i32, %c0_i32_0 : i32, i32
  }
  func.func @transform_17(%arg0: i32, %arg1: i32) -> (i32, i32) {
    %c0_i32 = arith.constant 0 : i32
    %c0_i32_0 = arith.constant 0 : i32
    %c0_i32_1 = arith.constant 0 : i32
    return %c0_i32, %c0_i32_0 : i32, i32
  }
  func.func @transform_18(%arg0: i32, %arg1: i32) -> (i32, i32, i32) {
    %c0_i32 = arith.constant 0 : i32
    %c0_i32_0 = arith.constant 0 : i32
    return %arg0, %arg1, %c0_i32 : i32, i32, i32
  }
}

module attributes {stable_mosaic.version = 11 : i64} {
  func.func @_transformer_layer_kernel(%arg0: i32, %arg1: i32, %arg2: memref<1x8x32xf32, #tpu.memory_space<vmem>>, %arg3: memref<1x8x32xf32, #tpu.memory_space<vmem>>, %arg4: memref<1x32xf32, #tpu.memory_space<vmem>>, %arg5: memref<1x32xf32, #tpu.memory_space<vmem>>, %arg6: memref<32x32xbf16, #tpu.memory_space<vmem>>, %arg7: memref<1x32xf32, #tpu.memory_space<vmem>>, %arg8: memref<32x32xbf16, #tpu.memory_space<vmem>>, %arg9: memref<1x32xf32, #tpu.memory_space<vmem>>, %arg10: memref<32x32xbf16, #tpu.memory_space<vmem>>, %arg11: memref<1x32xf32, #tpu.memory_space<vmem>>, %arg12: memref<32x32xbf16, #tpu.memory_space<vmem>>, %arg13: memref<1x32xf32, #tpu.memory_space<vmem>>, %arg14: memref<1x32xf32, #tpu.memory_space<vmem>>, %arg15: memref<1x32xf32, #tpu.memory_space<vmem>>, %arg16: memref<32x64xbf16, #tpu.memory_space<vmem>>, %arg17: memref<1x64xf32, #tpu.memory_space<vmem>>, %arg18: memref<64x32xbf16, #tpu.memory_space<vmem>>, %arg19: memref<1x32xf32, #tpu.memory_space<vmem>>, %arg20: memref<1x8x32xf32, #tpu.memory_space<vmem>>) attributes {dimension_semantics = [#tpu.dimension_semantics<parallel>, #tpu.dimension_semantics<parallel>], iteration_bounds = array<i64: 2, 1>, scalar_prefetch = 0 : i64, scratch_operands = 0 : i64, tpu.core_type = #tpu.core_type<tc>, window_params = [{transform_indices = @transform_0, window_bounds = array<i64: 1, 8, 32>}, {transform_indices = @transform_1, window_bounds = array<i64: 1, 8, 32>}, {pipeline_mode = #tpu.pipeline_mode<synchronous>, transform_indices = @transform_2, window_bounds = array<i64: 1, 32>}, {pipeline_mode = #tpu.pipeline_mode<synchronous>, transform_indices = @transform_3, window_bounds = array<i64: 1, 32>}, {pipeline_mode = #tpu.pipeline_mode<synchronous>, transform_indices = @transform_4, window_bounds = array<i64: 32, 32>}, {pipeline_mode = #tpu.pipeline_mode<synchronous>, transform_indices = @transform_5, window_bounds = array<i64: 1, 32>}, {pipeline_mode = #tpu.pipeline_mode<synchronous>, transform_indices = @transform_6, window_bounds = array<i64: 32, 32>}, {pipeline_mode = #tpu.pipeline_mode<synchronous>, transform_indices = @transform_7, window_bounds = array<i64: 1, 32>}, {pipeline_mode = #tpu.pipeline_mode<synchronous>, transform_indices = @transform_8, window_bounds = array<i64: 32, 32>}, {pipeline_mode = #tpu.pipeline_mode<synchronous>, transform_indices = @transform_9, window_bounds = array<i64: 1, 32>}, {pipeline_mode = #tpu.pipeline_mode<synchronous>, transform_indices = @transform_10, window_bounds = array<i64: 32, 32>}, {pipeline_mode = #tpu.pipeline_mode<synchronous>, transform_indices = @transform_11, window_bounds = array<i64: 1, 32>}, {pipeline_mode = #tpu.pipeline_mode<synchronous>, transform_indices = @transform_12, window_bounds = array<i64: 1, 32>}, {pipeline_mode = #tpu.pipeline_mode<synchronous>, transform_indices = @transform_13, window_bounds = array<i64: 1, 32>}, {pipeline_mode = #tpu.pipeline_mode<synchronous>, transform_indices = @transform_14, window_bounds = array<i64: 32, 64>}, {pipeline_mode = #tpu.pipeline_mode<synchronous>, transform_indices = @transform_15, window_bounds = array<i64: 1, 64>}, {pipeline_mode = #tpu.pipeline_mode<synchronous>, transform_indices = @transform_16, window_bounds = array<i64: 64, 32>}, {pipeline_mode = #tpu.pipeline_mode<synchronous>, transform_indices = @transform_17, window_bounds = array<i64: 1, 32>}, {transform_indices = @transform_18, window_bounds = array<i64: 1, 8, 32>}]} {
    %c0 = arith.constant 0 : index
    %c0_0 = arith.constant 0 : index
    %c0_1 = arith.constant 0 : index
    %0 = vector.load %arg2[%c0, %c0_0, %c0_1] : memref<1x8x32xf32, #tpu.memory_space<vmem>>, vector<1x8x32xf32>
    %1 = vector.shape_cast %0 : vector<1x8x32xf32> to vector<8x32xf32>
    %c0_2 = arith.constant 0 : index
    %c0_3 = arith.constant 0 : index
    %c0_4 = arith.constant 0 : index
    %2 = vector.load %arg3[%c0_2, %c0_3, %c0_4] : memref<1x8x32xf32, #tpu.memory_space<vmem>>, vector<1x8x32xf32>
    %3 = vector.shape_cast %2 : vector<1x8x32xf32> to vector<8x32xf32>
    %cst = arith.constant dense<0.000000e+00> : vector<8xf32>
    %4 = vector.multi_reduction <add>, %1, %cst [1] : vector<8x32xf32> to vector<8xf32>
    %5 = vector.shape_cast %4 : vector<8xf32> to vector<8x1xf32>
    %cst_5 = arith.constant 3.200000e+01 : f32
    %6 = vector.broadcast %cst_5 : f32 to vector<8x1xf32>
    %7 = arith.divf %5, %6 : vector<8x1xf32>
    %8 = vector.broadcast %7 : vector<8x1xf32> to vector<8x32xf32>
    %9 = arith.subf %1, %8 : vector<8x32xf32>
    %10 = arith.mulf %9, %9 : vector<8x32xf32>
    %cst_6 = arith.constant dense<0.000000e+00> : vector<8xf32>
    %11 = vector.multi_reduction <add>, %10, %cst_6 [1] : vector<8x32xf32> to vector<8xf32>
    %12 = vector.shape_cast %11 : vector<8xf32> to vector<8x1xf32>
    %cst_7 = arith.constant 3.200000e+01 : f32
    %13 = vector.broadcast %cst_7 : f32 to vector<8x1xf32>
    %14 = arith.divf %12, %13 : vector<8x1xf32>
    %15 = vector.broadcast %7 : vector<8x1xf32> to vector<8x32xf32>
    %16 = arith.subf %1, %15 : vector<8x32xf32>
    %cst_8 = arith.constant 9.99999974E-6 : f32
    %17 = vector.broadcast %cst_8 : f32 to vector<8x1xf32>
    %18 = arith.addf %14, %17 : vector<8x1xf32>
    %19 = math.rsqrt %18 : vector<8x1xf32>
    %20 = vector.broadcast %19 : vector<8x1xf32> to vector<8x32xf32>
    %21 = arith.mulf %16, %20 : vector<8x32xf32>
    %c0_9 = arith.constant 0 : index
    %c0_10 = arith.constant 0 : index
    %22 = vector.load %arg4[%c0_9, %c0_10] : memref<1x32xf32, #tpu.memory_space<vmem>>, vector<1x32xf32>
    %23 = vector.broadcast %22 : vector<1x32xf32> to vector<8x32xf32>
    %24 = arith.mulf %21, %23 : vector<8x32xf32>
    %c0_11 = arith.constant 0 : index
    %c0_12 = arith.constant 0 : index
    %25 = vector.load %arg5[%c0_11, %c0_12] : memref<1x32xf32, #tpu.memory_space<vmem>>, vector<1x32xf32>
    %26 = vector.broadcast %25 : vector<1x32xf32> to vector<8x32xf32>
    %27 = arith.addf %24, %26 : vector<8x32xf32>
    %cst_13 = arith.constant dense<0.000000e+00> : vector<8xf32>
    %28 = vector.multi_reduction <add>, %3, %cst_13 [1] : vector<8x32xf32> to vector<8xf32>
    %29 = vector.shape_cast %28 : vector<8xf32> to vector<8x1xf32>
    %cst_14 = arith.constant 3.200000e+01 : f32
    %30 = vector.broadcast %cst_14 : f32 to vector<8x1xf32>
    %31 = arith.divf %29, %30 : vector<8x1xf32>
    %32 = vector.broadcast %31 : vector<8x1xf32> to vector<8x32xf32>
    %33 = arith.subf %3, %32 : vector<8x32xf32>
    %34 = arith.mulf %33, %33 : vector<8x32xf32>
    %cst_15 = arith.constant dense<0.000000e+00> : vector<8xf32>
    %35 = vector.multi_reduction <add>, %34, %cst_15 [1] : vector<8x32xf32> to vector<8xf32>
    %36 = vector.shape_cast %35 : vector<8xf32> to vector<8x1xf32>
    %cst_16 = arith.constant 3.200000e+01 : f32
    %37 = vector.broadcast %cst_16 : f32 to vector<8x1xf32>
    %38 = arith.divf %36, %37 : vector<8x1xf32>
    %39 = vector.broadcast %31 : vector<8x1xf32> to vector<8x32xf32>
    %40 = arith.subf %3, %39 : vector<8x32xf32>
    %cst_17 = arith.constant 9.99999974E-6 : f32
    %41 = vector.broadcast %cst_17 : f32 to vector<8x1xf32>
    %42 = arith.addf %38, %41 : vector<8x1xf32>
    %43 = math.rsqrt %42 : vector<8x1xf32>
    %44 = vector.broadcast %43 : vector<8x1xf32> to vector<8x32xf32>
    %45 = arith.mulf %40, %44 : vector<8x32xf32>
    %c0_18 = arith.constant 0 : index
    %c0_19 = arith.constant 0 : index
    %46 = vector.load %arg4[%c0_18, %c0_19] : memref<1x32xf32, #tpu.memory_space<vmem>>, vector<1x32xf32>
    %47 = vector.broadcast %46 : vector<1x32xf32> to vector<8x32xf32>
    %48 = arith.mulf %45, %47 : vector<8x32xf32>
    %c0_20 = arith.constant 0 : index
    %c0_21 = arith.constant 0 : index
    %49 = vector.load %arg5[%c0_20, %c0_21] : memref<1x32xf32, #tpu.memory_space<vmem>>, vector<1x32xf32>
    %50 = vector.broadcast %49 : vector<1x32xf32> to vector<8x32xf32>
    %51 = arith.addf %48, %50 : vector<8x32xf32>
    %52 = arith.truncf %27 : vector<8x32xf32> to vector<8x32xbf16>
    %c0_22 = arith.constant 0 : index
    %c0_23 = arith.constant 0 : index
    %53 = vector.load %arg6[%c0_22, %c0_23] : memref<32x32xbf16, #tpu.memory_space<vmem>>, vector<32x32xbf16>
    %cst_24 = arith.constant dense<0.000000e+00> : vector<8x32xf32>
    %54 = tpu.matmul %52, %53, %cst_24 {dimension_numbers = #tpu.dot_dimension_numbers<[1], [0], [0], [1], [0, 0, 1, 1], [], []>} : vector<8x32xbf16>, vector<32x32xbf16>, vector<8x32xf32> -> vector<8x32xf32>
    %c0_25 = arith.constant 0 : index
    %c0_26 = arith.constant 0 : index
    %55 = vector.load %arg7[%c0_25, %c0_26] : memref<1x32xf32, #tpu.memory_space<vmem>>, vector<1x32xf32>
    %56 = vector.broadcast %55 : vector<1x32xf32> to vector<8x32xf32>
    %57 = arith.addf %54, %56 : vector<8x32xf32>
    %58 = arith.truncf %51 : vector<8x32xf32> to vector<8x32xbf16>
    %c0_27 = arith.constant 0 : index
    %c0_28 = arith.constant 0 : index
    %59 = vector.load %arg8[%c0_27, %c0_28] : memref<32x32xbf16, #tpu.memory_space<vmem>>, vector<32x32xbf16>
    %cst_29 = arith.constant dense<0.000000e+00> : vector<8x32xf32>
    %60 = tpu.matmul %58, %59, %cst_29 {dimension_numbers = #tpu.dot_dimension_numbers<[1], [0], [0], [1], [0, 0, 1, 1], [], []>} : vector<8x32xbf16>, vector<32x32xbf16>, vector<8x32xf32> -> vector<8x32xf32>
    %c0_30 = arith.constant 0 : index
    %c0_31 = arith.constant 0 : index
    %61 = vector.load %arg9[%c0_30, %c0_31] : memref<1x32xf32, #tpu.memory_space<vmem>>, vector<1x32xf32>
    %62 = vector.broadcast %61 : vector<1x32xf32> to vector<8x32xf32>
    %63 = arith.addf %60, %62 : vector<8x32xf32>
    %64 = arith.truncf %51 : vector<8x32xf32> to vector<8x32xbf16>
    %c0_32 = arith.constant 0 : index
    %c0_33 = arith.constant 0 : index
    %65 = vector.load %arg10[%c0_32, %c0_33] : memref<32x32xbf16, #tpu.memory_space<vmem>>, vector<32x32xbf16>
    %cst_34 = arith.constant dense<0.000000e+00> : vector<8x32xf32>
    %66 = tpu.matmul %64, %65, %cst_34 {dimension_numbers = #tpu.dot_dimension_numbers<[1], [0], [0], [1], [0, 0, 1, 1], [], []>} : vector<8x32xbf16>, vector<32x32xbf16>, vector<8x32xf32> -> vector<8x32xf32>
    %c0_35 = arith.constant 0 : index
    %c0_36 = arith.constant 0 : index
    %67 = vector.load %arg11[%c0_35, %c0_36] : memref<1x32xf32, #tpu.memory_space<vmem>>, vector<1x32xf32>
    %68 = vector.broadcast %67 : vector<1x32xf32> to vector<8x32xf32>
    %69 = arith.addf %66, %68 : vector<8x32xf32>
    %70 = vector.shape_cast %57 : vector<8x32xf32> to vector<8x4x8xf32>
    %71 = tpu.transpose %70, [1, 0, 2] : vector<8x4x8xf32> -> vector<4x8x8xf32>
    %72 = arith.truncf %71 : vector<4x8x8xf32> to vector<4x8x8xbf16>
    %73 = vector.shape_cast %63 : vector<8x32xf32> to vector<8x4x8xf32>
    %74 = tpu.transpose %73, [1, 0, 2] : vector<8x4x8xf32> -> vector<4x8x8xf32>
    %75 = arith.truncf %74 : vector<4x8x8xf32> to vector<4x8x8xbf16>
    %76 = vector.shape_cast %69 : vector<8x32xf32> to vector<8x4x8xf32>
    %77 = tpu.transpose %76, [1, 0, 2] : vector<8x4x8xf32> -> vector<4x8x8xf32>
    %78 = arith.truncf %77 : vector<4x8x8xf32> to vector<4x8x8xbf16>
    "tpu.trace_start"() <{level = 10 : i32, message = "hqd,hkd->hqk"}> : () -> ()
    %cst_37 = arith.constant dense<0.000000e+00> : vector<4x8x8xf32>
    %79 = tpu.matmul %72, %75, %cst_37 {dimension_numbers = #tpu.dot_dimension_numbers<[2], [2], [1], [1], [0, 0, 0, 1, 1, 1], [0], [0]>} : vector<4x8x8xbf16>, vector<4x8x8xbf16>, vector<4x8x8xf32> -> vector<4x8x8xf32>
    "tpu.trace_stop"() : () -> ()
    %cst_38 = arith.constant dense<0xFF800000> : vector<4x8xf32>
    %80 = vector.multi_reduction <maximumf>, %79, %cst_38 [2] : vector<4x8x8xf32> to vector<4x8xf32>
    %81 = vector.shape_cast %80 : vector<4x8xf32> to vector<4x8x1xf32>
    %82 = vector.broadcast %81 : vector<4x8x1xf32> to vector<4x8x8xf32>
    %83 = arith.subf %79, %82 : vector<4x8x8xf32>
    %84 = math.exp %83 : vector<4x8x8xf32>
    %cst_39 = arith.constant dense<0.000000e+00> : vector<4x8xf32>
    %85 = vector.multi_reduction <add>, %84, %cst_39 [2] : vector<4x8x8xf32> to vector<4x8xf32>
    %86 = vector.shape_cast %85 : vector<4x8xf32> to vector<4x8x1xf32>
    %87 = tpu.reciprocal %86 {approx = true} : vector<4x8x1xf32> -> vector<4x8x1xf32>
    %88 = vector.broadcast %87 : vector<4x8x1xf32> to vector<4x8x8xf32>
    %89 = arith.mulf %84, %88 : vector<4x8x8xf32>
    %90 = arith.truncf %89 : vector<4x8x8xf32> to vector<4x8x8xbf16>
    "tpu.trace_start"() <{level = 10 : i32, message = "hqk,hkd->hqd"}> : () -> ()
    %cst_40 = arith.constant dense<0.000000e+00> : vector<4x8x8xf32>
    %91 = tpu.matmul %90, %78, %cst_40 {dimension_numbers = #tpu.dot_dimension_numbers<[2], [1], [1], [2], [0, 0, 0, 1, 1, 2], [0], [0]>} : vector<4x8x8xbf16>, vector<4x8x8xbf16>, vector<4x8x8xf32> -> vector<4x8x8xf32>
    "tpu.trace_stop"() : () -> ()
    %92 = tpu.transpose %91, [1, 0, 2] : vector<4x8x8xf32> -> vector<8x4x8xf32>
    %93 = vector.shape_cast %92 : vector<8x4x8xf32> to vector<8x32xf32>
    %94 = arith.truncf %93 : vector<8x32xf32> to vector<8x32xbf16>
    %c0_41 = arith.constant 0 : index
    %c0_42 = arith.constant 0 : index
    %95 = vector.load %arg12[%c0_41, %c0_42] : memref<32x32xbf16, #tpu.memory_space<vmem>>, vector<32x32xbf16>
    %cst_43 = arith.constant dense<0.000000e+00> : vector<8x32xf32>
    %96 = tpu.matmul %94, %95, %cst_43 {dimension_numbers = #tpu.dot_dimension_numbers<[1], [0], [0], [1], [0, 0, 1, 1], [], []>} : vector<8x32xbf16>, vector<32x32xbf16>, vector<8x32xf32> -> vector<8x32xf32>
    %c0_44 = arith.constant 0 : index
    %c0_45 = arith.constant 0 : index
    %97 = vector.load %arg13[%c0_44, %c0_45] : memref<1x32xf32, #tpu.memory_space<vmem>>, vector<1x32xf32>
    %98 = vector.broadcast %97 : vector<1x32xf32> to vector<8x32xf32>
    %99 = arith.addf %96, %98 : vector<8x32xf32>
    %100 = arith.addf %1, %99 : vector<8x32xf32>
    %cst_46 = arith.constant dense<0.000000e+00> : vector<8xf32>
    %101 = vector.multi_reduction <add>, %100, %cst_46 [1] : vector<8x32xf32> to vector<8xf32>
    %102 = vector.shape_cast %101 : vector<8xf32> to vector<8x1xf32>
    %cst_47 = arith.constant 3.200000e+01 : f32
    %103 = vector.broadcast %cst_47 : f32 to vector<8x1xf32>
    %104 = arith.divf %102, %103 : vector<8x1xf32>
    %105 = vector.broadcast %104 : vector<8x1xf32> to vector<8x32xf32>
    %106 = arith.subf %100, %105 : vector<8x32xf32>
    %107 = arith.mulf %106, %106 : vector<8x32xf32>
    %cst_48 = arith.constant dense<0.000000e+00> : vector<8xf32>
    %108 = vector.multi_reduction <add>, %107, %cst_48 [1] : vector<8x32xf32> to vector<8xf32>
    %109 = vector.shape_cast %108 : vector<8xf32> to vector<8x1xf32>
    %cst_49 = arith.constant 3.200000e+01 : f32
    %110 = vector.broadcast %cst_49 : f32 to vector<8x1xf32>
    %111 = arith.divf %109, %110 : vector<8x1xf32>
    %112 = vector.broadcast %104 : vector<8x1xf32> to vector<8x32xf32>
    %113 = arith.subf %100, %112 : vector<8x32xf32>
    %cst_50 = arith.constant 9.99999974E-6 : f32
    %114 = vector.broadcast %cst_50 : f32 to vector<8x1xf32>
    %115 = arith.addf %111, %114 : vector<8x1xf32>
    %116 = math.rsqrt %115 : vector<8x1xf32>
    %117 = vector.broadcast %116 : vector<8x1xf32> to vector<8x32xf32>
    %118 = arith.mulf %113, %117 : vector<8x32xf32>
    %c0_51 = arith.constant 0 : index
    %c0_52 = arith.constant 0 : index
    %119 = vector.load %arg14[%c0_51, %c0_52] : memref<1x32xf32, #tpu.memory_space<vmem>>, vector<1x32xf32>
    %120 = vector.broadcast %119 : vector<1x32xf32> to vector<8x32xf32>
    %121 = arith.mulf %118, %120 : vector<8x32xf32>
    %c0_53 = arith.constant 0 : index
    %c0_54 = arith.constant 0 : index
    %122 = vector.load %arg15[%c0_53, %c0_54] : memref<1x32xf32, #tpu.memory_space<vmem>>, vector<1x32xf32>
    %123 = vector.broadcast %122 : vector<1x32xf32> to vector<8x32xf32>
    %124 = arith.addf %121, %123 : vector<8x32xf32>
    %125 = arith.truncf %124 : vector<8x32xf32> to vector<8x32xbf16>
    %c0_55 = arith.constant 0 : index
    %c0_56 = arith.constant 0 : index
    %126 = vector.load %arg16[%c0_55, %c0_56] : memref<32x64xbf16, #tpu.memory_space<vmem>>, vector<32x64xbf16>
    %cst_57 = arith.constant dense<0.000000e+00> : vector<8x64xf32>
    %127 = tpu.matmul %125, %126, %cst_57 {dimension_numbers = #tpu.dot_dimension_numbers<[1], [0], [0], [1], [0, 0, 1, 1], [], []>} : vector<8x32xbf16>, vector<32x64xbf16>, vector<8x64xf32> -> vector<8x64xf32>
    %c0_58 = arith.constant 0 : index
    %c0_59 = arith.constant 0 : index
    %128 = vector.load %arg17[%c0_58, %c0_59] : memref<1x64xf32, #tpu.memory_space<vmem>>, vector<1x64xf32>
    %129 = vector.broadcast %128 : vector<1x64xf32> to vector<8x64xf32>
    %130 = arith.addf %127, %129 : vector<8x64xf32>
    %cst_60 = arith.constant 5.000000e-01 : f32
    %131 = vector.broadcast %cst_60 : f32 to vector<8x64xf32>
    %132 = arith.mulf %131, %130 : vector<8x64xf32>
    %cst_61 = arith.constant 0.707106769 : f32
    %133 = vector.broadcast %cst_61 : f32 to vector<8x64xf32>
    %134 = arith.mulf %130, %133 : vector<8x64xf32>
    %135 = math.erf %134 : vector<8x64xf32>
    %cst_62 = arith.constant 1.000000e+00 : f32
    %136 = vector.broadcast %cst_62 : f32 to vector<8x64xf32>
    %137 = arith.addf %136, %135 : vector<8x64xf32>
    %138 = arith.mulf %132, %137 : vector<8x64xf32>
    %139 = arith.truncf %138 : vector<8x64xf32> to vector<8x64xbf16>
    %c0_63 = arith.constant 0 : index
    %c0_64 = arith.constant 0 : index
    %140 = vector.load %arg18[%c0_63, %c0_64] : memref<64x32xbf16, #tpu.memory_space<vmem>>, vector<64x32xbf16>
    %cst_65 = arith.constant dense<0.000000e+00> : vector<8x32xf32>
    %141 = tpu.matmul %139, %140, %cst_65 {dimension_numbers = #tpu.dot_dimension_numbers<[1], [0], [0], [1], [0, 0, 1, 1], [], []>} : vector<8x64xbf16>, vector<64x32xbf16>, vector<8x32xf32> -> vector<8x32xf32>
    %c0_66 = arith.constant 0 : index
    %c0_67 = arith.constant 0 : index
    %142 = vector.load %arg19[%c0_66, %c0_67] : memref<1x32xf32, #tpu.memory_space<vmem>>, vector<1x32xf32>
    %143 = vector.broadcast %142 : vector<1x32xf32> to vector<8x32xf32>
    %144 = arith.addf %141, %143 : vector<8x32xf32>
    %145 = arith.addf %100, %144 : vector<8x32xf32>
    %c0_68 = arith.constant 0 : index
    %c0_69 = arith.constant 0 : index
    %c0_70 = arith.constant 0 : index
    %146 = vector.load %arg20[%c0_68, %c0_69, %c0_70] : memref<1x8x32xf32, #tpu.memory_space<vmem>>, vector<1x8x32xf32>
    %147 = vector.shape_cast %146 : vector<1x8x32xf32> to vector<8x32xf32>
    %148 = vector.shape_cast %145 : vector<8x32xf32> to vector<1x8x32xf32>
    tpu.vector_store %arg20[%c0_68, %c0_69, %c0_70], %148 {strides = array<i32>} : memref<1x8x32xf32, #tpu.memory_space<vmem>>, vector<1x8x32xf32>,
    return
  }
  func.func @transform_0(%arg0: i32, %arg1: i32) -> (i32, i32, i32) {
    %c0_i32 = arith.constant 0 : i32
    %c0_i32_0 = arith.constant 0 : i32
    return %arg0, %arg1, %c0_i32 : i32, i32, i32
  }
  func.func @transform_1(%arg0: i32, %arg1: i32) -> (i32, i32, i32) {
    %c0_i32 = arith.constant 0 : i32
    %c0_i32_0 = arith.constant 0 : i32
    %c0_i32_1 = arith.constant 0 : i32
    return %arg0, %c0_i32, %c0_i32_0 : i32, i32, i32
  }
  func.func @transform_2(%arg0: i32, %arg1: i32) -> (i32, i32) {
    %c0_i32 = arith.constant 0 : i32
    %c0_i32_0 = arith.constant 0 : i32
    %c0_i32_1 = arith.constant 0 : i32
    return %c0_i32, %c0_i32_0 : i32, i32
  }
  func.func @transform_3(%arg0: i32, %arg1: i32) -> (i32, i32) {
    %c0_i32 = arith.constant 0 : i32
    %c0_i32_0 = arith.constant 0 : i32
    %c0_i32_1 = arith.constant 0 : i32
    return %c0_i32, %c0_i32_0 : i32, i32
  }
  func.func @transform_4(%arg0: i32, %arg1: i32) -> (i32, i32) {
    %c0_i32 = arith.constant 0 : i32
    %c0_i32_0 = arith.constant 0 : i32
    %c0_i32_1 = arith.constant 0 : i32
    return %c0_i32, %c0_i32_0 : i32, i32
  }
  func.func @transform_5(%arg0: i32, %arg1: i32) -> (i32, i32) {
    %c0_i32 = arith.constant 0 : i32
    %c0_i32_0 = arith.constant 0 : i32
    %c0_i32_1 = arith.constant 0 : i32
    return %c0_i32, %c0_i32_0 : i32, i32
  }
  func.func @transform_6(%arg0: i32, %arg1: i32) -> (i32, i32) {
    %c0_i32 = arith.constant 0 : i32
    %c0_i32_0 = arith.constant 0 : i32
    %c0_i32_1 = arith.constant 0 : i32
    return %c0_i32, %c0_i32_0 : i32, i32
  }
  func.func @transform_7(%arg0: i32, %arg1: i32) -> (i32, i32) {
    %c0_i32 = arith.constant 0 : i32
    %c0_i32_0 = arith.constant 0 : i32
    %c0_i32_1 = arith.constant 0 : i32
    return %c0_i32, %c0_i32_0 : i32, i32
  }
  func.func @transform_8(%arg0: i32, %arg1: i32) -> (i32, i32) {
    %c0_i32 = arith.constant 0 : i32
    %c0_i32_0 = arith.constant 0 : i32
    %c0_i32_1 = arith.constant 0 : i32
    return %c0_i32, %c0_i32_0 : i32, i32
  }
  func.func @transform_9(%arg0: i32, %arg1: i32) -> (i32, i32) {
    %c0_i32 = arith.constant 0 : i32
    %c0_i32_0 = arith.constant 0 : i32
    %c0_i32_1 = arith.constant 0 : i32
    return %c0_i32, %c0_i32_0 : i32, i32
  }
  func.func @transform_10(%arg0: i32, %arg1: i32) -> (i32, i32) {
    %c0_i32 = arith.constant 0 : i32
    %c0_i32_0 = arith.constant 0 : i32
    %c0_i32_1 = arith.constant 0 : i32
    return %c0_i32, %c0_i32_0 : i32, i32
  }
  func.func @transform_11(%arg0: i32, %arg1: i32) -> (i32, i32) {
    %c0_i32 = arith.constant 0 : i32
    %c0_i32_0 = arith.constant 0 : i32
    %c0_i32_1 = arith.constant 0 : i32
    return %c0_i32, %c0_i32_0 : i32, i32
  }
  func.func @transform_12(%arg0: i32, %arg1: i32) -> (i32, i32) {
    %c0_i32 = arith.constant 0 : i32
    %c0_i32_0 = arith.constant 0 : i32
    %c0_i32_1 = arith.constant 0 : i32
    return %c0_i32, %c0_i32_0 : i32, i32
  }
  func.func @transform_13(%arg0: i32, %arg1: i32) -> (i32, i32) {
    %c0_i32 = arith.constant 0 : i32
    %c0_i32_0 = arith.constant 0 : i32
    %c0_i32_1 = arith.constant 0 : i32
    return %c0_i32, %c0_i32_0 : i32, i32
  }
  func.func @transform_14(%arg0: i32, %arg1: i32) -> (i32, i32) {
    %c0_i32 = arith.constant 0 : i32
    %c0_i32_0 = arith.constant 0 : i32
    %c0_i32_1 = arith.constant 0 : i32
    return %c0_i32, %c0_i32_0 : i32, i32
  }
  func.func @transform_15(%arg0: i32, %arg1: i32) -> (i32, i32) {
    %c0_i32 = arith.constant 0 : i32
    %c0_i32_0 = arith.constant 0 : i32
    %c0_i32_1 = arith.constant 0 : i32
    return %c0_i32, %c0_i32_0 : i32, i32
  }
  func.func @transform_16(%arg0: i32, %arg1: i32) -> (i32, i32) {
    %c0_i32 = arith.constant 0 : i32
    %c0_i32_0 = arith.constant 0 : i32
    %c0_i32_1 = arith.constant 0 : i32
    return %c0_i32, %c0_i32_0 : i32, i32
  }
  func.func @transform_17(%arg0: i32, %arg1: i32) -> (i32, i32) {
    %c0_i32 = arith.constant 0 : i32
    %c0_i32_0 = arith.constant 0 : i32
    %c0_i32_1 = arith.constant 0 : i32
    return %c0_i32, %c0_i32_0 : i32, i32
  }
  func.func @transform_18(%arg0: i32, %arg1: i32) -> (i32, i32, i32) {
    %c0_i32 = arith.constant 0 : i32
    %c0_i32_0 = arith.constant 0 : i32
    return %arg0, %arg1, %c0_i32 : i32, i32, i32
  }
}

</mosaic_0001>

<bundles_post_ra>
// kernel: tpu_custom_call.1
= control target key start
LH: loop header
LB: loop body
LE: loop exit
PB: predicated region body
PF: predicated region fallthrough
CT: control target
= control target key end

     0   :  { %s2919_s0 = inlined_call_operand.vmem [shape: f32[2,8,32], index: 0, kind: input, shape index: {}]   ;;  %s2920_s1 = inlined_call_operand.vmem [shape: f32[2,8,32], index: 1, kind: input, shape index: {}]   ;;  %s2921_s2 = inlined_call_operand.vmem [shape: f32[1,32], index: 2, kind: input, shape index: {}]   ;;  %s2922_s3 = inlined_call_operand.vmem [shape: f32[1,32], index: 3, kind: input, shape index: {}]   ;;  %s2923_s4 = inlined_call_operand.vmem [shape: bf16[32,32], index: 4, kind: input, shape index: {}]   ;;  %s2924_s5 = inlined_call_operand.vmem [shape: f32[1,32], index: 5, kind: input, shape index: {}]   ;;  %s2925_s6 = inlined_call_operand.hbm [shape: bf16[32,32], index: 6, kind: input, shape index: {}]   ;;  %s2926_s7 = inlined_call_operand.vmem [shape: f32[1,32], index: 7, kind: input, shape index: {}]   ;;  %s2927_s8 = inlined_call_operand.hbm [shape: bf16[32,32], index: 8, kind: input, shape index: {}]   ;;  %s2928_s9 = inlined_call_operand.vmem [shape: f32[1,32], index: 9, kind: input, shape index: {}]   ;;  %s2929_s10 = inlined_call_operand.hbm [shape: bf16[32,32], index: 10, kind: input, shape index: {}]   ;;  %s2930_s11 = inlined_call_operand.vmem [shape: f32[1,32], index: 11, kind: input, shape index: {}]   ;;  %s2931_s12 = inlined_call_operand.vmem [shape: f32[1,32], index: 12, kind: input, shape index: {}]   ;;  %s2932_s13 = inlined_call_operand.vmem [shape: f32[1,32], index: 13, kind: input, shape index: {}]   ;;  %s2933_s14 = inlined_call_operand.hbm [shape: bf16[32,64], index: 14, kind: input, shape index: {}]   ;;  %s2934_s15 = inlined_call_operand.vmem [shape: f32[1,64], index: 15, kind: input, shape index: {}]   ;;  %s2935_s16 = inlined_call_operand.vmem [shape: bf16[64,32], index: 16, kind: input, shape index: {}]   ;;  %s2936_s17 = inlined_call_operand.vmem [shape: f32[1,32], index: 17, kind: input, shape index: {}]   ;;  %s2937_s18 = inlined_call_operand.hbm [shape: f32[2,8,32], index: 18, kind: output, shape index: {}]  }
   0x1   :  { %2950 = sst [smem:[#allocation24_spill]] %s2919_s0 }
   0x2   :  { %2951 = sst [smem:[#allocation25_spill]] %s2920_s1 }
   0x3   :  { %2952 = sst [smem:[#allocation26_spill]] %s2921_s2 }
   0x4   :  { %2953 = sst [smem:[#allocation27_spill]] %s2927_s8 }
   0x5   :  { %2954 = sst [smem:[#allocation28_spill]] %s2935_s16 }
   0x6   :  { %2955 = sst [smem:[#allocation29_spill]] %s2936_s17 }
   0x7   :  { %2956 = sst [smem:[#allocation30_spill]] %s2937_s18 }
   0x8   :  { %23 = vsyncpa [#allocation3], 0 }
   0x9   :  { %24 = vsyncpa [#allocation6], 0 }
   0xa   :  { %25 = vsyncpa [#allocation9], 0 }
   0xb   :  { %26 = vsyncpa [#allocation4], 0 }
   0xc   :  { %28 = vsyncpa [#allocation4 + $0x1], 0  ;;  %s2474_s27 = smov 0   ;;  %s2476_s28 = smov 0  }
   0xd   :  { %s2478_s29 = smov 0   ;;  %s2480_s30 = smov 0  }
   0xe   :  { %s2482_s0 = smov 0   ;;  %s2484_s19 = smov 0  }
   0xf LB: > { %2957 = sst [smem:[#allocation15_spill]] %s2342_s27  ;;  %s1904_s1 = sadd.s32 4294967295, %s2362_s19   ;;  %s2362_s19 = sphi %s2484_s19, %s34_s19   ;;  %s2358_s0 = sphi %s2482_s0, %s2989_s0   ;;  %s2354_s30 = sphi %s2480_s30, %s2988_s30   ;;  %s2350_s29 = sphi %s2478_s29, %s2987_s29   ;;  %s2346_s28 = sphi %s2476_s28, %s2986_s28   ;;  %s2342_s27 = sphi %s2474_s27, %s2985_s27  }
  0x10   : > { %2958 = sst [smem:[#allocation16_spill]] %s2346_s28  ;;  %s1905_s20 = sadd.s32 4294967294, %s2362_s19  }
  0x11   : > { %2959 = sst [smem:[#allocation17_spill]] %s2350_s29  ;;  %s46_s21 = sadd.s32 1, %s2358_s0 }
  0x12   : > { %2960 = sst [smem:[#allocation18_spill]] %s2358_s0  ;;  %s445_s22 = sadd.s32 1, %s2350_s29 }
  0x13   : > { %2961 = sst [smem:[#allocation19_spill]] %s2362_s19  ;;  %p48_p0 = scmp.ge.s32.totalorder %s46_s21, 2 }
  0x14   : > { %p455_p1 = scmp.ne.s32.totalorder %s2350_s29, %s2346_s28  ;;  %p456_p2 = scmp.eq.s32.totalorder %s1904_s1, 1 }
  0x15   : > { %p461_p3 = scmp.ne.s32.totalorder %s2346_s28, %s2342_s27  ;;  %s2991_s21 = smov (%p48_p0, %s46_s21), 0 }
  0x16   : > { %2962 = sst [smem:[#allocation20_spill]] %s2991_s21  ;;  %p2514_p4 = por %p456_p2, %p455_p1 }
  0x17   : > { %p462_p5 = scmp.eq.s32.totalorder %s1905_s20, 1  ;;  %s440_s23 = ssub.s32 %s2358_s0, %s2991_s21 }
  0x18   : > { %s2963_s2 = scalar_select %p2514_p4, 1, 0 }
  0x19   : > { %p1906_p6 = scmp.ge.s32.totalorder %s2362_s19, 1  ;;  %p443_p7 = scmp.eq.s32.totalorder %s440_s23, 0 }
  0x1a   : > { %2964 = sst [smem:[#allocation21_spill]] %s2963_s2  ;;  %p2521_p8 = por %p462_p5, %p461_p3 }
  0x1b   : > { %p469_p9 = scmp.lt.s32.totalorder %s2362_s19, 3  ;;  %p2533_p11 = scmp.eq.s32.totalorder %s1904_s1, 0 }
  0x1c   : > { %s2965_s24 = scalar_select %p2521_p8, 1, 0 }
  0x1d   : > { %s2527_s25 = scalar_select %p443_p7, %s2350_s29, %s445_s22  }
  0x1e   : > { %2966 = sst [smem:[#allocation22_spill]] %s2965_s24  ;;  %p2529_p10 = pnand %p1906_p6, %p469_p9 }
  0x1f   : > { %2967 = sst [smem:[#allocation23_spill]] %s2527_s25  ;;  %s2364_s0 = smov [#allocation5]  }
  0x20   : > { %p2027_p12 = pneg %p2529_p10  ;;  %s2970_s8 = sld [smem:[#allocation27_spill]] }
  0x21   : > { %s511_s1 = sshll.u32 %s2364_s0, 4  ;;  %s2365_s25 = smov 64   ;;  %s512_s1 = int_to_ptr.vmem [resolvable:$true] %s511_s1 }
  0x22   : > { %p2544_p13 = pnand %p2533_p11, %p2027_p12  ;;  %s2366_s29 = smov 4  }
  0x23   : > { %s492_s20 = sshll.u32 %s2925_s6, 4  ;;  %s2367_s23 = smov [#allocation2]   ;;  %s493_s20 = int_to_ptr.hbm [resolvable:$true] %s492_s20 }
  0x24   : > { %s526_s17 = sshll.u32 %s2929_s10, 4  ;;  %s2368_s0 = smov [#allocation7]   ;;  %s527_s17 = int_to_ptr.hbm [resolvable:$true] %s526_s17 }
  0x25   : > { %s528_s28 = sshll.u32 %s2368_s0, 4  ;;  %s2369_s19 = smov [#allocation8]   ;;  %s529_s28 = int_to_ptr.vmem [resolvable:$true] %s528_s28 }
  0x26   : > { %s509_s21 = sshll.u32 %s2970_s8, 4  ;;  %s494_s8 = sshll.u32 %s2367_s23, 4  ;;  %s510_s21 = int_to_ptr.hbm [resolvable:$true] %s509_s21  ;;  %s495_s8 = int_to_ptr.vmem [resolvable:$true] %s494_s8 }
  0x27   : > { %2033 = dma.hbm_to_vmem [thread:$0]  (!%p2544_p13), %s510_s21, 256, %s512_s1, [#allocation6], %s2365_s25, %s2365_s25, %s2366_s29  }
  0x28   : > { %2030 = dma.hbm_to_vmem [thread:$0]  (!%p2544_p13), %s493_s20, 256, %s495_s8, [#allocation3], %s2365_s25, %s2365_s25, %s2366_s29  }
  0x29   : > { %s549_s1 = sshll.u32 %s2933_s14, 4  ;;  %s551_s24 = sshll.u32 %s2369_s19, 4  ;;  %s550_s1 = int_to_ptr.hbm [resolvable:$true] %s549_s1  ;;  %s552_s24 = int_to_ptr.vmem [resolvable:$true] %s551_s24 }
  0x2a   : > { %2036 = dma.hbm_to_vmem [thread:$0]  (!%p2544_p13), %s527_s17, 256, %s529_s28, [#allocation6], %s2365_s25, %s2365_s25, %s2366_s29  }
  0x2b   : > { %2039 = dma.hbm_to_vmem [thread:$0]  (!%p2544_p13), %s550_s1, 256, %s552_s24, [#allocation9], %s2365_s25, %s2365_s25, %s2366_s29  }
  0x2c   : > { %593 = sbr.rel (%p2529_p10) target bundleno = 2000 (0x7d0), region = 92 }
  0x31   : > { %2325 = dma.done.wait (%p2533_p11), [#allocation3], 256  }
  0x32   : > { %2327 = vsyncadd (%p2533_p11), [#allocation3], 4294967040 }
  0x33   : > { %2329 = dma.done.wait (%p2533_p11), [#allocation6], 512  }
  0x34   : > { %2331 = vsyncadd (%p2533_p11), [#allocation6], 4294966784 }
  0x35   : > { %2333 = dma.done.wait (%p2533_p11), [#allocation9], 256  }
  0x36   : > { %2335 = vsyncadd (%p2533_p11), [#allocation9], 4294967040  ;;  %p669_p0 = scmp.lt.s32.totalorder %s2354_s30, 1  ;;  %s2972_s28 = sld [smem:[#allocation25_spill]]  ;;  %vm683_vm0 = vcmask 261120   ;;  %v2370_v4 = vmov 32.0  }
  0x37   : > { %s2973_s26 = sld [smem:[#allocation24_spill]]  ;;  %2126 = vrcp.f32 %v2370_v4  ;;  %v1998_v21 = vld [vmem:[#allocation2 + $0x8] sm:$0xff]  ;;  %v2000_v22 = vld [vmem:[#allocation5 + $0x8] sm:$0xff]  ;;  %v1997_v23 = vld [vmem:[#allocation2] sm:$0xff]  ;;  %s2371_s18 = smov 120   ;;  %vm865_vm8 = vcmask 1047556  }
  0x38   : > { %s670_s8 = scalar_select %p669_p0, %s2354_s30, 1  ;;  %814 = vmatpush.bf16.msra.mxu1 %v1998_v21  ;;  %847 = vmatpush.bf16.msra.mxu2 %v2000_v22  ;;  %v1999_v24 = vld [vmem:[#allocation5] sm:$0xff]  ;;  %v1996_v25 = vld [vmem:[%s2923_s4 + $0x8] sm:$0xff]  ;;  %v1995_v27 = vld [vmem:[%s2923_s4] sm:$0xff]  ;;  %vm1227_vm9 = vcmask 64512   ;;  %vm1355_vm10 = vcmask 1043456  }
  0x39   : > { %777 = vmatpush.bf16.msra.mxu0 %v1996_v25  ;;  %s2974_s19 = sld [smem:[#allocation26_spill]]  ;;  %v2117_v44 = vld [vmem:[%s2922_s3] ss:$0 sm:$0xff]  ;;  %s2373_s25 = smov 112   ;;  %vm1552_vm11 = vcmask 130048   ;;  %vm1554_vm12 = vcmask 195584  }
  0x3a   : > { %s1918_s16 = sshll.u32 %s670_s8, 3  ;;  %v2118_v57 = vld [vmem:[%s2926_s7] ss:$0 sm:$0xff]  ;;  %s2376_s27 = smov 24  }
  0x3b   : > { %v2120_v60 = vld [vmem:[%s2924_s5] ss:$0 sm:$0xff]  ;;  %s2377_s20 = smov 16   ;;  %s2378_s23 = smov 8  }
  0x3c   : > { %s679_s29 = scalar_lea.vmem %s2972_s28, %s1918_s16  ;;  %815 = vmatpush.bf16.msra.mxu1 %v1997_v23  ;;  %848 = vmatpush.bf16.msra.mxu2 %v1999_v24  ;;  %s2372_s28 = smov 104  }
  0x3d   : > { %v682_v0 = vld [vmem:[%s679_s29] sm:$0xff]  ;;  %s675_s22 = scalar_lea.vmem %s2973_s26, %s1918_s16  ;;  %v2127_v5 = vpop.eup %2126  ;;  %778 = vmatpush.bf16.msra.mxu0 %v1995_v27  ;;  %s2975_s29 = sld [smem:[#allocation28_spill]] }
  0x3e   : > { %v723_v1 = vsel %vm683_vm0, %v682_v0, 0.0  ;;  %v2588_v2 = vld [vmem:[%s675_s22] sm:$0xff]  ;;  %v688_v6 = vmul.f32 32.0, %v2127_v5  ;;  %vm692_vm1 = vweird.f32 %v2127_v5  ;;  %s2977_s0 = sld [smem:[#allocation16_spill]] }
  0x3f   : > { %724 = vadd.xlane.f32.xlu0 %v723_v1  ;;  %v684_v3 = vsel %vm683_vm0, %v2588_v2, 0.0  ;;  %v2116_v41 = vld [vmem:[%s2974_s19] ss:$0 sm:$0xff]  ;;  %s1992_s19 = sshll.u32 %s2354_s30, 3  ;;  %s2978_s16 = sld [smem:[#allocation29_spill]] }
  0x40   : > { %v689_v7 = vsub.f32 1.0, %v688_v6  ;;  %v2374_v6 = vmov 1983009808  }
  0x42   : > { %v690_v8 = vmul.f32 %v2127_v5, %v689_v7  ;;  %v870_v7 = vunpack.c.l.s4 %v2374_v6 }
  0x43   : > { %s2976_s2 = smov %s2975_s29 }
  0x44   : > { %v691_v9 = vadd.f32 %v2127_v5, %v690_v8  ;;  %s666_s21 = sand.u32 1, %s2977_s0  }
  0x45   : > { %s1917_s1 = sshll.u32 %s666_s21, 3  ;;  %s1764_s30 = scalar_lea.sflag [#allocation4], %s666_s21 }
  0x46   : > { %v2592_v10 = vsel %vm692_vm1, %v2127_v5, %v691_v9  ;;  %s668_s22 = scalar_lea.vmem [#allocation10], %s1917_s1 }
  0x47   : > { %685 = vadd.xlane.f32.xlu0 %v684_v3 }
  0xb2   : > { %v725_v11 = vpop.xlane.xlu0 %724 }
  0xb3   : > { %v726_v12 = vmul.f32 %v725_v11, %v2592_v10  ;;  %v2630_v11 = vunpack.c.0.s8 %v870_v7 }
  0xb5   : > { %v727_v13 = vsub.f32 %v682_v0, %v726_v12 }
  0xb7   : > { %v728_v14 = vmul.f32 %v727_v13, %v727_v13 }
  0xb9   : > { %v729_v15 = vsel %vm683_vm0, %v728_v14, 0.0 }
  0xba   : > { %730 = vadd.xlane.f32.xlu1 %v729_v15  ;;  %v686_v16 = vpop.xlane.xlu0 %685 }
  0xbb   : > { %v694_v17 = vmul.f32 %v2592_v10, %v686_v16  ;;  %v2375_v16 = vmov 1934713408  }
  0xbd   : > { %v695_v18 = vsub.f32 %v2588_v2, %v694_v17  ;;  %v894_v17 = vunpack.c.l.s4 %v2375_v16 }
  0xbf   : > { %v696_v19 = vmul.f32 %v695_v18, %v695_v18  ;;  %v2638_v25 = vunpack.c.0.s8 %v894_v17 }
  0xc1   : > { %v697_v20 = vsel %vm683_vm0, %v696_v19, 0.0 }
  0xc2   : > { %698 = vadd.xlane.f32.xlu1 %v697_v20 }
 0x12d   : > { %v731_v26 = vpop.xlane.xlu1 %730 }
 0x12e   : > { %v732_v28 = vmul.f32 %v731_v26, %v2592_v10 }
 0x130   : > { %v733_v29 = vadd.f32 1e-05, %v732_v28 }
 0x132   : > { %2128 = vrsqrt.f32 %v733_v29  ;;  %vm740_vm3 = vweird.f32 %v733_v29 }
 0x135   : > { %v699_v30 = vpop.xlane.xlu1 %698 }
 0x136   : > { %v700_v31 = vmul.f32 %v699_v30, %v2592_v10 }
 0x138   : > { %v2129_v32 = vpop.eup %2128  ;;  %v701_v33 = vadd.f32 1e-05, %v700_v31 }
 0x139   : > { %v735_v34 = vmul.f32 %v2129_v32, %v733_v29  ;;  %vm741_vm2 = vweird.f32 %v2129_v32 }
 0x13a   : > { %2130 = vrsqrt.f32 %v701_v33  ;;  %vm742_vm4 = vmor %vm740_vm3, %vm741_vm2  ;;  %vm708_vm6 = vweird.f32 %v701_v33 }
 0x13b   : > { %v736_v35 = vmul.f32 %v2129_v32, %v735_v34 }
 0x13d   : > { %v737_v36 = vmul.f32 0.5, %v736_v35 }
 0x13f   : > { %v738_v37 = vsub.f32 1.5, %v737_v36 }
 0x140   : > { %v2131_v38 = vpop.eup %2130 }
 0x141   : > { %v739_v39 = vmul.f32 %v2129_v32, %v738_v37  ;;  %v703_v40 = vmul.f32 %v2131_v38, %v701_v33  ;;  %vm709_vm5 = vweird.f32 %v2131_v38 }
 0x142   : > { %vm710_vm7 = vmor %vm708_vm6, %vm709_vm5  ;;  %vm1744_vm5 = vcmask 523264  }
 0x143   : > { %v743_v42 = vsel %vm742_vm4, %v2129_v32, %v739_v39  ;;  %v704_v43 = vmul.f32 %v2131_v38, %v703_v40 }
 0x144   : > { %v744_v45 = vmul.f32 %v743_v42, %v727_v13 }
 0x145   : > { %v705_v46 = vmul.f32 0.5, %v704_v43 }
 0x146   : > { %v745_v47 = vmul.f32 %v2116_v41, %v744_v45 }
 0x147   : > { %v706_v48 = vsub.f32 1.5, %v705_v46 }
 0x148   : > { %v746_v49 = vadd.f32 %v2117_v44, %v745_v47 }
 0x149   : > { %v707_v50 = vmul.f32 %v2131_v38, %v706_v48 }
 0x14a   : > { %v784_v51 = vpack.c.bf16 %v746_v49, %v746_v49 }
 0x14b   : > { %v711_v52 = vsel %vm710_vm7, %v2131_v38, %v707_v50 }
 0x14c   : > { %1937 = vmatmul.msk.bf16.vlgmr.msra.gmra.mxu1 %vm683_vm0, %v784_v51  ;;  %1946 = vmatmul.msk.bf16.vlgmr.msra.gmra.mxu2 %vm683_vm0, %v784_v51  ;;  %v712_v53 = vmul.f32 %v711_v52, %v695_v18 }
 0x14e   : > { %v717_v54 = vmul.f32 %v2116_v41, %v712_v53 }
 0x150   : > { %v722_v55 = vadd.f32 %v2117_v44, %v717_v54 }
 0x152   : > { %v747_v56 = vpack.c.bf16 %v722_v55, %v722_v55 }
 0x154   : > { %1928 = vmatmul.msk.bf16.vlgmr.msra.gmra.mxu0 %vm683_vm0, %v747_v56 }
 0x1c9   : > { %v817_v58 = vpop.f32.mrf.mxu1 }
 0x1ca   : > { %v818_v59 = vadd.f32 %v2118_v57, %v817_v58 }
 0x1cc   : > { %980 = vrot.lane.b32.xlu2 %v818_v59, %s2371_s18  ;;  %986 = vrot.lane.b32.xlu0 %v818_v59, %s2372_s28  ;;  %v991_v9 = vrot.slane %v818_v59, 4 }
 0x1cf   : > { %v2624_v61 = vpop.f32.mrf.mxu2 }
 0x1d1   : > { %v780_v62 = vpop.f32.mrf.mxu0  ;;  %v819_v63 = vpop.f32.mrf.mxu1 }
 0x1d2   : > { %v781_v0 = vadd.f32 %v2120_v60, %v780_v62 }
 0x1d4   : > { %983 = vrot.lane.b32.xlu2 %v818_v59, %s2373_s25  ;;  %855 = vrot.lane.b32.xlu1 %v781_v0, %s2371_s18  ;;  %v867_v19 = vrot.slane %v781_v0, 4 }
 0x1d7   : > { %v852_v1 = vpop.f32.mrf.mxu2 }
 0x1d9   : > { %v782_v3 = vpop.f32.mrf.mxu0 }
 0x1dc   : > { %858 = vrot.lane.b32.xlu2 %v781_v0, %s2373_s25 }
 0x1e4   : > { %861 = vrot.lane.b32.xlu2 %v781_v0, %s2372_s28 }
 0x226   : > { %v981_v4 = vpop.permute.xlu2 %980 }
 0x227   : > { %v1003_v20 = vrot.slane %v981_v4, 4 }
 0x22e   : > { %v984_v5 = vpop.permute.xlu2 %983 }
 0x22f   : > { %v989_v8 = vrot.slane %v984_v5, 4  ;;  %v992_v13 = vsel %vm865_vm8, %v984_v5, %v991_v9 }
 0x230   : > { %v1000_v18 = vperm.slane %v992_v13, %v2630_v11 }
 0x231   : > { %v990_v14 = vsel %vm865_vm8, %v989_v8, %v818_v59 }
 0x232   : > { %v996_v21 = vperm.slane %v990_v14, %v2630_v11  ;;  %v1027_v28 = vrot.slane %v1000_v18, 4 }
 0x234   : > { %v1015_v30 = vrot.slane %v996_v21, 4 }
 0x236   : > { %v859_v12 = vpop.permute.xlu2 %858 }
 0x237   : > { %v864_v15 = vrot.slane %v859_v12, 4  ;;  %v868_v22 = vsel %vm865_vm8, %v859_v12, %v867_v19 }
 0x238   : > { %v876_v31 = vperm.slane %v868_v22, %v2630_v11 }
 0x239   : > { %v866_v24 = vsel %vm865_vm8, %v864_v15, %v781_v0 }
 0x23a   : > { %v872_v33 = vperm.slane %v866_v24, %v2630_v11  ;;  %v903_v46 = vrot.slane %v876_v31, 4 }
 0x23c   : > { %v891_v45 = vrot.slane %v872_v33, 4 }
 0x23e   : > { %v987_v23 = vpop.permute.xlu0 %986  ;;  %v862_v37 = vpop.permute.xlu2 %861 }
 0x23f   : > { %v1001_v26 = vrot.slane %v987_v23, 4  ;;  %v1004_v27 = vsel %vm865_vm8, %v987_v23, %v1003_v20  ;;  %v877_v47 = vrot.slane %v862_v37, 4 }
 0x240   : > { %v1012_v29 = vperm.slane %v1004_v27, %v2630_v11 }
 0x241   : > { %v1002_v32 = vsel %vm865_vm8, %v1001_v26, %v981_v4 }
 0x242   : > { %v1008_v34 = vperm.slane %v1002_v32, %v2630_v11  ;;  %v1025_v35 = vrot.slane %v1012_v29, 4  ;;  %v1028_v36 = vsel %vm865_vm8, %v1012_v29, %v1027_v28 }
 0x243   : > { %v1036_v38 = vperm.slane %v1028_v36, %v2638_v25 }
 0x244   : > { %v1013_v39 = vrot.slane %v1008_v34, 4  ;;  %v1016_v40 = vsel %vm865_vm8, %v1008_v34, %v1015_v30  ;;  %v1026_v41 = vsel %vm865_vm8, %v1025_v35, %v1000_v18 }
 0x245   : > { %v1024_v42 = vperm.slane %v1016_v40, %v2638_v25  ;;  %v1032_v43 = vperm.slane %v1026_v41, %v2638_v25  ;;  %v1043_v44 = vrot.slane %v1036_v38, 4 }
 0x246   : > { %v1014_v48 = vsel %vm865_vm8, %v1013_v39, %v996_v21  ;;  %v856_v49 = vpop.permute.xlu1 %855 }
 0x247   : > { %v1020_v50 = vperm.slane %v1014_v48, %v2638_v25  ;;  %v1039_v51 = vrot.slane %v1024_v42, 4  ;;  %v1041_v52 = vrot.slane %v1032_v43, 4  ;;  %v1044_v53 = vsel %vm865_vm8, 0.0, %v1043_v44 }
 0x248   : > { %v1056_v54 = vsel %vm865_vm8, %v1043_v44, %v1032_v43  ;;  %v1061_v55 = vrot.slane %v1044_v53, 4  ;;  %v878_v56 = vsel %vm865_vm8, %v877_v47, %v856_v49  ;;  %v879_v57 = vrot.slane %v856_v49, 4 }
 0x249   : > { %v1037_v58 = vrot.slane %v1020_v50, 4  ;;  %v1040_v59 = vsel %vm865_vm8, 0.0, %v1039_v51  ;;  %v1042_v60 = vsel %vm865_vm8, 0.0, %v1041_v52  ;;  %v1060_v62 = vperm.slane %v1056_v54, %v2630_v11 }
 0x24a   : > { %v1050_v63 = vrot.slane %v1040_v59, 4  ;;  %v1062_v0 = vsel %vm865_vm8, %v1061_v55, %v1042_v60  ;;  %v880_v1 = vsel %vm865_vm8, %v862_v37, %v879_v57  ;;  %v884_v3 = vperm.slane %v878_v56, %v2630_v11 }
 0x24b   : > { %v888_v4 = vperm.slane %v880_v1, %v2630_v11  ;;  %v1038_v5 = vsel %vm865_vm8, 0.0, %v1037_v58  ;;  %v1045_v6 = vsel %vm865_vm8, %v1039_v51, %v1020_v50  ;;  %v1066_v7 = vperm.slane %v1062_v0, %v2630_v11 }
 0x24c   : > { %v889_v8 = vrot.slane %v884_v3, 4  ;;  %v892_v9 = vsel %vm865_vm8, %v884_v3, %v891_v45  ;;  %v1049_v12 = vperm.slane %v1045_v6, %v2630_v11  ;;  %v1051_v13 = vsel %vm865_vm8, %v1050_v63, %v1038_v5 }
 0x24d   : > { %v900_v14 = vperm.slane %v892_v9, %v2638_v25  ;;  %v901_v15 = vrot.slane %v888_v4, 4  ;;  %v904_v16 = vsel %vm865_vm8, %v888_v4, %v903_v46  ;;  %v1055_v17 = vperm.slane %v1051_v13, %v2630_v11 }
 0x24e   : > { %v890_v18 = vsel %vm865_vm8, %v889_v8, %v872_v33  ;;  %v912_v19 = vperm.slane %v904_v16, %v2638_v25  ;;  %v1069_v20 = vrot.slane %v1049_v12, 4  ;;  %v1081_v21 = vrot.slane %v1060_v62, 4 }
 0x24f   : > { %v896_v22 = vperm.slane %v890_v18, %v2638_v25  ;;  %v902_v23 = vsel %vm865_vm8, %v901_v15, %v876_v31  ;;  %v915_v24 = vrot.slane %v900_v14, 4  ;;  %v1067_v26 = vrot.slane %v1055_v17, 4 }
 0x250   : > { %v908_v27 = vperm.slane %v902_v23, %v2638_v25  ;;  %v919_v28 = vrot.slane %v912_v19, 4  ;;  %v1070_v29 = vsel %vm865_vm8, %v1055_v17, %v1069_v20  ;;  %v1082_v30 = vsel %vm865_vm8, %v1066_v7, %v1081_v21 }
 0x251   : > { %v913_v32 = vrot.slane %v896_v22, 4  ;;  %v916_v33 = vsel %vm865_vm8, 0.0, %v915_v24  ;;  %v921_v34 = vsel %vm865_vm8, %v915_v24, %v896_v22  ;;  %v1078_v35 = vperm.slane %v1070_v29, %v2638_v25 }
 0x252   : > { %v917_v36 = vrot.slane %v908_v27, 4  ;;  %v920_v31 = vsel %vm865_vm8, 0.0, %v919_v28  ;;  %v925_v37 = vperm.slane %v921_v34, %v2630_v11  ;;  %v926_v38 = vrot.slane %v916_v33, 4 }
 0x253   : > { %v914_v39 = vsel %vm865_vm8, 0.0, %v913_v32  ;;  %v932_v40 = vsel %vm865_vm8, %v919_v28, %v908_v27  ;;  %v937_v41 = vrot.slane %v920_v31, 4  ;;  %v1090_v42 = vperm.slane %v1082_v30, %v2638_v25 }
 0x254   : > { %v918_v43 = vsel %vm865_vm8, 0.0, %v917_v36  ;;  %v927_v44 = vsel %vm865_vm8, %v926_v38, %v914_v39  ;;  %v936_v45 = vperm.slane %v932_v40, %v2630_v11  ;;  %v945_v46 = vrot.slane %v925_v37, 4 }
 0x255   : > { %v931_v47 = vperm.slane %v927_v44, %v2630_v11  ;;  %v938_v48 = vsel %vm865_vm8, %v937_v41, %v918_v43  ;;  %v1095_v49 = vrot.slane %v1090_v42, 4  ;;  %v1068_v50 = vsel %vm865_vm8, %v1067_v26, %v1049_v12 }
 0x256   : > { %v1074_v51 = vperm.slane %v1068_v50, %v2638_v25  ;;  %v1079_v52 = vrot.slane %v1066_v7, 4  ;;  %v1097_v53 = vrot.slane %v1078_v35, 4  ;;  %v942_v54 = vperm.slane %v938_v48, %v2630_v11 }
 0x257   : > { %v1096_v55 = vsel %vm865_vm8, %v1095_v49, %v1078_v35  ;;  %v946_v56 = vsel %vm865_vm8, %v931_v47, %v945_v46  ;;  %v957_v57 = vrot.slane %v936_v45, 4  ;;  %v943_v58 = vrot.slane %v931_v47, 4  ;;  %v2119_v47 = vld [vmem:[%s2928_s9] ss:$0 sm:$0xff] }
 0x258   : > { %v1101_v59 = vpack.c.bf16 %v1096_v55, %v1096_v55  ;;  %v1080_v60 = vsel %vm865_vm8, %v1079_v52, %v1060_v62  ;;  %v1098_v63 = vsel %vm865_vm8, %v1090_v42, %v1097_v53  ;;  %v1093_v0 = vrot.slane %v1074_v51, 4 }
 0x259   : > { %v1086_v1 = vperm.slane %v1080_v60, %v2638_v25  ;;  %v1102_v3 = vpack.c.bf16 %v1098_v63, %v1098_v63  ;;  %v954_v4 = vperm.slane %v946_v56, %v2638_v25  ;;  %v958_v5 = vsel %vm865_vm8, %v942_v54, %v957_v57 }
 0x25a   : > { %v1270_v6 = vsel %vm1227_vm9, %v1101_v59, 0  ;;  %v966_v7 = vperm.slane %v958_v5, %v2638_v25  ;;  %v944_v8 = vsel %vm865_vm8, %v943_v58, %v925_v37  ;;  %v955_v9 = vrot.slane %v942_v54, 4 }
 0x25b   : > { %1279 = vmatpush.bf16.xpose.msrb.mxu1 %v1270_v6  ;;  %v1091_v12 = vrot.slane %v1086_v1, 4  ;;  %v1289_v62 = vsel %vm1227_vm9, %v1102_v3, 0  ;;  %v1094_v13 = vsel %vm865_vm8, %v1086_v1, %v1093_v0  ;;  %v973_v14 = vrot.slane %v954_v4, 4 }
 0x25c   : > { %1298 = vmatpush.bf16.xpose.msrb.mxu2 %v1289_v62  ;;  %v1100_v15 = vpack.c.bf16 %v1094_v13, %v1094_v13  ;;  %v971_v16 = vrot.slane %v966_v7, 4  ;;  %v950_v17 = vperm.slane %v944_v8, %v2638_v25  ;;  %v956_v18 = vsel %vm865_vm8, %v955_v9, %v936_v45 }
 0x25d   : > { %v1092_v19 = vsel %vm865_vm8, %v1091_v12, %v1074_v51  ;;  %v962_v20 = vperm.slane %v956_v18, %v2638_v25  ;;  %v974_v24 = vsel %vm865_vm8, %v966_v7, %v973_v14  ;;  %v851_v48 = vadd.f32 %v2119_v47, %v2624_v61 }
 0x25e   : > { %v1099_v21 = vpack.c.bf16 %v1092_v19, %v1092_v19  ;;  %v1251_v22 = vsel %vm1227_vm9, %v1100_v15, 0  ;;  %v972_v23 = vsel %vm865_vm8, %v971_v16, %v954_v4  ;;  %v969_v28 = vrot.slane %v950_v17, 4 }
 0x25f   : > { %1260 = vmatpush.bf16.xpose.msrb.mxu0 %v1251_v22  ;;  %v977_v26 = vpack.c.bf16 %v972_v23, %v972_v23  ;;  %v967_v27 = vrot.slane %v962_v20, 4  ;;  %v978_v30 = vpack.c.bf16 %v974_v24, %v974_v24  ;;  %v1115_v4 = vrot.slane %v851_v48, 4 }
 0x260   : > { %v1232_v29 = vsel %vm1227_vm9, %v1099_v21, 0  ;;  %v970_v33 = vsel %vm865_vm8, %v962_v20, %v969_v28 }
 0x261   : > { %1241 = vmatpush.bf16.xpose.msra.mxu3 %v1232_v29  ;;  %v968_v32 = vsel %vm865_vm8, %v967_v27, %v950_v17  ;;  %v976_v35 = vpack.c.bf16 %v970_v33, %v970_v33 }
 0x262   : > { %1949 = vmatmul.msk.bf16.vlgmr.msrb.gmra.mxu1 %vm1227_vm9, %v977_v26  ;;  %v975_v34 = vpack.c.bf16 %v968_v32, %v968_v32 }
 0x263   : > { %1950 = vmatmul.msk.bf16.vlgmr.msrb.gmra.mxu2 %vm1227_vm9, %v978_v30 }
 0x266   : > { %1948 = vmatmul.msk.bf16.vlgmr.msrb.gmra.mxu0 %vm1227_vm9, %v976_v35 }
 0x268   : > { %1947 = vmatmul.msk.bf16.vlgmr.msra.gmra.mxu3 %vm1227_vm9, %v975_v34 }
 0x2df   : > { %v1281_v36 = vpop.f32.mrf.mxu1 }
 0x2e0   : > { %v1310_v31 = vsel %vm1227_vm9, %v1281_v36, -inf }
 0x2e1   : > { %1311 = vmax.xlane.f32.xlu1 %v1310_v31 }
 0x2e3   : > { %v1262_v37 = vpop.f32.mrf.mxu0 }
 0x2e4   : > { %v1307_v38 = vsel %vm1227_vm9, %v1262_v37, -inf }
 0x2e5   : > { %1308 = vmax.xlane.f32.xlu2 %v1307_v38 }
 0x2e6   : > { %v1300_v39 = vpop.f32.mrf.mxu2 }
 0x2e7   : > { %v1313_v40 = vsel %vm1227_vm9, %v1300_v39, -inf  ;;  %v1283_v41 = vpop.f32.mrf.mxu1 }
 0x2e8   : > { %1314 = vmax.xlane.f32.xlu0 %v1313_v40 }
 0x2eb   : > { %v1243_v42 = vpop.f32.mrf.mxu3  ;;  %v1264_v43 = vpop.f32.mrf.mxu0 }
 0x2ec   : > { %v1304_v44 = vsel %vm1227_vm9, %v1243_v42, -inf }
 0x2ed   : > { %1305 = vmax.xlane.f32.xlu2 %v1304_v44 }
 0x2ee   : > { %v1302_v45 = vpop.f32.mrf.mxu2 }
 0x2f3   : > { %v1245_v46 = vpop.f32.mrf.mxu3 }
 0x2fa   : > { %1110 = vrot.lane.b32.xlu1 %v851_v48, %s2372_s28  ;;  %s2979_s28 = sld [smem:[#allocation30_spill]] }
 0x2fc   : > { %1104 = vrot.lane.b32.xlu0 %v851_v48, %s2371_s18 }
 0x300   : > { %s1775_s26 = scalar_lea.hbm %s2979_s28, %s1992_s19 }
 0x305   : > { %1107 = vrot.lane.b32.xlu2 %v851_v48, %s2373_s25  ;;  %s2980_s25 = smov %s2979_s28 }
 0x306   : > { %s2292_s1 = scalar_lea.hbm %s2980_s25, 16 }
 0x354   : > { %v1312_v49 = vpop.xlane.xlu1 %1311 }
 0x355   : > { %v1318_v50 = vsub.f32 %v1281_v36, %v1312_v49 }
 0x357   : > { %v1324_v51 = vmul.f32 1.442695, %v1318_v50 }
 0x358   : > { %v1309_v52 = vpop.xlane.xlu2 %1308 }
 0x359   : > { %2132 = vpow2.f32 %v1324_v51  ;;  %v1317_v59 = vsub.f32 %v1262_v37, %v1309_v52 }
 0x35b   : > { %v1315_v53 = vpop.xlane.xlu0 %1314  ;;  %v1322_v0 = vmul.f32 1.442695, %v1317_v59 }
 0x35c   : > { %v1319_v54 = vsub.f32 %v1300_v39, %v1315_v53 }
 0x35e   : > { %v1326_v55 = vmul.f32 1.442695, %v1319_v54 }
 0x35f   : > { %v2733_v56 = vpop.eup %2132 }
 0x360   : > { %2134 = vpow2.f32 %v1326_v55  ;;  %v1306_v57 = vpop.xlane.xlu2 %1305  ;;  %v1334_v61 = vsel %vm1227_vm9, %v2733_v56, 0.0 }
 0x361   : > { %v1316_v58 = vsub.f32 %v1243_v42, %v1306_v57  ;;  %1335 = vadd.xlane.f32.xlu1 %v1334_v61 }
 0x363   : > { %v1320_v60 = vmul.f32 1.442695, %v1316_v58 }
 0x365   : > { %2136 = vpow2.f32 %v1320_v60 }
 0x366   : > { %v2737_v63 = vpop.eup %2134  ;;  %2138 = vpow2.f32 %v1322_v0 }
 0x367   : > { %v1337_v1 = vsel %vm1227_vm9, %v2737_v63, 0.0 }
 0x368   : > { %v1108_v3 = vpop.permute.xlu2 %1107  ;;  %1338 = vadd.xlane.f32.xlu2 %v1337_v1 }
 0x369   : > { %v1113_v5 = vrot.slane %v1108_v3, 4  ;;  %v1116_v8 = vsel %vm865_vm8, %v1108_v3, %v1115_v4 }
 0x36a   : > { %v1124_v14 = vperm.slane %v1116_v8, %v2630_v11 }
 0x36b   : > { %v2741_v6 = vpop.eup %2136  ;;  %v1114_v7 = vsel %vm865_vm8, %v1113_v5, %v851_v48 }
 0x36c   : > { %v1120_v9 = vperm.slane %v1114_v7, %v2630_v11  ;;  %v1328_v12 = vsel %vm1227_vm9, %v2741_v6, 0.0  ;;  %v1111_v62 = vpop.permute.xlu1 %1110  ;;  %v2751_v20 = vpop.eup %2138  ;;  %v1151_v22 = vrot.slane %v1124_v14, 4 }
 0x36d   : > { %1329 = vadd.xlane.f32.xlu0 %v1328_v12  ;;  %v1125_v13 = vrot.slane %v1111_v62, 4  ;;  %v1331_v32 = vsel %vm1227_vm9, %v2751_v20, 0.0 }
 0x36e   : > { %v1105_v15 = vpop.permute.xlu0 %1104  ;;  %v1139_v18 = vrot.slane %v1120_v9, 4 }
 0x36f   : > { %v1126_v16 = vsel %vm865_vm8, %v1125_v13, %v1105_v15  ;;  %v1127_v17 = vrot.slane %v1105_v15, 4 }
 0x370   : > { %v1132_v19 = vperm.slane %v1126_v16, %v2630_v11 }
 0x371   : > { %v1128_v21 = vsel %vm865_vm8, %v1111_v62, %v1127_v17 }
 0x372   : > { %v1136_v23 = vperm.slane %v1128_v21, %v2630_v11  ;;  %v1137_v24 = vrot.slane %v1132_v19, 4  ;;  %v1140_v26 = vsel %vm865_vm8, %v1132_v19, %v1139_v18 }
 0x373   : > { %v1148_v27 = vperm.slane %v1140_v26, %v2638_v25 }
 0x374   : > { %v1138_v28 = vsel %vm865_vm8, %v1137_v24, %v1120_v9  ;;  %v1149_v29 = vrot.slane %v1136_v23, 4  ;;  %v1152_v30 = vsel %vm865_vm8, %v1136_v23, %v1151_v22 }
 0x375   : > { %v1144_v33 = vperm.slane %v1138_v28, %v2638_v25  ;;  %v1160_v34 = vperm.slane %v1152_v30, %v2638_v25  ;;  %v1163_v35 = vrot.slane %v1148_v27, 4  ;;  %1332 = vadd.xlane.f32.xlu0 %v1331_v32 }
 0x376   : > { %v1150_v36 = vsel %vm865_vm8, %v1149_v29, %v1124_v14 }
 0x377   : > { %v1156_v31 = vperm.slane %v1150_v36, %v2638_v25  ;;  %v1161_v37 = vrot.slane %v1144_v33, 4  ;;  %v1164_v38 = vsel %vm865_vm8, 0.0, %v1163_v35  ;;  %v1167_v39 = vrot.slane %v1160_v34, 4 }
 0x378   : > { %v1169_v40 = vsel %vm865_vm8, %v1163_v35, %v1144_v33  ;;  %v1174_v41 = vrot.slane %v1164_v38, 4 }
 0x379   : > { %v1162_v42 = vsel %vm865_vm8, 0.0, %v1161_v37  ;;  %v1165_v43 = vrot.slane %v1156_v31, 4  ;;  %v1168_v44 = vsel %vm865_vm8, 0.0, %v1167_v39  ;;  %v1173_v45 = vperm.slane %v1169_v40, %v2630_v11 }
 0x37a   : > { %v1175_v46 = vsel %vm865_vm8, %v1174_v41, %v1162_v42  ;;  %v1180_v47 = vsel %vm865_vm8, %v1167_v39, %v1156_v31  ;;  %v1185_v48 = vrot.slane %v1168_v44, 4 }
 0x37b   : > { %v1166_v49 = vsel %vm865_vm8, 0.0, %v1165_v43  ;;  %v1179_v50 = vperm.slane %v1175_v46, %v2630_v11  ;;  %v1193_v51 = vrot.slane %v1173_v45, 4  ;;  %v1184_v52 = vperm.slane %v1180_v47, %v2630_v11 }
 0x37c   : > { %v1186_v53 = vsel %vm865_vm8, %v1185_v48, %v1166_v49 }
 0x37d   : > { %v1190_v54 = vperm.slane %v1186_v53, %v2630_v11  ;;  %v1194_v55 = vsel %vm865_vm8, %v1179_v50, %v1193_v51  ;;  %v1205_v57 = vrot.slane %v1184_v52, 4  ;;  %v1191_v61 = vrot.slane %v1179_v50, 4 }
 0x37e   : > { %v1202_v58 = vperm.slane %v1194_v55, %v2638_v25 }
 0x37f   : > { %v1206_v59 = vsel %vm865_vm8, %v1190_v54, %v1205_v57  ;;  %v1192_v60 = vsel %vm865_vm8, %v1191_v61, %v1173_v45  ;;  %v1203_v0 = vrot.slane %v1190_v54, 4 }
 0x380   : > { %v1214_v1 = vperm.slane %v1206_v59, %v2638_v25  ;;  %v1221_v3 = vrot.slane %v1202_v58, 4  ;;  %v1198_v4 = vperm.slane %v1192_v60, %v2638_v25 }
 0x381   : > { %v1204_v5 = vsel %vm865_vm8, %v1203_v0, %v1184_v52 }
 0x382   : > { %v1222_v7 = vsel %vm865_vm8, %v1214_v1, %v1221_v3  ;;  %v1219_v8 = vrot.slane %v1214_v1, 4  ;;  %v1210_v9 = vperm.slane %v1204_v5, %v2638_v25  ;;  %v1217_v12 = vrot.slane %v1198_v4, 4 }
 0x383   : > { %v1226_v62 = vpack.c.bf16 %v1222_v7, %v1222_v7 }
 0x384   : > { %v1220_v13 = vsel %vm865_vm8, %v1219_v8, %v1202_v58  ;;  %v1218_v14 = vsel %vm865_vm8, %v1210_v9, %v1217_v12  ;;  %v1215_v15 = vrot.slane %v1210_v9, 4 }
 0x385   : > { %v1414_v16 = vsel %vm1355_vm10, %v1226_v62, 0  ;;  %v1225_v17 = vpack.c.bf16 %v1220_v13, %v1220_v13  ;;  %v1224_v18 = vpack.c.bf16 %v1218_v14, %v1218_v14 }
 0x386   : > { %1423 = vmatpush.bf16.msra.mxu2 %v1414_v16  ;;  %v1216_v19 = vsel %vm865_vm8, %v1215_v15, %v1198_v4 }
 0x387   : > { %v1395_v21 = vsel %vm1355_vm10, %v1225_v17, 0  ;;  %v1376_v22 = vsel %vm1355_vm10, %v1224_v18, 0  ;;  %v1223_v23 = vpack.c.bf16 %v1216_v19, %v1216_v19 }
 0x388   : > { %1404 = vmatpush.bf16.msra.mxu1 %v1395_v21  ;;  %1385 = vmatpush.bf16.msra.mxu0 %v1376_v22 }
 0x389   : > { %v1357_v24 = vsel %vm1355_vm10, %v1223_v23, 0 }
 0x38a   : > { %1366 = vmatpush.bf16.msrb.mxu3 %v1357_v24 }
 0x3d4   : > { %v1336_v26 = vpop.xlane.xlu1 %1335 }
 0x3d5   : > { %2140 = vrcp.f32 %v1336_v26 }
 0x3db   : > { %v2141_v27 = vpop.eup %2140  ;;  %v1339_v28 = vpop.xlane.xlu2 %1338 }
 0x3dc   : > { %v1346_v29 = vmul.f32 %v2141_v27, %v2733_v56  ;;  %2142 = vrcp.f32 %v1339_v28 }
 0x3de   : > { %v1350_v30 = vpack.c.bf16 %v1346_v29, %v1346_v29 }
 0x3e0   : > { %v1330_v32 = vpop.xlane.xlu0 %1329  ;;  %1953 = vmatmul.msk.bf16.vlgmr.msra.gmra.mxu1 %vm1227_vm9, %v1350_v30 }
 0x3e1   : > { %2144 = vrcp.f32 %v1330_v32 }
 0x3e2   : > { %v2143_v33 = vpop.eup %2142 }
 0x3e3   : > { %v1347_v34 = vmul.f32 %v2143_v33, %v2737_v63 }
 0x3e5   : > { %v1351_v35 = vpack.c.bf16 %v1347_v34, %v1347_v34 }
 0x3e7   : > { %v2145_v36 = vpop.eup %2144  ;;  %1954 = vmatmul.msk.bf16.vlgmr.msra.gmra.mxu2 %vm1227_vm9, %v1351_v35 }
 0x3e8   : > { %v1344_v31 = vmul.f32 %v2145_v36, %v2741_v6  ;;  %v1333_v37 = vpop.xlane.xlu0 %1332 }
 0x3e9   : > { %2146 = vrcp.f32 %v1333_v37 }
 0x3ea   : > { %v1348_v38 = vpack.c.bf16 %v1344_v31, %v1344_v31 }
 0x3ec   : > { %1951 = vmatmul.msk.bf16.vlgmr.msrb.gmra.mxu3 %vm1227_vm9, %v1348_v38 }
 0x3ef   : > { %v2147_v56 = vpop.eup %2146 }
 0x3f0   : > { %v1345_v39 = vmul.f32 %v2147_v56, %v2751_v20 }
 0x3f2   : > { %v1349_v40 = vpack.c.bf16 %v1345_v39, %v1345_v39 }
 0x3f4   : > { %1952 = vmatmul.msk.bf16.vlgmr.msra.gmra.mxu0 %vm1227_vm9, %v1349_v40 }
 0x45d   : > { %v1406_v41 = vpop.f32.mrf.mxu1 }
 0x45e   : > { %v1429_v43 = vrot.slane %v1406_v41, 4 }
 0x465   : > { %v1408_v42 = vpop.f32.mrf.mxu1 }
 0x46a   : > { %v1425_v63 = vpop.f32.mrf.mxu2 }
 0x46b   : > { %v1441_v45 = vrot.slane %v1425_v63, 4 }
 0x46f   : > { %v1368_v44 = vpop.f32.mrf.mxu3 }
 0x470   : > { %v1430_v46 = vsel %vm865_vm8, %v1429_v43, %v1368_v44  ;;  %v1431_v6 = vrot.slane %v1368_v44, 4 }
 0x471   : > { %v1436_v47 = vperm.slane %v1430_v46, %v2630_v11  ;;  %v1387_v48 = vpop.f32.mrf.mxu0 }
 0x472   : > { %v1432_v49 = vsel %vm865_vm8, %v1406_v41, %v1431_v6  ;;  %v1442_v50 = vsel %vm865_vm8, %v1441_v45, %v1387_v48  ;;  %v1443_v20 = vrot.slane %v1387_v48, 4  ;;  %v1427_v51 = vpop.f32.mrf.mxu2  ;;  %v2002_v48 = vld [vmem:[#allocation7 + $0x8] sm:$0xff] }
 0x473   : > { %v1440_v52 = vperm.slane %v1432_v49, %v2630_v11  ;;  %v1455_v53 = vrot.slane %v1436_v47, 4  ;;  %v1448_v54 = vperm.slane %v1442_v50, %v2630_v11  ;;  %1586 = vmatpush.bf16.msra.mxu3 %v2002_v48  ;;  %v2001_v49 = vld [vmem:[#allocation7] sm:$0xff] }
 0x474   : > { %v1444_v55 = vsel %vm865_vm8, %v1425_v63, %v1443_v20 }
 0x475   : > { %v1467_v57 = vrot.slane %v1440_v52, 4  ;;  %v1452_v61 = vperm.slane %v1444_v55, %v2630_v11  ;;  %v1453_v58 = vrot.slane %v1448_v54, 4  ;;  %v1456_v59 = vsel %vm865_vm8, %v1448_v54, %v1455_v53  ;;  %v2121_v55 = vld [vmem:[%s2930_s11] ss:$0 sm:$0xff] }
 0x476   : > { %v1464_v60 = vperm.slane %v1456_v59, %v2638_v25 }
 0x477   : > { %v1454_v0 = vsel %vm865_vm8, %v1453_v58, %v1436_v47  ;;  %v1465_v1 = vrot.slane %v1452_v61, 4  ;;  %v1468_v3 = vsel %vm865_vm8, %v1452_v61, %v1467_v57  ;;  %v1370_v4 = vpop.f32.mrf.mxu3  ;;  %1587 = vmatpush.bf16.msra.mxu3 %v2001_v49 }
 0x478   : > { %v1460_v5 = vperm.slane %v1454_v0, %v2638_v25  ;;  %v1476_v7 = vperm.slane %v1468_v3, %v2638_v25  ;;  %v1479_v8 = vrot.slane %v1464_v60, 4 }
 0x479   : > { %v1466_v9 = vsel %vm865_vm8, %v1465_v1, %v1440_v52  ;;  %v1389_v12 = vpop.f32.mrf.mxu0 }
 0x47a   : > { %v1472_v62 = vperm.slane %v1466_v9, %v2638_v25  ;;  %v1477_v13 = vrot.slane %v1460_v5, 4  ;;  %v1480_v14 = vsel %vm865_vm8, 0.0, %v1479_v8  ;;  %v1483_v15 = vrot.slane %v1476_v7, 4  ;;  %v2004_v7 = vld [vmem:[#allocation8 + $0x8] sm:$0xff] }
 0x47b   : > { %v1485_v16 = vsel %vm865_vm8, %v1479_v8, %v1460_v5  ;;  %v1490_v17 = vrot.slane %v1480_v14, 4  ;;  %1656 = vmatpush.bf16.msrb.mxu0 %v2004_v7  ;;  %v2003_v8 = vld [vmem:[#allocation8] sm:$0xff] }
 0x47c   : > { %v1478_v18 = vsel %vm865_vm8, 0.0, %v1477_v13  ;;  %v1481_v19 = vrot.slane %v1472_v62, 4  ;;  %v1484_v21 = vsel %vm865_vm8, 0.0, %v1483_v15  ;;  %v1489_v22 = vperm.slane %v1485_v16, %v2630_v11 }
 0x47d   : > { %v1501_v23 = vrot.slane %v1484_v21, 4  ;;  %v1491_v24 = vsel %vm865_vm8, %v1490_v17, %v1478_v18  ;;  %v1496_v26 = vsel %vm865_vm8, %v1483_v15, %v1472_v62  ;;  %v2122_v18 = vld [vmem:[%s2931_s12] ss:$0 sm:$0xff] }
 0x47e   : > { %v1482_v27 = vsel %vm865_vm8, 0.0, %v1481_v19  ;;  %v1495_v28 = vperm.slane %v1491_v24, %v2630_v11  ;;  %v1500_v29 = vperm.slane %v1496_v26, %v2630_v11  ;;  %v1509_v30 = vrot.slane %v1489_v22, 4  ;;  %v2124_v26 = vld [vmem:[%s2934_s15] ss:$0 sm:$0xff] }
 0x47f   : > { %v1502_v32 = vsel %vm865_vm8, %v1501_v23, %v1482_v27  ;;  %1657 = vmatpush.bf16.msrb.mxu0 %v2003_v8 }
 0x480   : > { %v1506_v33 = vperm.slane %v1502_v32, %v2630_v11  ;;  %v1510_v34 = vsel %vm865_vm8, %v1495_v28, %v1509_v30  ;;  %v1521_v35 = vrot.slane %v1500_v29, 4  ;;  %v1507_v36 = vrot.slane %v1495_v28, 4 }
 0x481   : > { %v1518_v31 = vperm.slane %v1510_v34, %v2638_v25 }
 0x482   : > { %v1522_v37 = vsel %vm865_vm8, %v1506_v33, %v1521_v35  ;;  %v1508_v38 = vsel %vm865_vm8, %v1507_v36, %v1489_v22  ;;  %v1519_v56 = vrot.slane %v1506_v33, 4 }
 0x483   : > { %v1530_v39 = vperm.slane %v1522_v37, %v2638_v25  ;;  %v1537_v40 = vrot.slane %v1518_v31, 4  ;;  %v1514_v41 = vperm.slane %v1508_v38, %v2638_v25  ;;  %v2008_v37 = vld [vmem:[%s2975_s29 + $0x18] sm:$0xff] }
 0x484   : > { %v1520_v42 = vsel %vm865_vm8, %v1519_v56, %v1500_v29  ;;  %1752 = vmatpush.bf16.msrb.mxu1 %v2008_v37 }
 0x485   : > { %v1538_v11 = vsel %vm865_vm8, %v1530_v39, %v1537_v40  ;;  %v1535_v63 = vrot.slane %v1530_v39, 4  ;;  %v1526_v43 = vperm.slane %v1520_v42, %v2638_v25  ;;  %v1533_v44 = vrot.slane %v1514_v41, 4  ;;  %v2007_v40 = vld [vmem:[%s2976_s2 + $0x10] sm:$0xff] }
 0x486   : > { %1548 = vrot.lane.b32.xlu1 %v1538_v11, %s2376_s27  ;;  %s1777_s27 = sshll.u32 %s668_s22, 4  ;;  %s1778_s27 = int_to_ptr.vmem [resolvable:$true] %s1777_s27 }
 0x487   : > { %v1536_v45 = vsel %vm865_vm8, %v1535_v63, %v1518_v31  ;;  %v1531_v46 = vrot.slane %v1526_v43, 4  ;;  %v1534_v6 = vsel %vm865_vm8, %v1526_v43, %v1533_v44  ;;  %v2006_v63 = vld [vmem:[%s2976_s2 + $0x8] sm:$0xff] }
 0x488   : > { %1544 = vrot.lane.b32.xlu0 %v1536_v45, %s2377_s20  ;;  %1540 = vrot.lane.b32.xlu2 %v1534_v6, %s2378_s23  ;;  %v2005_v45 = vld [vmem:[%s2976_s2] sm:$0xff]  ;;  %s1779_s20 = sshll.u32 %s1775_s26, 4  ;;  %s1780_s20 = int_to_ptr.hbm [resolvable:$true] %s1779_s20 }
 0x489   : > { %v1532_v47 = vsel %vm865_vm8, %v1531_v46, %v1514_v41  ;;  %1753 = vmatpush.bf16.msrb.mxu1 %v2007_v40  ;;  %s2286_s23 = sshra.s32 %s1780_s20, 4  ;;  %s2287_s23 = int_to_ptr.hbm [resolvable:$true] %s2286_s23 }
 0x48a   : > { %s2288_s0 = scalar_lea.hbm %s2287_s23, 8  ;;  %p2293_p5 = scmp.lt.s32.totalorder %s2287_s23, %s2980_s25 }
 0x48b   : > { %p2289_p1 = scmp.ne.s32.totalorder %s2287_s23, %s2288_s0  ;;  %p2294_p6 = scmp.lt.s32.totalorder %s2292_s1, %s2288_s0 }
 0x48d   : > { %1754 = vmatpush.bf16.msrb.mxu1 %v2006_v63  ;;  %p2290_p2 = pnand %p2289_p1, %p2514_p4  ;;  %p2295_p7 = por %p2294_p6, %p2293_p5 }
 0x48f   : > { %p2291_p3 = pneg %p2290_p2 }
 0x491   : > { %1755 = vmatpush.bf16.msrb.mxu1 %v2005_v45  ;;  %p2296_p9 = pnand %p2295_p7, %p2291_p3 }
 0x4e2   : > { %v1541_v50 = vpop.permute.xlu2 %1540 }
 0x4e3   : > { %v1551_v25 = vsel %vm1227_vm9, %v1532_v47, %v1541_v50 }
 0x4f8   : > { %v1549_v51 = vpop.permute.xlu1 %1548 }
 0x4fa   : > { %v1545_v20 = vpop.permute.xlu0 %1544 }
 0x4fb   : > { %v1553_v52 = vsel %vm1552_vm11, %v1551_v25, %v1545_v20 }
 0x4fc   : > { %v1555_v53 = vsel %vm1554_vm12, %v1553_v52, %v1549_v51 }
 0x4fd   : > { %v1556_v54 = vpack.c.bf16 %v1555_v53, %v1555_v53 }
 0x4ff   : > { %1963 = vmatmul.msk.bf16.vlgmr.msra.gmra.mxu3 %vm683_vm0, %v1556_v54 }
 0x582   : > { %v1589_v57 = vpop.f32.mrf.mxu3 }
 0x583   : > { %v1590_v61 = vadd.f32 %v2121_v55, %v1589_v57 }
 0x585   : > { %v2847_v58 = vadd.f32 %v1590_v61, %v2588_v2 }
 0x587   : > { %v1594_v59 = vsel %vm683_vm0, %v2847_v58, 0.0 }
 0x588   : > { %1595 = vadd.xlane.f32.xlu0 %v1594_v59 }
 0x58a   : > { %v1591_v60 = vpop.f32.mrf.mxu3 }
 0x5fb   : > { %v1596_v0 = vpop.xlane.xlu0 %1595 }
 0x5fc   : > { %v1597_v1 = vmul.f32 %v1596_v0, %v2592_v10 }
 0x5fe   : > { %v1598_v3 = vsub.f32 %v2847_v58, %v1597_v1 }
 0x600   : > { %v1599_v4 = vmul.f32 %v1598_v3, %v1598_v3 }
 0x602   : > { %v1600_v5 = vsel %vm683_vm0, %v1599_v4, 0.0 }
 0x603   : > { %1601 = vadd.xlane.f32.xlu2 %v1600_v5 }
 0x676   : > { %v1602_v2 = vpop.xlane.xlu2 %1601 }
 0x677   : > { %v1603_v9 = vmul.f32 %v1602_v2, %v2592_v10  ;;  %v2123_v10 = vld [vmem:[%s2932_s13] ss:$0 sm:$0xff] }
 0x679   : > { %v1604_v12 = vadd.f32 1e-05, %v1603_v9  ;;  %v2125_v9 = vld [vmem:[%s2978_s16] ss:$0 sm:$0xff] }
 0x67b   : > { %2148 = vrsqrt.f32 %v1604_v12  ;;  %vm1611_vm14 = vweird.f32 %v1604_v12 }
 0x681   : > { %v2149_v62 = vpop.eup %2148 }
 0x682   : > { %v1606_v13 = vmul.f32 %v2149_v62, %v1604_v12  ;;  %vm1612_vm13 = vweird.f32 %v2149_v62 }
 0x683   : > { %vm1613_vm15 = vmor %vm1611_vm14, %vm1612_vm13 }
 0x684   : > { %v1607_v14 = vmul.f32 %v2149_v62, %v1606_v13 }
 0x686   : > { %v1608_v15 = vmul.f32 0.5, %v1607_v14 }
 0x688   : > { %v1609_v16 = vsub.f32 1.5, %v1608_v15 }
 0x68a   : > { %v1610_v17 = vmul.f32 %v2149_v62, %v1609_v16 }
 0x68c   : > { %v1614_v19 = vsel %vm1613_vm15, %v2149_v62, %v1610_v17 }
 0x68d   : > { %v1615_v21 = vmul.f32 %v1614_v19, %v1598_v3 }
 0x68f   : > { %v1620_v22 = vmul.f32 %v2122_v18, %v1615_v21 }
 0x691   : > { %v1625_v23 = vadd.f32 %v2123_v10, %v1620_v22 }
 0x693   : > { %v1626_v24 = vpack.c.bf16 %v1625_v23, %v1625_v23 }
 0x695   : > { %1972 = vmatmul.msk.bf16.vlgmr.msrb.gmra.mxu0 %vm683_vm0, %v1626_v24 }
 0x712   : > { %v1659_v27 = vpop.f32.mrf.mxu0 }
 0x713   : > { %v1660_v28 = vadd.f32 %v2124_v26, %v1659_v27 }
 0x715   : > { %v1664_v29 = vmul.f32 0.70710677, %v1660_v28  ;;  %v1663_v5 = vmul.f32 0.5, %v1660_v28 }
 0x717   : > { %v1665_v30 = vmul.f32 %v1664_v29, %v1664_v29 }
 0x719   : > { %v1666_v32 = vmin.f32 %v1665_v30, 16.0 }
 0x71a   : > { %v1661_v33 = vpop.f32.mrf.mxu0 }
 0x71b   : > { %v1667_v34 = vmul.f32 2.1237322e-06, %v1666_v32  ;;  %v1678_v35 = vmul.f32 3.8918573e-05, %v1666_v32 }
 0x71d   : > { %v1668_v36 = vadd.f32 0.00028619796, %v1667_v34  ;;  %v1679_v31 = vadd.f32 0.001143296, %v1678_v35 }
 0x71f   : > { %v1669_v38 = vmul.f32 %v1668_v36, %v1666_v32  ;;  %v1680_v56 = vmul.f32 %v1679_v31, %v1666_v32 }
 0x721   : > { %v1681_v39 = vadd.f32 0.014752088, %v1680_v56  ;;  %v1670_v41 = vadd.f32 0.0036580483, %v1669_v38 }
 0x723   : > { %v1682_v42 = vmul.f32 %v1681_v39, %v1666_v32  ;;  %v1671_v43 = vmul.f32 %v1670_v41, %v1666_v32 }
 0x725   : > { %v1683_v11 = vadd.f32 0.112945676, %v1682_v42  ;;  %v1672_v6 = vadd.f32 0.05243302, %v1671_v43 }
 0x727   : > { %v1684_v44 = vmul.f32 %v1683_v11, %v1666_v32  ;;  %v1673_v49 = vmul.f32 %v1672_v6, %v1666_v32 }
 0x729   : > { %v1685_v46 = vadd.f32 0.4994258, %v1684_v44  ;;  %v1674_v50 = vadd.f32 0.18741608, %v1673_v49 }
 0x72b   : > { %v1686_v47 = vmul.f32 %v1685_v46, %v1666_v32  ;;  %v1675_v20 = vmul.f32 %v1674_v50, %v1666_v32 }
 0x72d   : > { %v1687_v48 = vadd.f32 1.0, %v1686_v47  ;;  %v1676_v54 = vadd.f32 1.1283791, %v1675_v20 }
 0x72f   : > { %2150 = vrcp.f32 %v1687_v48  ;;  %v1699_v53 = vand.u32 2147483648, %v1687_v48  ;;  %v1697_v57 = vand.u32 2147483647, %v1687_v48  ;;  %vm1693_vm2 = vweird.f32 %v1687_v48 }
 0x730   : > { %v1677_v60 = vmul.f32 %v1676_v54, %v1664_v29 }
 0x731   : > { %v1700_v59 = vor.u32 1.1754944e-38, %v1699_v53  ;;  %vm1698_vm4 = vcmp.eq.f32.partialorder %v1697_v57, 8.507059e+37 }
 0x735   : > { %v2151_v25 = vpop.eup %2150 }
 0x736   : > { %v1689_v51 = vmul.f32 %v2151_v25, %v1687_v48  ;;  %vm1694_vm1 = vweird.f32 %v2151_v25 }
 0x737   : > { %vm1695_vm3 = vmor %vm1693_vm2, %vm1694_vm1 }
 0x738   : > { %v1690_v52 = vsub.f32 1.0, %v1689_v51 }
 0x73a   : > { %v1691_v55 = vmul.f32 %v2151_v25, %v1690_v52 }
 0x73c   : > { %v1692_v61 = vadd.f32 %v2151_v25, %v1691_v55 }
 0x73e   : > { %v1696_v0 = vsel %vm1695_vm3, %v2151_v25, %v1692_v61 }
 0x73f   : > { %v1701_v1 = vsel %vm1698_vm4, %v1700_v59, %v1696_v0 }
 0x740   : > { %v1702_v3 = vmul.f32 %v1701_v1, %v1677_v60 }
 0x742   : > { %v1973_v4 = vclamps-f32 %v1702_v3, 1.0 }
 0x744   : > { %v1705_v7 = vadd.f32 1.0, %v1973_v4 }
 0x746   : > { %v1706_v8 = vmul.f32 %v1705_v7, %v1663_v5 }
 0x748   : > { %v1707_v2 = vpack.c.bf16 %v1706_v8, %v1706_v8 }
 0x74a   : > { %1990 = vmatmul.msk.bf16.vlgmr.msrb.gmra.mxu1 %vm1744_vm5, %v1707_v2 }
 0x7c7   : > { %v1757_v12 = vpop.f32.mrf.mxu1 }
 0x7c8   : > { %v1758_v62 = vadd.f32 %v2125_v9, %v1757_v12 }
 0x7ca   : > { %v1761_v13 = vadd.f32 %v1758_v62, %v2847_v58 }
 0x7cc   : > { %1762 = vst.msk [vmem:[%s668_s22] sm:$0xff] %vm683_vm0, %v1761_v13 }
 0x7cd   : > { %2299 = shalt.err (!%p2296_p9)
}
 0x7ce   : > { %2025 = dma.vmem_to_hbm [thread:$0]  (%p2514_p4), %s1778_s27, 128, %s1780_s20, %s1764_s30  }
 0x7cf   : > { %v1759_v58 = vpop.f32.mrf.mxu1 }
 0x7d0 PF: > { %s2982_s21 = sld [smem:[#allocation19_spill]] }
 0x7d1   : > { %s2983_s17 = sld [smem:[#allocation15_spill]] }
 0x7d6   : > { %p2052_p10 = scmp.ge.s32.totalorder %s2982_s21, 2 }
 0x7d7   : > { %s1791_s28 = sand.u32 1, %s2983_s17  }
 0x7d8   : > { %p2041_p11 = pnand %p2052_p10, %p2521_p8  ;;  %s1792_s26 = scalar_lea.sflag [#allocation4], %s1791_s28 }
 0x7da   : > { %p2042_p12 = pneg %p2041_p11 }
 0x7dc   : > { %2337 = dma.done.wait (%p2042_p12), %s1792_s26, 128  }
 0x7dd   : > { %2339 = vsyncadd (%p2042_p12), %s1792_s26, 4294967168  ;;  %s34_s19 = sadd.s32 1, %s2982_s21   ;;  %s2985_s27 = sld [smem:[#allocation16_spill]] }
 0x7de   : > { %p31_p13 = scmp.ge.s32.totalorder %s34_s19, 4   ;;  %s2986_s28 = sld [smem:[#allocation17_spill]] }
 0x7df   : > { %s2987_s29 = sld [smem:[#allocation23_spill]] }
 0x7e0   : > { %s2988_s30 = sld [smem:[#allocation18_spill]]  ;;  %33 = sbr.rel (!%p31_p13) target bundleno = 15 (0xf), region = 147 }
 0x7e1   : > { %s2989_s0 = sld [smem:[#allocation20_spill]] }
 0x7e5   :  { %1798 = vsyncpa [#allocation3], 1 }
 0x7e6   :  { %1800 = vsyncpa [#allocation3 + $0x1], 1 }
 0x7e7   :  { %1801 = vsyncpa [#allocation6], 1 }
 0x7e8   :  { %1802 = vsyncpa [#allocation9], 1 }
 0x7e9   :  { %1803 = vsyncpa [#allocation4], 1 }
 0x7ea   :  { %1805 = vsyncpa [#allocation4 + $0x1], 1 }

// kernel: tpu_custom_call.1
= control target key start
LH: loop header
LB: loop body
LE: loop exit
PB: predicated region body
PF: predicated region fallthrough
CT: control target
= control target key end

     0   :  { %s2919_s0 = inlined_call_operand.vmem [shape: f32[2,8,32], index: 0, kind: input, shape index: {}]   ;;  %s2920_s1 = inlined_call_operand.vmem [shape: f32[2,8,32], index: 1, kind: input, shape index: {}]   ;;  %s2921_s2 = inlined_call_operand.vmem [shape: f32[1,32], index: 2, kind: input, shape index: {}]   ;;  %s2922_s3 = inlined_call_operand.vmem [shape: f32[1,32], index: 3, kind: input, shape index: {}]   ;;  %s2923_s4 = inlined_call_operand.vmem [shape: bf16[32,32], index: 4, kind: input, shape index: {}]   ;;  %s2924_s5 = inlined_call_operand.vmem [shape: f32[1,32], index: 5, kind: input, shape index: {}]   ;;  %s2925_s6 = inlined_call_operand.hbm [shape: bf16[32,32], index: 6, kind: input, shape index: {}]   ;;  %s2926_s7 = inlined_call_operand.vmem [shape: f32[1,32], index: 7, kind: input, shape index: {}]   ;;  %s2927_s8 = inlined_call_operand.hbm [shape: bf16[32,32], index: 8, kind: input, shape index: {}]   ;;  %s2928_s9 = inlined_call_operand.vmem [shape: f32[1,32], index: 9, kind: input, shape index: {}]   ;;  %s2929_s10 = inlined_call_operand.hbm [shape: bf16[32,32], index: 10, kind: input, shape index: {}]   ;;  %s2930_s11 = inlined_call_operand.vmem [shape: f32[1,32], index: 11, kind: input, shape index: {}]   ;;  %s2931_s12 = inlined_call_operand.vmem [shape: f32[1,32], index: 12, kind: input, shape index: {}]   ;;  %s2932_s13 = inlined_call_operand.vmem [shape: f32[1,32], index: 13, kind: input, shape index: {}]   ;;  %s2933_s14 = inlined_call_operand.hbm [shape: bf16[32,64], index: 14, kind: input, shape index: {}]   ;;  %s2934_s15 = inlined_call_operand.vmem [shape: f32[1,64], index: 15, kind: input, shape index: {}]   ;;  %s2935_s16 = inlined_call_operand.vmem [shape: bf16[64,32], index: 16, kind: input, shape index: {}]   ;;  %s2936_s17 = inlined_call_operand.vmem [shape: f32[1,32], index: 17, kind: input, shape index: {}]   ;;  %s2937_s18 = inlined_call_operand.hbm [shape: f32[2,8,32], index: 18, kind: output, shape index: {}]  }
   0x1   :  { %2950 = sst [smem:[#allocation24_spill]] %s2919_s0 }
   0x2   :  { %2951 = sst [smem:[#allocation25_spill]] %s2920_s1 }
   0x3   :  { %2952 = sst [smem:[#allocation26_spill]] %s2921_s2 }
   0x4   :  { %2953 = sst [smem:[#allocation27_spill]] %s2927_s8 }
   0x5   :  { %2954 = sst [smem:[#allocation28_spill]] %s2935_s16 }
   0x6   :  { %2955 = sst [smem:[#allocation29_spill]] %s2936_s17 }
   0x7   :  { %2956 = sst [smem:[#allocation30_spill]] %s2937_s18 }
   0x8   :  { %23 = vsyncpa [#allocation3], 0 }
   0x9   :  { %24 = vsyncpa [#allocation6], 0 }
   0xa   :  { %25 = vsyncpa [#allocation9], 0 }
   0xb   :  { %26 = vsyncpa [#allocation4], 0 }
   0xc   :  { %28 = vsyncpa [#allocation4 + $0x1], 0  ;;  %s2474_s27 = smov 0   ;;  %s2476_s28 = smov 0  }
   0xd   :  { %s2478_s29 = smov 0   ;;  %s2480_s30 = smov 0  }
   0xe   :  { %s2482_s0 = smov 0   ;;  %s2484_s19 = smov 0  }
   0xf LB: > { %2957 = sst [smem:[#allocation15_spill]] %s2342_s27  ;;  %s1904_s1 = sadd.s32 4294967295, %s2362_s19   ;;  %s2362_s19 = sphi %s2484_s19, %s34_s19   ;;  %s2358_s0 = sphi %s2482_s0, %s2989_s0   ;;  %s2354_s30 = sphi %s2480_s30, %s2988_s30   ;;  %s2350_s29 = sphi %s2478_s29, %s2987_s29   ;;  %s2346_s28 = sphi %s2476_s28, %s2986_s28   ;;  %s2342_s27 = sphi %s2474_s27, %s2985_s27  }
  0x10   : > { %2958 = sst [smem:[#allocation16_spill]] %s2346_s28  ;;  %s1905_s20 = sadd.s32 4294967294, %s2362_s19  }
  0x11   : > { %2959 = sst [smem:[#allocation17_spill]] %s2350_s29  ;;  %s46_s21 = sadd.s32 1, %s2358_s0 }
  0x12   : > { %2960 = sst [smem:[#allocation18_spill]] %s2358_s0  ;;  %s445_s22 = sadd.s32 1, %s2350_s29 }
  0x13   : > { %2961 = sst [smem:[#allocation19_spill]] %s2362_s19  ;;  %p48_p0 = scmp.ge.s32.totalorder %s46_s21, 2 }
  0x14   : > { %p455_p1 = scmp.ne.s32.totalorder %s2350_s29, %s2346_s28  ;;  %p456_p2 = scmp.eq.s32.totalorder %s1904_s1, 1 }
  0x15   : > { %p461_p3 = scmp.ne.s32.totalorder %s2346_s28, %s2342_s27  ;;  %s2991_s21 = smov (%p48_p0, %s46_s21), 0 }
  0x16   : > { %2962 = sst [smem:[#allocation20_spill]] %s2991_s21  ;;  %p2514_p4 = por %p456_p2, %p455_p1 }
  0x17   : > { %p462_p5 = scmp.eq.s32.totalorder %s1905_s20, 1  ;;  %s440_s23 = ssub.s32 %s2358_s0, %s2991_s21 }
  0x18   : > { %s2963_s2 = scalar_select %p2514_p4, 1, 0 }
  0x19   : > { %p1906_p6 = scmp.ge.s32.totalorder %s2362_s19, 1  ;;  %p443_p7 = scmp.eq.s32.totalorder %s440_s23, 0 }
  0x1a   : > { %2964 = sst [smem:[#allocation21_spill]] %s2963_s2  ;;  %p2521_p8 = por %p462_p5, %p461_p3 }
  0x1b   : > { %p469_p9 = scmp.lt.s32.totalorder %s2362_s19, 3  ;;  %p2533_p11 = scmp.eq.s32.totalorder %s1904_s1, 0 }
  0x1c   : > { %s2965_s24 = scalar_select %p2521_p8, 1, 0 }
  0x1d   : > { %s2527_s25 = scalar_select %p443_p7, %s2350_s29, %s445_s22  }
  0x1e   : > { %2966 = sst [smem:[#allocation22_spill]] %s2965_s24  ;;  %p2529_p10 = pnand %p1906_p6, %p469_p9 }
  0x1f   : > { %2967 = sst [smem:[#allocation23_spill]] %s2527_s25  ;;  %s2364_s0 = smov [#allocation5]  }
  0x20   : > { %p2027_p12 = pneg %p2529_p10  ;;  %s2970_s8 = sld [smem:[#allocation27_spill]] }
  0x21   : > { %s511_s1 = sshll.u32 %s2364_s0, 4  ;;  %s2365_s25 = smov 64   ;;  %s512_s1 = int_to_ptr.vmem [resolvable:$true] %s511_s1 }
  0x22   : > { %p2544_p13 = pnand %p2533_p11, %p2027_p12  ;;  %s2366_s29 = smov 4  }
  0x23   : > { %s492_s20 = sshll.u32 %s2925_s6, 4  ;;  %s2367_s23 = smov [#allocation2]   ;;  %s493_s20 = int_to_ptr.hbm [resolvable:$true] %s492_s20 }
  0x24   : > { %s526_s17 = sshll.u32 %s2929_s10, 4  ;;  %s2368_s0 = smov [#allocation7]   ;;  %s527_s17 = int_to_ptr.hbm [resolvable:$true] %s526_s17 }
  0x25   : > { %s528_s28 = sshll.u32 %s2368_s0, 4  ;;  %s2369_s19 = smov [#allocation8]   ;;  %s529_s28 = int_to_ptr.vmem [resolvable:$true] %s528_s28 }
  0x26   : > { %s509_s21 = sshll.u32 %s2970_s8, 4  ;;  %s494_s8 = sshll.u32 %s2367_s23, 4  ;;  %s510_s21 = int_to_ptr.hbm [resolvable:$true] %s509_s21  ;;  %s495_s8 = int_to_ptr.vmem [resolvable:$true] %s494_s8 }
  0x27   : > { %2033 = dma.hbm_to_vmem [thread:$0]  (!%p2544_p13), %s510_s21, 256, %s512_s1, [#allocation6], %s2365_s25, %s2365_s25, %s2366_s29  }
  0x28   : > { %2030 = dma.hbm_to_vmem [thread:$0]  (!%p2544_p13), %s493_s20, 256, %s495_s8, [#allocation3], %s2365_s25, %s2365_s25, %s2366_s29  }
  0x29   : > { %s549_s1 = sshll.u32 %s2933_s14, 4  ;;  %s551_s24 = sshll.u32 %s2369_s19, 4  ;;  %s550_s1 = int_to_ptr.hbm [resolvable:$true] %s549_s1  ;;  %s552_s24 = int_to_ptr.vmem [resolvable:$true] %s551_s24 }
  0x2a   : > { %2036 = dma.hbm_to_vmem [thread:$0]  (!%p2544_p13), %s527_s17, 256, %s529_s28, [#allocation6], %s2365_s25, %s2365_s25, %s2366_s29  }
  0x2b   : > { %2039 = dma.hbm_to_vmem [thread:$0]  (!%p2544_p13), %s550_s1, 256, %s552_s24, [#allocation9], %s2365_s25, %s2365_s25, %s2366_s29  }
  0x2c   : > { %593 = sbr.rel (%p2529_p10) target bundleno = 2000 (0x7d0), region = 92 }
  0x31   : > { %2325 = dma.done.wait (%p2533_p11), [#allocation3], 256  }
  0x32   : > { %2327 = vsyncadd (%p2533_p11), [#allocation3], 4294967040 }
  0x33   : > { %2329 = dma.done.wait (%p2533_p11), [#allocation6], 512  }
  0x34   : > { %2331 = vsyncadd (%p2533_p11), [#allocation6], 4294966784 }
  0x35   : > { %2333 = dma.done.wait (%p2533_p11), [#allocation9], 256  }
  0x36   : > { %2335 = vsyncadd (%p2533_p11), [#allocation9], 4294967040  ;;  %p669_p0 = scmp.lt.s32.totalorder %s2354_s30, 1  ;;  %s2972_s28 = sld [smem:[#allocation25_spill]]  ;;  %vm683_vm0 = vcmask 261120   ;;  %v2370_v4 = vmov 32.0  }
  0x37   : > { %s2973_s26 = sld [smem:[#allocation24_spill]]  ;;  %2126 = vrcp.f32 %v2370_v4  ;;  %v1998_v21 = vld [vmem:[#allocation2 + $0x8] sm:$0xff]  ;;  %v2000_v22 = vld [vmem:[#allocation5 + $0x8] sm:$0xff]  ;;  %v1997_v23 = vld [vmem:[#allocation2] sm:$0xff]  ;;  %s2371_s18 = smov 120   ;;  %vm865_vm8 = vcmask 1047556  }
  0x38   : > { %s670_s8 = scalar_select %p669_p0, %s2354_s30, 1  ;;  %814 = vmatpush.bf16.msra.mxu1 %v1998_v21  ;;  %847 = vmatpush.bf16.msra.mxu2 %v2000_v22  ;;  %v1999_v24 = vld [vmem:[#allocation5] sm:$0xff]  ;;  %v1996_v25 = vld [vmem:[%s2923_s4 + $0x8] sm:$0xff]  ;;  %v1995_v27 = vld [vmem:[%s2923_s4] sm:$0xff]  ;;  %vm1227_vm9 = vcmask 64512   ;;  %vm1355_vm10 = vcmask 1043456  }
  0x39   : > { %777 = vmatpush.bf16.msra.mxu0 %v1996_v25  ;;  %s2974_s19 = sld [smem:[#allocation26_spill]]  ;;  %v2117_v44 = vld [vmem:[%s2922_s3] ss:$0 sm:$0xff]  ;;  %s2373_s25 = smov 112   ;;  %vm1552_vm11 = vcmask 130048   ;;  %vm1554_vm12 = vcmask 195584  }
  0x3a   : > { %s1918_s16 = sshll.u32 %s670_s8, 3  ;;  %v2118_v57 = vld [vmem:[%s2926_s7] ss:$0 sm:$0xff]  ;;  %s2376_s27 = smov 24  }
  0x3b   : > { %v2120_v60 = vld [vmem:[%s2924_s5] ss:$0 sm:$0xff]  ;;  %s2377_s20 = smov 16   ;;  %s2378_s23 = smov 8  }
  0x3c   : > { %s679_s29 = scalar_lea.vmem %s2972_s28, %s1918_s16  ;;  %815 = vmatpush.bf16.msra.mxu1 %v1997_v23  ;;  %848 = vmatpush.bf16.msra.mxu2 %v1999_v24  ;;  %s2372_s28 = smov 104  }
  0x3d   : > { %v682_v0 = vld [vmem:[%s679_s29] sm:$0xff]  ;;  %s675_s22 = scalar_lea.vmem %s2973_s26, %s1918_s16  ;;  %v2127_v5 = vpop.eup %2126  ;;  %778 = vmatpush.bf16.msra.mxu0 %v1995_v27  ;;  %s2975_s29 = sld [smem:[#allocation28_spill]] }
  0x3e   : > { %v723_v1 = vsel %vm683_vm0, %v682_v0, 0.0  ;;  %v2588_v2 = vld [vmem:[%s675_s22] sm:$0xff]  ;;  %v688_v6 = vmul.f32 32.0, %v2127_v5  ;;  %vm692_vm1 = vweird.f32 %v2127_v5  ;;  %s2977_s0 = sld [smem:[#allocation16_spill]] }
  0x3f   : > { %724 = vadd.xlane.f32.xlu0 %v723_v1  ;;  %v684_v3 = vsel %vm683_vm0, %v2588_v2, 0.0  ;;  %v2116_v41 = vld [vmem:[%s2974_s19] ss:$0 sm:$0xff]  ;;  %s1992_s19 = sshll.u32 %s2354_s30, 3  ;;  %s2978_s16 = sld [smem:[#allocation29_spill]] }
  0x40   : > { %v689_v7 = vsub.f32 1.0, %v688_v6  ;;  %v2374_v6 = vmov 1983009808  }
  0x42   : > { %v690_v8 = vmul.f32 %v2127_v5, %v689_v7  ;;  %v870_v7 = vunpack.c.l.s4 %v2374_v6 }
  0x43   : > { %s2976_s2 = smov %s2975_s29 }
  0x44   : > { %v691_v9 = vadd.f32 %v2127_v5, %v690_v8  ;;  %s666_s21 = sand.u32 1, %s2977_s0  }
  0x45   : > { %s1917_s1 = sshll.u32 %s666_s21, 3  ;;  %s1764_s30 = scalar_lea.sflag [#allocation4], %s666_s21 }
  0x46   : > { %v2592_v10 = vsel %vm692_vm1, %v2127_v5, %v691_v9  ;;  %s668_s22 = scalar_lea.vmem [#allocation10], %s1917_s1 }
  0x47   : > { %685 = vadd.xlane.f32.xlu0 %v684_v3 }
  0xb2   : > { %v725_v11 = vpop.xlane.xlu0 %724 }
  0xb3   : > { %v726_v12 = vmul.f32 %v725_v11, %v2592_v10  ;;  %v2630_v11 = vunpack.c.0.s8 %v870_v7 }
  0xb5   : > { %v727_v13 = vsub.f32 %v682_v0, %v726_v12 }
  0xb7   : > { %v728_v14 = vmul.f32 %v727_v13, %v727_v13 }
  0xb9   : > { %v729_v15 = vsel %vm683_vm0, %v728_v14, 0.0 }
  0xba   : > { %730 = vadd.xlane.f32.xlu1 %v729_v15  ;;  %v686_v16 = vpop.xlane.xlu0 %685 }
  0xbb   : > { %v694_v17 = vmul.f32 %v2592_v10, %v686_v16  ;;  %v2375_v16 = vmov 1934713408  }
  0xbd   : > { %v695_v18 = vsub.f32 %v2588_v2, %v694_v17  ;;  %v894_v17 = vunpack.c.l.s4 %v2375_v16 }
  0xbf   : > { %v696_v19 = vmul.f32 %v695_v18, %v695_v18  ;;  %v2638_v25 = vunpack.c.0.s8 %v894_v17 }
  0xc1   : > { %v697_v20 = vsel %vm683_vm0, %v696_v19, 0.0 }
  0xc2   : > { %698 = vadd.xlane.f32.xlu1 %v697_v20 }
 0x12d   : > { %v731_v26 = vpop.xlane.xlu1 %730 }
 0x12e   : > { %v732_v28 = vmul.f32 %v731_v26, %v2592_v10 }
 0x130   : > { %v733_v29 = vadd.f32 1e-05, %v732_v28 }
 0x132   : > { %2128 = vrsqrt.f32 %v733_v29  ;;  %vm740_vm3 = vweird.f32 %v733_v29 }
 0x135   : > { %v699_v30 = vpop.xlane.xlu1 %698 }
 0x136   : > { %v700_v31 = vmul.f32 %v699_v30, %v2592_v10 }
 0x138   : > { %v2129_v32 = vpop.eup %2128  ;;  %v701_v33 = vadd.f32 1e-05, %v700_v31 }
 0x139   : > { %v735_v34 = vmul.f32 %v2129_v32, %v733_v29  ;;  %vm741_vm2 = vweird.f32 %v2129_v32 }
 0x13a   : > { %2130 = vrsqrt.f32 %v701_v33  ;;  %vm742_vm4 = vmor %vm740_vm3, %vm741_vm2  ;;  %vm708_vm6 = vweird.f32 %v701_v33 }
 0x13b   : > { %v736_v35 = vmul.f32 %v2129_v32, %v735_v34 }
 0x13d   : > { %v737_v36 = vmul.f32 0.5, %v736_v35 }
 0x13f   : > { %v738_v37 = vsub.f32 1.5, %v737_v36 }
 0x140   : > { %v2131_v38 = vpop.eup %2130 }
 0x141   : > { %v739_v39 = vmul.f32 %v2129_v32, %v738_v37  ;;  %v703_v40 = vmul.f32 %v2131_v38, %v701_v33  ;;  %vm709_vm5 = vweird.f32 %v2131_v38 }
 0x142   : > { %vm710_vm7 = vmor %vm708_vm6, %vm709_vm5  ;;  %vm1744_vm5 = vcmask 523264  }
 0x143   : > { %v743_v42 = vsel %vm742_vm4, %v2129_v32, %v739_v39  ;;  %v704_v43 = vmul.f32 %v2131_v38, %v703_v40 }
 0x144   : > { %v744_v45 = vmul.f32 %v743_v42, %v727_v13 }
 0x145   : > { %v705_v46 = vmul.f32 0.5, %v704_v43 }
 0x146   : > { %v745_v47 = vmul.f32 %v2116_v41, %v744_v45 }
 0x147   : > { %v706_v48 = vsub.f32 1.5, %v705_v46 }
 0x148   : > { %v746_v49 = vadd.f32 %v2117_v44, %v745_v47 }
 0x149   : > { %v707_v50 = vmul.f32 %v2131_v38, %v706_v48 }
 0x14a   : > { %v784_v51 = vpack.c.bf16 %v746_v49, %v746_v49 }
 0x14b   : > { %v711_v52 = vsel %vm710_vm7, %v2131_v38, %v707_v50 }
 0x14c   : > { %1937 = vmatmul.msk.bf16.vlgmr.msra.gmra.mxu1 %vm683_vm0, %v784_v51  ;;  %1946 = vmatmul.msk.bf16.vlgmr.msra.gmra.mxu2 %vm683_vm0, %v784_v51  ;;  %v712_v53 = vmul.f32 %v711_v52, %v695_v18 }
 0x14e   : > { %v717_v54 = vmul.f32 %v2116_v41, %v712_v53 }
 0x150   : > { %v722_v55 = vadd.f32 %v2117_v44, %v717_v54 }
 0x152   : > { %v747_v56 = vpack.c.bf16 %v722_v55, %v722_v55 }
 0x154   : > { %1928 = vmatmul.msk.bf16.vlgmr.msra.gmra.mxu0 %vm683_vm0, %v747_v56 }
 0x1c9   : > { %v817_v58 = vpop.f32.mrf.mxu1 }
 0x1ca   : > { %v818_v59 = vadd.f32 %v2118_v57, %v817_v58 }
 0x1cc   : > { %980 = vrot.lane.b32.xlu2 %v818_v59, %s2371_s18  ;;  %986 = vrot.lane.b32.xlu0 %v818_v59, %s2372_s28  ;;  %v991_v9 = vrot.slane %v818_v59, 4 }
 0x1cf   : > { %v2624_v61 = vpop.f32.mrf.mxu2 }
 0x1d1   : > { %v780_v62 = vpop.f32.mrf.mxu0  ;;  %v819_v63 = vpop.f32.mrf.mxu1 }
 0x1d2   : > { %v781_v0 = vadd.f32 %v2120_v60, %v780_v62 }
 0x1d4   : > { %983 = vrot.lane.b32.xlu2 %v818_v59, %s2373_s25  ;;  %855 = vrot.lane.b32.xlu1 %v781_v0, %s2371_s18  ;;  %v867_v19 = vrot.slane %v781_v0, 4 }
 0x1d7   : > { %v852_v1 = vpop.f32.mrf.mxu2 }
 0x1d9   : > { %v782_v3 = vpop.f32.mrf.mxu0 }
 0x1dc   : > { %858 = vrot.lane.b32.xlu2 %v781_v0, %s2373_s25 }
 0x1e4   : > { %861 = vrot.lane.b32.xlu2 %v781_v0, %s2372_s28 }
 0x226   : > { %v981_v4 = vpop.permute.xlu2 %980 }
 0x227   : > { %v1003_v20 = vrot.slane %v981_v4, 4 }
 0x22e   : > { %v984_v5 = vpop.permute.xlu2 %983 }
 0x22f   : > { %v989_v8 = vrot.slane %v984_v5, 4  ;;  %v992_v13 = vsel %vm865_vm8, %v984_v5, %v991_v9 }
 0x230   : > { %v1000_v18 = vperm.slane %v992_v13, %v2630_v11 }
 0x231   : > { %v990_v14 = vsel %vm865_vm8, %v989_v8, %v818_v59 }
 0x232   : > { %v996_v21 = vperm.slane %v990_v14, %v2630_v11  ;;  %v1027_v28 = vrot.slane %v1000_v18, 4 }
 0x234   : > { %v1015_v30 = vrot.slane %v996_v21, 4 }
 0x236   : > { %v859_v12 = vpop.permute.xlu2 %858 }
 0x237   : > { %v864_v15 = vrot.slane %v859_v12, 4  ;;  %v868_v22 = vsel %vm865_vm8, %v859_v12, %v867_v19 }
 0x238   : > { %v876_v31 = vperm.slane %v868_v22, %v2630_v11 }
 0x239   : > { %v866_v24 = vsel %vm865_vm8, %v864_v15, %v781_v0 }
 0x23a   : > { %v872_v33 = vperm.slane %v866_v24, %v2630_v11  ;;  %v903_v46 = vrot.slane %v876_v31, 4 }
 0x23c   : > { %v891_v45 = vrot.slane %v872_v33, 4 }
 0x23e   : > { %v987_v23 = vpop.permute.xlu0 %986  ;;  %v862_v37 = vpop.permute.xlu2 %861 }
 0x23f   : > { %v1001_v26 = vrot.slane %v987_v23, 4  ;;  %v1004_v27 = vsel %vm865_vm8, %v987_v23, %v1003_v20  ;;  %v877_v47 = vrot.slane %v862_v37, 4 }
 0x240   : > { %v1012_v29 = vperm.slane %v1004_v27, %v2630_v11 }
 0x241   : > { %v1002_v32 = vsel %vm865_vm8, %v1001_v26, %v981_v4 }
 0x242   : > { %v1008_v34 = vperm.slane %v1002_v32, %v2630_v11  ;;  %v1025_v35 = vrot.slane %v1012_v29, 4  ;;  %v1028_v36 = vsel %vm865_vm8, %v1012_v29, %v1027_v28 }
 0x243   : > { %v1036_v38 = vperm.slane %v1028_v36, %v2638_v25 }
 0x244   : > { %v1013_v39 = vrot.slane %v1008_v34, 4  ;;  %v1016_v40 = vsel %vm865_vm8, %v1008_v34, %v1015_v30  ;;  %v1026_v41 = vsel %vm865_vm8, %v1025_v35, %v1000_v18 }
 0x245   : > { %v1024_v42 = vperm.slane %v1016_v40, %v2638_v25  ;;  %v1032_v43 = vperm.slane %v1026_v41, %v2638_v25  ;;  %v1043_v44 = vrot.slane %v1036_v38, 4 }
 0x246   : > { %v1014_v48 = vsel %vm865_vm8, %v1013_v39, %v996_v21  ;;  %v856_v49 = vpop.permute.xlu1 %855 }
 0x247   : > { %v1020_v50 = vperm.slane %v1014_v48, %v2638_v25  ;;  %v1039_v51 = vrot.slane %v1024_v42, 4  ;;  %v1041_v52 = vrot.slane %v1032_v43, 4  ;;  %v1044_v53 = vsel %vm865_vm8, 0.0, %v1043_v44 }
 0x248   : > { %v1056_v54 = vsel %vm865_vm8, %v1043_v44, %v1032_v43  ;;  %v1061_v55 = vrot.slane %v1044_v53, 4  ;;  %v878_v56 = vsel %vm865_vm8, %v877_v47, %v856_v49  ;;  %v879_v57 = vrot.slane %v856_v49, 4 }
 0x249   : > { %v1037_v58 = vrot.slane %v1020_v50, 4  ;;  %v1040_v59 = vsel %vm865_vm8, 0.0, %v1039_v51  ;;  %v1042_v60 = vsel %vm865_vm8, 0.0, %v1041_v52  ;;  %v1060_v62 = vperm.slane %v1056_v54, %v2630_v11 }
 0x24a   : > { %v1050_v63 = vrot.slane %v1040_v59, 4  ;;  %v1062_v0 = vsel %vm865_vm8, %v1061_v55, %v1042_v60  ;;  %v880_v1 = vsel %vm865_vm8, %v862_v37, %v879_v57  ;;  %v884_v3 = vperm.slane %v878_v56, %v2630_v11 }
 0x24b   : > { %v888_v4 = vperm.slane %v880_v1, %v2630_v11  ;;  %v1038_v5 = vsel %vm865_vm8, 0.0, %v1037_v58  ;;  %v1045_v6 = vsel %vm865_vm8, %v1039_v51, %v1020_v50  ;;  %v1066_v7 = vperm.slane %v1062_v0, %v2630_v11 }
 0x24c   : > { %v889_v8 = vrot.slane %v884_v3, 4  ;;  %v892_v9 = vsel %vm865_vm8, %v884_v3, %v891_v45  ;;  %v1049_v12 = vperm.slane %v1045_v6, %v2630_v11  ;;  %v1051_v13 = vsel %vm865_vm8, %v1050_v63, %v1038_v5 }
 0x24d   : > { %v900_v14 = vperm.slane %v892_v9, %v2638_v25  ;;  %v901_v15 = vrot.slane %v888_v4, 4  ;;  %v904_v16 = vsel %vm865_vm8, %v888_v4, %v903_v46  ;;  %v1055_v17 = vperm.slane %v1051_v13, %v2630_v11 }
 0x24e   : > { %v890_v18 = vsel %vm865_vm8, %v889_v8, %v872_v33  ;;  %v912_v19 = vperm.slane %v904_v16, %v2638_v25  ;;  %v1069_v20 = vrot.slane %v1049_v12, 4  ;;  %v1081_v21 = vrot.slane %v1060_v62, 4 }
 0x24f   : > { %v896_v22 = vperm.slane %v890_v18, %v2638_v25  ;;  %v902_v23 = vsel %vm865_vm8, %v901_v15, %v876_v31  ;;  %v915_v24 = vrot.slane %v900_v14, 4  ;;  %v1067_v26 = vrot.slane %v1055_v17, 4 }
 0x250   : > { %v908_v27 = vperm.slane %v902_v23, %v2638_v25  ;;  %v919_v28 = vrot.slane %v912_v19, 4  ;;  %v1070_v29 = vsel %vm865_vm8, %v1055_v17, %v1069_v20  ;;  %v1082_v30 = vsel %vm865_vm8, %v1066_v7, %v1081_v21 }
 0x251   : > { %v913_v32 = vrot.slane %v896_v22, 4  ;;  %v916_v33 = vsel %vm865_vm8, 0.0, %v915_v24  ;;  %v921_v34 = vsel %vm865_vm8, %v915_v24, %v896_v22  ;;  %v1078_v35 = vperm.slane %v1070_v29, %v2638_v25 }
 0x252   : > { %v917_v36 = vrot.slane %v908_v27, 4  ;;  %v920_v31 = vsel %vm865_vm8, 0.0, %v919_v28  ;;  %v925_v37 = vperm.slane %v921_v34, %v2630_v11  ;;  %v926_v38 = vrot.slane %v916_v33, 4 }
 0x253   : > { %v914_v39 = vsel %vm865_vm8, 0.0, %v913_v32  ;;  %v932_v40 = vsel %vm865_vm8, %v919_v28, %v908_v27  ;;  %v937_v41 = vrot.slane %v920_v31, 4  ;;  %v1090_v42 = vperm.slane %v1082_v30, %v2638_v25 }
 0x254   : > { %v918_v43 = vsel %vm865_vm8, 0.0, %v917_v36  ;;  %v927_v44 = vsel %vm865_vm8, %v926_v38, %v914_v39  ;;  %v936_v45 = vperm.slane %v932_v40, %v2630_v11  ;;  %v945_v46 = vrot.slane %v925_v37, 4 }
 0x255   : > { %v931_v47 = vperm.slane %v927_v44, %v2630_v11  ;;  %v938_v48 = vsel %vm865_vm8, %v937_v41, %v918_v43  ;;  %v1095_v49 = vrot.slane %v1090_v42, 4  ;;  %v1068_v50 = vsel %vm865_vm8, %v1067_v26, %v1049_v12 }
 0x256   : > { %v1074_v51 = vperm.slane %v1068_v50, %v2638_v25  ;;  %v1079_v52 = vrot.slane %v1066_v7, 4  ;;  %v1097_v53 = vrot.slane %v1078_v35, 4  ;;  %v942_v54 = vperm.slane %v938_v48, %v2630_v11 }
 0x257   : > { %v1096_v55 = vsel %vm865_vm8, %v1095_v49, %v1078_v35  ;;  %v946_v56 = vsel %vm865_vm8, %v931_v47, %v945_v46  ;;  %v957_v57 = vrot.slane %v936_v45, 4  ;;  %v943_v58 = vrot.slane %v931_v47, 4  ;;  %v2119_v47 = vld [vmem:[%s2928_s9] ss:$0 sm:$0xff] }
 0x258   : > { %v1101_v59 = vpack.c.bf16 %v1096_v55, %v1096_v55  ;;  %v1080_v60 = vsel %vm865_vm8, %v1079_v52, %v1060_v62  ;;  %v1098_v63 = vsel %vm865_vm8, %v1090_v42, %v1097_v53  ;;  %v1093_v0 = vrot.slane %v1074_v51, 4 }
 0x259   : > { %v1086_v1 = vperm.slane %v1080_v60, %v2638_v25  ;;  %v1102_v3 = vpack.c.bf16 %v1098_v63, %v1098_v63  ;;  %v954_v4 = vperm.slane %v946_v56, %v2638_v25  ;;  %v958_v5 = vsel %vm865_vm8, %v942_v54, %v957_v57 }
 0x25a   : > { %v1270_v6 = vsel %vm1227_vm9, %v1101_v59, 0  ;;  %v966_v7 = vperm.slane %v958_v5, %v2638_v25  ;;  %v944_v8 = vsel %vm865_vm8, %v943_v58, %v925_v37  ;;  %v955_v9 = vrot.slane %v942_v54, 4 }
 0x25b   : > { %1279 = vmatpush.bf16.xpose.msrb.mxu1 %v1270_v6  ;;  %v1091_v12 = vrot.slane %v1086_v1, 4  ;;  %v1289_v62 = vsel %vm1227_vm9, %v1102_v3, 0  ;;  %v1094_v13 = vsel %vm865_vm8, %v1086_v1, %v1093_v0  ;;  %v973_v14 = vrot.slane %v954_v4, 4 }
 0x25c   : > { %1298 = vmatpush.bf16.xpose.msrb.mxu2 %v1289_v62  ;;  %v1100_v15 = vpack.c.bf16 %v1094_v13, %v1094_v13  ;;  %v971_v16 = vrot.slane %v966_v7, 4  ;;  %v950_v17 = vperm.slane %v944_v8, %v2638_v25  ;;  %v956_v18 = vsel %vm865_vm8, %v955_v9, %v936_v45 }
 0x25d   : > { %v1092_v19 = vsel %vm865_vm8, %v1091_v12, %v1074_v51  ;;  %v962_v20 = vperm.slane %v956_v18, %v2638_v25  ;;  %v974_v24 = vsel %vm865_vm8, %v966_v7, %v973_v14  ;;  %v851_v48 = vadd.f32 %v2119_v47, %v2624_v61 }
 0x25e   : > { %v1099_v21 = vpack.c.bf16 %v1092_v19, %v1092_v19  ;;  %v1251_v22 = vsel %vm1227_vm9, %v1100_v15, 0  ;;  %v972_v23 = vsel %vm865_vm8, %v971_v16, %v954_v4  ;;  %v969_v28 = vrot.slane %v950_v17, 4 }
 0x25f   : > { %1260 = vmatpush.bf16.xpose.msrb.mxu0 %v1251_v22  ;;  %v977_v26 = vpack.c.bf16 %v972_v23, %v972_v23  ;;  %v967_v27 = vrot.slane %v962_v20, 4  ;;  %v978_v30 = vpack.c.bf16 %v974_v24, %v974_v24  ;;  %v1115_v4 = vrot.slane %v851_v48, 4 }
 0x260   : > { %v1232_v29 = vsel %vm1227_vm9, %v1099_v21, 0  ;;  %v970_v33 = vsel %vm865_vm8, %v962_v20, %v969_v28 }
 0x261   : > { %1241 = vmatpush.bf16.xpose.msra.mxu3 %v1232_v29  ;;  %v968_v32 = vsel %vm865_vm8, %v967_v27, %v950_v17  ;;  %v976_v35 = vpack.c.bf16 %v970_v33, %v970_v33 }
 0x262   : > { %1949 = vmatmul.msk.bf16.vlgmr.msrb.gmra.mxu1 %vm1227_vm9, %v977_v26  ;;  %v975_v34 = vpack.c.bf16 %v968_v32, %v968_v32 }
 0x263   : > { %1950 = vmatmul.msk.bf16.vlgmr.msrb.gmra.mxu2 %vm1227_vm9, %v978_v30 }
 0x266   : > { %1948 = vmatmul.msk.bf16.vlgmr.msrb.gmra.mxu0 %vm1227_vm9, %v976_v35 }
 0x268   : > { %1947 = vmatmul.msk.bf16.vlgmr.msra.gmra.mxu3 %vm1227_vm9, %v975_v34 }
 0x2df   : > { %v1281_v36 = vpop.f32.mrf.mxu1 }
 0x2e0   : > { %v1310_v31 = vsel %vm1227_vm9, %v1281_v36, -inf }
 0x2e1   : > { %1311 = vmax.xlane.f32.xlu1 %v1310_v31 }
 0x2e3   : > { %v1262_v37 = vpop.f32.mrf.mxu0 }
 0x2e4   : > { %v1307_v38 = vsel %vm1227_vm9, %v1262_v37, -inf }
 0x2e5   : > { %1308 = vmax.xlane.f32.xlu2 %v1307_v38 }
 0x2e6   : > { %v1300_v39 = vpop.f32.mrf.mxu2 }
 0x2e7   : > { %v1313_v40 = vsel %vm1227_vm9, %v1300_v39, -inf  ;;  %v1283_v41 = vpop.f32.mrf.mxu1 }
 0x2e8   : > { %1314 = vmax.xlane.f32.xlu0 %v1313_v40 }
 0x2eb   : > { %v1243_v42 = vpop.f32.mrf.mxu3  ;;  %v1264_v43 = vpop.f32.mrf.mxu0 }
 0x2ec   : > { %v1304_v44 = vsel %vm1227_vm9, %v1243_v42, -inf }
 0x2ed   : > { %1305 = vmax.xlane.f32.xlu2 %v1304_v44 }
 0x2ee   : > { %v1302_v45 = vpop.f32.mrf.mxu2 }
 0x2f3   : > { %v1245_v46 = vpop.f32.mrf.mxu3 }
 0x2fa   : > { %1110 = vrot.lane.b32.xlu1 %v851_v48, %s2372_s28  ;;  %s2979_s28 = sld [smem:[#allocation30_spill]] }
 0x2fc   : > { %1104 = vrot.lane.b32.xlu0 %v851_v48, %s2371_s18 }
 0x300   : > { %s1775_s26 = scalar_lea.hbm %s2979_s28, %s1992_s19 }
 0x305   : > { %1107 = vrot.lane.b32.xlu2 %v851_v48, %s2373_s25  ;;  %s2980_s25 = smov %s2979_s28 }
 0x306   : > { %s2292_s1 = scalar_lea.hbm %s2980_s25, 16 }
 0x354   : > { %v1312_v49 = vpop.xlane.xlu1 %1311 }
 0x355   : > { %v1318_v50 = vsub.f32 %v1281_v36, %v1312_v49 }
 0x357   : > { %v1324_v51 = vmul.f32 1.442695, %v1318_v50 }
 0x358   : > { %v1309_v52 = vpop.xlane.xlu2 %1308 }
 0x359   : > { %2132 = vpow2.f32 %v1324_v51  ;;  %v1317_v59 = vsub.f32 %v1262_v37, %v1309_v52 }
 0x35b   : > { %v1315_v53 = vpop.xlane.xlu0 %1314  ;;  %v1322_v0 = vmul.f32 1.442695, %v1317_v59 }
 0x35c   : > { %v1319_v54 = vsub.f32 %v1300_v39, %v1315_v53 }
 0x35e   : > { %v1326_v55 = vmul.f32 1.442695, %v1319_v54 }
 0x35f   : > { %v2733_v56 = vpop.eup %2132 }
 0x360   : > { %2134 = vpow2.f32 %v1326_v55  ;;  %v1306_v57 = vpop.xlane.xlu2 %1305  ;;  %v1334_v61 = vsel %vm1227_vm9, %v2733_v56, 0.0 }
 0x361   : > { %v1316_v58 = vsub.f32 %v1243_v42, %v1306_v57  ;;  %1335 = vadd.xlane.f32.xlu1 %v1334_v61 }
 0x363   : > { %v1320_v60 = vmul.f32 1.442695, %v1316_v58 }
 0x365   : > { %2136 = vpow2.f32 %v1320_v60 }
 0x366   : > { %v2737_v63 = vpop.eup %2134  ;;  %2138 = vpow2.f32 %v1322_v0 }
 0x367   : > { %v1337_v1 = vsel %vm1227_vm9, %v2737_v63, 0.0 }
 0x368   : > { %v1108_v3 = vpop.permute.xlu2 %1107  ;;  %1338 = vadd.xlane.f32.xlu2 %v1337_v1 }
 0x369   : > { %v1113_v5 = vrot.slane %v1108_v3, 4  ;;  %v1116_v8 = vsel %vm865_vm8, %v1108_v3, %v1115_v4 }
 0x36a   : > { %v1124_v14 = vperm.slane %v1116_v8, %v2630_v11 }
 0x36b   : > { %v2741_v6 = vpop.eup %2136  ;;  %v1114_v7 = vsel %vm865_vm8, %v1113_v5, %v851_v48 }
 0x36c   : > { %v1120_v9 = vperm.slane %v1114_v7, %v2630_v11  ;;  %v1328_v12 = vsel %vm1227_vm9, %v2741_v6, 0.0  ;;  %v1111_v62 = vpop.permute.xlu1 %1110  ;;  %v2751_v20 = vpop.eup %2138  ;;  %v1151_v22 = vrot.slane %v1124_v14, 4 }
 0x36d   : > { %1329 = vadd.xlane.f32.xlu0 %v1328_v12  ;;  %v1125_v13 = vrot.slane %v1111_v62, 4  ;;  %v1331_v32 = vsel %vm1227_vm9, %v2751_v20, 0.0 }
 0x36e   : > { %v1105_v15 = vpop.permute.xlu0 %1104  ;;  %v1139_v18 = vrot.slane %v1120_v9, 4 }
 0x36f   : > { %v1126_v16 = vsel %vm865_vm8, %v1125_v13, %v1105_v15  ;;  %v1127_v17 = vrot.slane %v1105_v15, 4 }
 0x370   : > { %v1132_v19 = vperm.slane %v1126_v16, %v2630_v11 }
 0x371   : > { %v1128_v21 = vsel %vm865_vm8, %v1111_v62, %v1127_v17 }
 0x372   : > { %v1136_v23 = vperm.slane %v1128_v21, %v2630_v11  ;;  %v1137_v24 = vrot.slane %v1132_v19, 4  ;;  %v1140_v26 = vsel %vm865_vm8, %v1132_v19, %v1139_v18 }
 0x373   : > { %v1148_v27 = vperm.slane %v1140_v26, %v2638_v25 }
 0x374   : > { %v1138_v28 = vsel %vm865_vm8, %v1137_v24, %v1120_v9  ;;  %v1149_v29 = vrot.slane %v1136_v23, 4  ;;  %v1152_v30 = vsel %vm865_vm8, %v1136_v23, %v1151_v22 }
 0x375   : > { %v1144_v33 = vperm.slane %v1138_v28, %v2638_v25  ;;  %v1160_v34 = vperm.slane %v1152_v30, %v2638_v25  ;;  %v1163_v35 = vrot.slane %v1148_v27, 4  ;;  %1332 = vadd.xlane.f32.xlu0 %v1331_v32 }
 0x376   : > { %v1150_v36 = vsel %vm865_vm8, %v1149_v29, %v1124_v14 }
 0x377   : > { %v1156_v31 = vperm.slane %v1150_v36, %v2638_v25  ;;  %v1161_v37 = vrot.slane %v1144_v33, 4  ;;  %v1164_v38 = vsel %vm865_vm8, 0.0, %v1163_v35  ;;  %v1167_v39 = vrot.slane %v1160_v34, 4 }
 0x378   : > { %v1169_v40 = vsel %vm865_vm8, %v1163_v35, %v1144_v33  ;;  %v1174_v41 = vrot.slane %v1164_v38, 4 }
 0x379   : > { %v1162_v42 = vsel %vm865_vm8, 0.0, %v1161_v37  ;;  %v1165_v43 = vrot.slane %v1156_v31, 4  ;;  %v1168_v44 = vsel %vm865_vm8, 0.0, %v1167_v39  ;;  %v1173_v45 = vperm.slane %v1169_v40, %v2630_v11 }
 0x37a   : > { %v1175_v46 = vsel %vm865_vm8, %v1174_v41, %v1162_v42  ;;  %v1180_v47 = vsel %vm865_vm8, %v1167_v39, %v1156_v31  ;;  %v1185_v48 = vrot.slane %v1168_v44, 4 }
 0x37b   : > { %v1166_v49 = vsel %vm865_vm8, 0.0, %v1165_v43  ;;  %v1179_v50 = vperm.slane %v1175_v46, %v2630_v11  ;;  %v1193_v51 = vrot.slane %v1173_v45, 4  ;;  %v1184_v52 = vperm.slane %v1180_v47, %v2630_v11 }
 0x37c   : > { %v1186_v53 = vsel %vm865_vm8, %v1185_v48, %v1166_v49 }
 0x37d   : > { %v1190_v54 = vperm.slane %v1186_v53, %v2630_v11  ;;  %v1194_v55 = vsel %vm865_vm8, %v1179_v50, %v1193_v51  ;;  %v1205_v57 = vrot.slane %v1184_v52, 4  ;;  %v1191_v61 = vrot.slane %v1179_v50, 4 }
 0x37e   : > { %v1202_v58 = vperm.slane %v1194_v55, %v2638_v25 }
 0x37f   : > { %v1206_v59 = vsel %vm865_vm8, %v1190_v54, %v1205_v57  ;;  %v1192_v60 = vsel %vm865_vm8, %v1191_v61, %v1173_v45  ;;  %v1203_v0 = vrot.slane %v1190_v54, 4 }
 0x380   : > { %v1214_v1 = vperm.slane %v1206_v59, %v2638_v25  ;;  %v1221_v3 = vrot.slane %v1202_v58, 4  ;;  %v1198_v4 = vperm.slane %v1192_v60, %v2638_v25 }
 0x381   : > { %v1204_v5 = vsel %vm865_vm8, %v1203_v0, %v1184_v52 }
 0x382   : > { %v1222_v7 = vsel %vm865_vm8, %v1214_v1, %v1221_v3  ;;  %v1219_v8 = vrot.slane %v1214_v1, 4  ;;  %v1210_v9 = vperm.slane %v1204_v5, %v2638_v25  ;;  %v1217_v12 = vrot.slane %v1198_v4, 4 }
 0x383   : > { %v1226_v62 = vpack.c.bf16 %v1222_v7, %v1222_v7 }
 0x384   : > { %v1220_v13 = vsel %vm865_vm8, %v1219_v8, %v1202_v58  ;;  %v1218_v14 = vsel %vm865_vm8, %v1210_v9, %v1217_v12  ;;  %v1215_v15 = vrot.slane %v1210_v9, 4 }
 0x385   : > { %v1414_v16 = vsel %vm1355_vm10, %v1226_v62, 0  ;;  %v1225_v17 = vpack.c.bf16 %v1220_v13, %v1220_v13  ;;  %v1224_v18 = vpack.c.bf16 %v1218_v14, %v1218_v14 }
 0x386   : > { %1423 = vmatpush.bf16.msra.mxu2 %v1414_v16  ;;  %v1216_v19 = vsel %vm865_vm8, %v1215_v15, %v1198_v4 }
 0x387   : > { %v1395_v21 = vsel %vm1355_vm10, %v1225_v17, 0  ;;  %v1376_v22 = vsel %vm1355_vm10, %v1224_v18, 0  ;;  %v1223_v23 = vpack.c.bf16 %v1216_v19, %v1216_v19 }
 0x388   : > { %1404 = vmatpush.bf16.msra.mxu1 %v1395_v21  ;;  %1385 = vmatpush.bf16.msra.mxu0 %v1376_v22 }
 0x389   : > { %v1357_v24 = vsel %vm1355_vm10, %v1223_v23, 0 }
 0x38a   : > { %1366 = vmatpush.bf16.msrb.mxu3 %v1357_v24 }
 0x3d4   : > { %v1336_v26 = vpop.xlane.xlu1 %1335 }
 0x3d5   : > { %2140 = vrcp.f32 %v1336_v26 }
 0x3db   : > { %v2141_v27 = vpop.eup %2140  ;;  %v1339_v28 = vpop.xlane.xlu2 %1338 }
 0x3dc   : > { %v1346_v29 = vmul.f32 %v2141_v27, %v2733_v56  ;;  %2142 = vrcp.f32 %v1339_v28 }
 0x3de   : > { %v1350_v30 = vpack.c.bf16 %v1346_v29, %v1346_v29 }
 0x3e0   : > { %v1330_v32 = vpop.xlane.xlu0 %1329  ;;  %1953 = vmatmul.msk.bf16.vlgmr.msra.gmra.mxu1 %vm1227_vm9, %v1350_v30 }
 0x3e1   : > { %2144 = vrcp.f32 %v1330_v32 }
 0x3e2   : > { %v2143_v33 = vpop.eup %2142 }
 0x3e3   : > { %v1347_v34 = vmul.f32 %v2143_v33, %v2737_v63 }
 0x3e5   : > { %v1351_v35 = vpack.c.bf16 %v1347_v34, %v1347_v34 }
 0x3e7   : > { %v2145_v36 = vpop.eup %2144  ;;  %1954 = vmatmul.msk.bf16.vlgmr.msra.gmra.mxu2 %vm1227_vm9, %v1351_v35 }
 0x3e8   : > { %v1344_v31 = vmul.f32 %v2145_v36, %v2741_v6  ;;  %v1333_v37 = vpop.xlane.xlu0 %1332 }
 0x3e9   : > { %2146 = vrcp.f32 %v1333_v37 }
 0x3ea   : > { %v1348_v38 = vpack.c.bf16 %v1344_v31, %v1344_v31 }
 0x3ec   : > { %1951 = vmatmul.msk.bf16.vlgmr.msrb.gmra.mxu3 %vm1227_vm9, %v1348_v38 }
 0x3ef   : > { %v2147_v56 = vpop.eup %2146 }
 0x3f0   : > { %v1345_v39 = vmul.f32 %v2147_v56, %v2751_v20 }
 0x3f2   : > { %v1349_v40 = vpack.c.bf16 %v1345_v39, %v1345_v39 }
 0x3f4   : > { %1952 = vmatmul.msk.bf16.vlgmr.msra.gmra.mxu0 %vm1227_vm9, %v1349_v40 }
 0x45d   : > { %v1406_v41 = vpop.f32.mrf.mxu1 }
 0x45e   : > { %v1429_v43 = vrot.slane %v1406_v41, 4 }
 0x465   : > { %v1408_v42 = vpop.f32.mrf.mxu1 }
 0x46a   : > { %v1425_v63 = vpop.f32.mrf.mxu2 }
 0x46b   : > { %v1441_v45 = vrot.slane %v1425_v63, 4 }
 0x46f   : > { %v1368_v44 = vpop.f32.mrf.mxu3 }
 0x470   : > { %v1430_v46 = vsel %vm865_vm8, %v1429_v43, %v1368_v44  ;;  %v1431_v6 = vrot.slane %v1368_v44, 4 }
 0x471   : > { %v1436_v47 = vperm.slane %v1430_v46, %v2630_v11  ;;  %v1387_v48 = vpop.f32.mrf.mxu0 }
 0x472   : > { %v1432_v49 = vsel %vm865_vm8, %v1406_v41, %v1431_v6  ;;  %v1442_v50 = vsel %vm865_vm8, %v1441_v45, %v1387_v48  ;;  %v1443_v20 = vrot.slane %v1387_v48, 4  ;;  %v1427_v51 = vpop.f32.mrf.mxu2  ;;  %v2002_v48 = vld [vmem:[#allocation7 + $0x8] sm:$0xff] }
 0x473   : > { %v1440_v52 = vperm.slane %v1432_v49, %v2630_v11  ;;  %v1455_v53 = vrot.slane %v1436_v47, 4  ;;  %v1448_v54 = vperm.slane %v1442_v50, %v2630_v11  ;;  %1586 = vmatpush.bf16.msra.mxu3 %v2002_v48  ;;  %v2001_v49 = vld [vmem:[#allocation7] sm:$0xff] }
 0x474   : > { %v1444_v55 = vsel %vm865_vm8, %v1425_v63, %v1443_v20 }
 0x475   : > { %v1467_v57 = vrot.slane %v1440_v52, 4  ;;  %v1452_v61 = vperm.slane %v1444_v55, %v2630_v11  ;;  %v1453_v58 = vrot.slane %v1448_v54, 4  ;;  %v1456_v59 = vsel %vm865_vm8, %v1448_v54, %v1455_v53  ;;  %v2121_v55 = vld [vmem:[%s2930_s11] ss:$0 sm:$0xff] }
 0x476   : > { %v1464_v60 = vperm.slane %v1456_v59, %v2638_v25 }
 0x477   : > { %v1454_v0 = vsel %vm865_vm8, %v1453_v58, %v1436_v47  ;;  %v1465_v1 = vrot.slane %v1452_v61, 4  ;;  %v1468_v3 = vsel %vm865_vm8, %v1452_v61, %v1467_v57  ;;  %v1370_v4 = vpop.f32.mrf.mxu3  ;;  %1587 = vmatpush.bf16.msra.mxu3 %v2001_v49 }
 0x478   : > { %v1460_v5 = vperm.slane %v1454_v0, %v2638_v25  ;;  %v1476_v7 = vperm.slane %v1468_v3, %v2638_v25  ;;  %v1479_v8 = vrot.slane %v1464_v60, 4 }
 0x479   : > { %v1466_v9 = vsel %vm865_vm8, %v1465_v1, %v1440_v52  ;;  %v1389_v12 = vpop.f32.mrf.mxu0 }
 0x47a   : > { %v1472_v62 = vperm.slane %v1466_v9, %v2638_v25  ;;  %v1477_v13 = vrot.slane %v1460_v5, 4  ;;  %v1480_v14 = vsel %vm865_vm8, 0.0, %v1479_v8  ;;  %v1483_v15 = vrot.slane %v1476_v7, 4  ;;  %v2004_v7 = vld [vmem:[#allocation8 + $0x8] sm:$0xff] }
 0x47b   : > { %v1485_v16 = vsel %vm865_vm8, %v1479_v8, %v1460_v5  ;;  %v1490_v17 = vrot.slane %v1480_v14, 4  ;;  %1656 = vmatpush.bf16.msrb.mxu0 %v2004_v7  ;;  %v2003_v8 = vld [vmem:[#allocation8] sm:$0xff] }
 0x47c   : > { %v1478_v18 = vsel %vm865_vm8, 0.0, %v1477_v13  ;;  %v1481_v19 = vrot.slane %v1472_v62, 4  ;;  %v1484_v21 = vsel %vm865_vm8, 0.0, %v1483_v15  ;;  %v1489_v22 = vperm.slane %v1485_v16, %v2630_v11 }
 0x47d   : > { %v1501_v23 = vrot.slane %v1484_v21, 4  ;;  %v1491_v24 = vsel %vm865_vm8, %v1490_v17, %v1478_v18  ;;  %v1496_v26 = vsel %vm865_vm8, %v1483_v15, %v1472_v62  ;;  %v2122_v18 = vld [vmem:[%s2931_s12] ss:$0 sm:$0xff] }
 0x47e   : > { %v1482_v27 = vsel %vm865_vm8, 0.0, %v1481_v19  ;;  %v1495_v28 = vperm.slane %v1491_v24, %v2630_v11  ;;  %v1500_v29 = vperm.slane %v1496_v26, %v2630_v11  ;;  %v1509_v30 = vrot.slane %v1489_v22, 4  ;;  %v2124_v26 = vld [vmem:[%s2934_s15] ss:$0 sm:$0xff] }
 0x47f   : > { %v1502_v32 = vsel %vm865_vm8, %v1501_v23, %v1482_v27  ;;  %1657 = vmatpush.bf16.msrb.mxu0 %v2003_v8 }
 0x480   : > { %v1506_v33 = vperm.slane %v1502_v32, %v2630_v11  ;;  %v1510_v34 = vsel %vm865_vm8, %v1495_v28, %v1509_v30  ;;  %v1521_v35 = vrot.slane %v1500_v29, 4  ;;  %v1507_v36 = vrot.slane %v1495_v28, 4 }
 0x481   : > { %v1518_v31 = vperm.slane %v1510_v34, %v2638_v25 }
 0x482   : > { %v1522_v37 = vsel %vm865_vm8, %v1506_v33, %v1521_v35  ;;  %v1508_v38 = vsel %vm865_vm8, %v1507_v36, %v1489_v22  ;;  %v1519_v56 = vrot.slane %v1506_v33, 4 }
 0x483   : > { %v1530_v39 = vperm.slane %v1522_v37, %v2638_v25  ;;  %v1537_v40 = vrot.slane %v1518_v31, 4  ;;  %v1514_v41 = vperm.slane %v1508_v38, %v2638_v25  ;;  %v2008_v37 = vld [vmem:[%s2975_s29 + $0x18] sm:$0xff] }
 0x484   : > { %v1520_v42 = vsel %vm865_vm8, %v1519_v56, %v1500_v29  ;;  %1752 = vmatpush.bf16.msrb.mxu1 %v2008_v37 }
 0x485   : > { %v1538_v11 = vsel %vm865_vm8, %v1530_v39, %v1537_v40  ;;  %v1535_v63 = vrot.slane %v1530_v39, 4  ;;  %v1526_v43 = vperm.slane %v1520_v42, %v2638_v25  ;;  %v1533_v44 = vrot.slane %v1514_v41, 4  ;;  %v2007_v40 = vld [vmem:[%s2976_s2 + $0x10] sm:$0xff] }
 0x486   : > { %1548 = vrot.lane.b32.xlu1 %v1538_v11, %s2376_s27  ;;  %s1777_s27 = sshll.u32 %s668_s22, 4  ;;  %s1778_s27 = int_to_ptr.vmem [resolvable:$true] %s1777_s27 }
 0x487   : > { %v1536_v45 = vsel %vm865_vm8, %v1535_v63, %v1518_v31  ;;  %v1531_v46 = vrot.slane %v1526_v43, 4  ;;  %v1534_v6 = vsel %vm865_vm8, %v1526_v43, %v1533_v44  ;;  %v2006_v63 = vld [vmem:[%s2976_s2 + $0x8] sm:$0xff] }
 0x488   : > { %1544 = vrot.lane.b32.xlu0 %v1536_v45, %s2377_s20  ;;  %1540 = vrot.lane.b32.xlu2 %v1534_v6, %s2378_s23  ;;  %v2005_v45 = vld [vmem:[%s2976_s2] sm:$0xff]  ;;  %s1779_s20 = sshll.u32 %s1775_s26, 4  ;;  %s1780_s20 = int_to_ptr.hbm [resolvable:$true] %s1779_s20 }
 0x489   : > { %v1532_v47 = vsel %vm865_vm8, %v1531_v46, %v1514_v41  ;;  %1753 = vmatpush.bf16.msrb.mxu1 %v2007_v40  ;;  %s2286_s23 = sshra.s32 %s1780_s20, 4  ;;  %s2287_s23 = int_to_ptr.hbm [resolvable:$true] %s2286_s23 }
 0x48a   : > { %s2288_s0 = scalar_lea.hbm %s2287_s23, 8  ;;  %p2293_p5 = scmp.lt.s32.totalorder %s2287_s23, %s2980_s25 }
 0x48b   : > { %p2289_p1 = scmp.ne.s32.totalorder %s2287_s23, %s2288_s0  ;;  %p2294_p6 = scmp.lt.s32.totalorder %s2292_s1, %s2288_s0 }
 0x48d   : > { %1754 = vmatpush.bf16.msrb.mxu1 %v2006_v63  ;;  %p2290_p2 = pnand %p2289_p1, %p2514_p4  ;;  %p2295_p7 = por %p2294_p6, %p2293_p5 }
 0x48f   : > { %p2291_p3 = pneg %p2290_p2 }
 0x491   : > { %1755 = vmatpush.bf16.msrb.mxu1 %v2005_v45  ;;  %p2296_p9 = pnand %p2295_p7, %p2291_p3 }
 0x4e2   : > { %v1541_v50 = vpop.permute.xlu2 %1540 }
 0x4e3   : > { %v1551_v25 = vsel %vm1227_vm9, %v1532_v47, %v1541_v50 }
 0x4f8   : > { %v1549_v51 = vpop.permute.xlu1 %1548 }
 0x4fa   : > { %v1545_v20 = vpop.permute.xlu0 %1544 }
 0x4fb   : > { %v1553_v52 = vsel %vm1552_vm11, %v1551_v25, %v1545_v20 }
 0x4fc   : > { %v1555_v53 = vsel %vm1554_vm12, %v1553_v52, %v1549_v51 }
 0x4fd   : > { %v1556_v54 = vpack.c.bf16 %v1555_v53, %v1555_v53 }
 0x4ff   : > { %1963 = vmatmul.msk.bf16.vlgmr.msra.gmra.mxu3 %vm683_vm0, %v1556_v54 }
 0x582   : > { %v1589_v57 = vpop.f32.mrf.mxu3 }
 0x583   : > { %v1590_v61 = vadd.f32 %v2121_v55, %v1589_v57 }
 0x585   : > { %v2847_v58 = vadd.f32 %v1590_v61, %v2588_v2 }
 0x587   : > { %v1594_v59 = vsel %vm683_vm0, %v2847_v58, 0.0 }
 0x588   : > { %1595 = vadd.xlane.f32.xlu0 %v1594_v59 }
 0x58a   : > { %v1591_v60 = vpop.f32.mrf.mxu3 }
 0x5fb   : > { %v1596_v0 = vpop.xlane.xlu0 %1595 }
 0x5fc   : > { %v1597_v1 = vmul.f32 %v1596_v0, %v2592_v10 }
 0x5fe   : > { %v1598_v3 = vsub.f32 %v2847_v58, %v1597_v1 }
 0x600   : > { %v1599_v4 = vmul.f32 %v1598_v3, %v1598_v3 }
 0x602   : > { %v1600_v5 = vsel %vm683_vm0, %v1599_v4, 0.0 }
 0x603   : > { %1601 = vadd.xlane.f32.xlu2 %v1600_v5 }
 0x676   : > { %v1602_v2 = vpop.xlane.xlu2 %1601 }
 0x677   : > { %v1603_v9 = vmul.f32 %v1602_v2, %v2592_v10  ;;  %v2123_v10 = vld [vmem:[%s2932_s13] ss:$0 sm:$0xff] }
 0x679   : > { %v1604_v12 = vadd.f32 1e-05, %v1603_v9  ;;  %v2125_v9 = vld [vmem:[%s2978_s16] ss:$0 sm:$0xff] }
 0x67b   : > { %2148 = vrsqrt.f32 %v1604_v12  ;;  %vm1611_vm14 = vweird.f32 %v1604_v12 }
 0x681   : > { %v2149_v62 = vpop.eup %2148 }
 0x682   : > { %v1606_v13 = vmul.f32 %v2149_v62, %v1604_v12  ;;  %vm1612_vm13 = vweird.f32 %v2149_v62 }
 0x683   : > { %vm1613_vm15 = vmor %vm1611_vm14, %vm1612_vm13 }
 0x684   : > { %v1607_v14 = vmul.f32 %v2149_v62, %v1606_v13 }
 0x686   : > { %v1608_v15 = vmul.f32 0.5, %v1607_v14 }
 0x688   : > { %v1609_v16 = vsub.f32 1.5, %v1608_v15 }
 0x68a   : > { %v1610_v17 = vmul.f32 %v2149_v62, %v1609_v16 }
 0x68c   : > { %v1614_v19 = vsel %vm1613_vm15, %v2149_v62, %v1610_v17 }
 0x68d   : > { %v1615_v21 = vmul.f32 %v1614_v19, %v1598_v3 }
 0x68f   : > { %v1620_v22 = vmul.f32 %v2122_v18, %v1615_v21 }
 0x691   : > { %v1625_v23 = vadd.f32 %v2123_v10, %v1620_v22 }
 0x693   : > { %v1626_v24 = vpack.c.bf16 %v1625_v23, %v1625_v23 }
 0x695   : > { %1972 = vmatmul.msk.bf16.vlgmr.msrb.gmra.mxu0 %vm683_vm0, %v1626_v24 }
 0x712   : > { %v1659_v27 = vpop.f32.mrf.mxu0 }
 0x713   : > { %v1660_v28 = vadd.f32 %v2124_v26, %v1659_v27 }
 0x715   : > { %v1664_v29 = vmul.f32 0.70710677, %v1660_v28  ;;  %v1663_v5 = vmul.f32 0.5, %v1660_v28 }
 0x717   : > { %v1665_v30 = vmul.f32 %v1664_v29, %v1664_v29 }
 0x719   : > { %v1666_v32 = vmin.f32 %v1665_v30, 16.0 }
 0x71a   : > { %v1661_v33 = vpop.f32.mrf.mxu0 }
 0x71b   : > { %v1667_v34 = vmul.f32 2.1237322e-06, %v1666_v32  ;;  %v1678_v35 = vmul.f32 3.8918573e-05, %v1666_v32 }
 0x71d   : > { %v1668_v36 = vadd.f32 0.00028619796, %v1667_v34  ;;  %v1679_v31 = vadd.f32 0.001143296, %v1678_v35 }
 0x71f   : > { %v1669_v38 = vmul.f32 %v1668_v36, %v1666_v32  ;;  %v1680_v56 = vmul.f32 %v1679_v31, %v1666_v32 }
 0x721   : > { %v1681_v39 = vadd.f32 0.014752088, %v1680_v56  ;;  %v1670_v41 = vadd.f32 0.0036580483, %v1669_v38 }
 0x723   : > { %v1682_v42 = vmul.f32 %v1681_v39, %v1666_v32  ;;  %v1671_v43 = vmul.f32 %v1670_v41, %v1666_v32 }
 0x725   : > { %v1683_v11 = vadd.f32 0.112945676, %v1682_v42  ;;  %v1672_v6 = vadd.f32 0.05243302, %v1671_v43 }
 0x727   : > { %v1684_v44 = vmul.f32 %v1683_v11, %v1666_v32  ;;  %v1673_v49 = vmul.f32 %v1672_v6, %v1666_v32 }
 0x729   : > { %v1685_v46 = vadd.f32 0.4994258, %v1684_v44  ;;  %v1674_v50 = vadd.f32 0.18741608, %v1673_v49 }
 0x72b   : > { %v1686_v47 = vmul.f32 %v1685_v46, %v1666_v32  ;;  %v1675_v20 = vmul.f32 %v1674_v50, %v1666_v32 }
 0x72d   : > { %v1687_v48 = vadd.f32 1.0, %v1686_v47  ;;  %v1676_v54 = vadd.f32 1.1283791, %v1675_v20 }
 0x72f   : > { %2150 = vrcp.f32 %v1687_v48  ;;  %v1699_v53 = vand.u32 2147483648, %v1687_v48  ;;  %v1697_v57 = vand.u32 2147483647, %v1687_v48  ;;  %vm1693_vm2 = vweird.f32 %v1687_v48 }
 0x730   : > { %v1677_v60 = vmul.f32 %v1676_v54, %v1664_v29 }
 0x731   : > { %v1700_v59 = vor.u32 1.1754944e-38, %v1699_v53  ;;  %vm1698_vm4 = vcmp.eq.f32.partialorder %v1697_v57, 8.507059e+37 }
 0x735   : > { %v2151_v25 = vpop.eup %2150 }
 0x736   : > { %v1689_v51 = vmul.f32 %v2151_v25, %v1687_v48  ;;  %vm1694_vm1 = vweird.f32 %v2151_v25 }
 0x737   : > { %vm1695_vm3 = vmor %vm1693_vm2, %vm1694_vm1 }
 0x738   : > { %v1690_v52 = vsub.f32 1.0, %v1689_v51 }
 0x73a   : > { %v1691_v55 = vmul.f32 %v2151_v25, %v1690_v52 }
 0x73c   : > { %v1692_v61 = vadd.f32 %v2151_v25, %v1691_v55 }
 0x73e   : > { %v1696_v0 = vsel %vm1695_vm3, %v2151_v25, %v1692_v61 }
 0x73f   : > { %v1701_v1 = vsel %vm1698_vm4, %v1700_v59, %v1696_v0 }
 0x740   : > { %v1702_v3 = vmul.f32 %v1701_v1, %v1677_v60 }
 0x742   : > { %v1973_v4 = vclamps-f32 %v1702_v3, 1.0 }
 0x744   : > { %v1705_v7 = vadd.f32 1.0, %v1973_v4 }
 0x746   : > { %v1706_v8 = vmul.f32 %v1705_v7, %v1663_v5 }
 0x748   : > { %v1707_v2 = vpack.c.bf16 %v1706_v8, %v1706_v8 }
 0x74a   : > { %1990 = vmatmul.msk.bf16.vlgmr.msrb.gmra.mxu1 %vm1744_vm5, %v1707_v2 }
 0x7c7   : > { %v1757_v12 = vpop.f32.mrf.mxu1 }
 0x7c8   : > { %v1758_v62 = vadd.f32 %v2125_v9, %v1757_v12 }
 0x7ca   : > { %v1761_v13 = vadd.f32 %v1758_v62, %v2847_v58 }
 0x7cc   : > { %1762 = vst.msk [vmem:[%s668_s22] sm:$0xff] %vm683_vm0, %v1761_v13 }
 0x7cd   : > { %2299 = shalt.err (!%p2296_p9)
}
 0x7ce   : > { %2025 = dma.vmem_to_hbm [thread:$0]  (%p2514_p4), %s1778_s27, 128, %s1780_s20, %s1764_s30  }
 0x7cf   : > { %v1759_v58 = vpop.f32.mrf.mxu1 }
 0x7d0 PF: > { %s2982_s21 = sld [smem:[#allocation19_spill]] }
 0x7d1   : > { %s2983_s17 = sld [smem:[#allocation15_spill]] }
 0x7d6   : > { %p2052_p10 = scmp.ge.s32.totalorder %s2982_s21, 2 }
 0x7d7   : > { %s1791_s28 = sand.u32 1, %s2983_s17  }
 0x7d8   : > { %p2041_p11 = pnand %p2052_p10, %p2521_p8  ;;  %s1792_s26 = scalar_lea.sflag [#allocation4], %s1791_s28 }
 0x7da   : > { %p2042_p12 = pneg %p2041_p11 }
 0x7dc   : > { %2337 = dma.done.wait (%p2042_p12), %s1792_s26, 128  }
 0x7dd   : > { %2339 = vsyncadd (%p2042_p12), %s1792_s26, 4294967168  ;;  %s34_s19 = sadd.s32 1, %s2982_s21   ;;  %s2985_s27 = sld [smem:[#allocation16_spill]] }
 0x7de   : > { %p31_p13 = scmp.ge.s32.totalorder %s34_s19, 4   ;;  %s2986_s28 = sld [smem:[#allocation17_spill]] }
 0x7df   : > { %s2987_s29 = sld [smem:[#allocation23_spill]] }
 0x7e0   : > { %s2988_s30 = sld [smem:[#allocation18_spill]]  ;;  %33 = sbr.rel (!%p31_p13) target bundleno = 15 (0xf), region = 147 }
 0x7e1   : > { %s2989_s0 = sld [smem:[#allocation20_spill]] }
 0x7e5   :  { %1798 = vsyncpa [#allocation3], 1 }
 0x7e6   :  { %1800 = vsyncpa [#allocation3 + $0x1], 1 }
 0x7e7   :  { %1801 = vsyncpa [#allocation6], 1 }
 0x7e8   :  { %1802 = vsyncpa [#allocation9], 1 }
 0x7e9   :  { %1803 = vsyncpa [#allocation4], 1 }
 0x7ea   :  { %1805 = vsyncpa [#allocation4 + $0x1], 1 }

</bundles_post_ra>
